<compile_context>
chip_gen: v7x
topology: tpu7x:2x2x1
jax: 0.10.0
libtpu: 0.0.40
codegen_flags: <defaults>
</compile_context>

<pallas_src>
import functools

import jax
import jax.numpy as jnp
from jax import lax
from jax.experimental import pallas as pl
from jax.experimental.pallas import tpu as pltpu


def _round_up(x, m):
    return (x + m - 1) // m * m


# ============================================================================
# Kernel 1: fused LayerNorm + FeatureCrossing stack + FeatureAttention + gate.
# One grid step processes BB batch elements; batch is folded into the matmul
# M dimension everywhere the math allows it.
# ============================================================================
def _fused_features_kernel(BB, S, D, N0, keep,
                           scal_ref, x_ref, p_ref, lnwb_ref, qk_ref, w3_ref,
                           wfa_ref, e_ref, xg_ref, aux_ref):
    SD = S * D
    DQ = D // 2
    L = len(keep)
    NT = sum(keep) + N0
    AUXR = aux_ref.shape[1]
    f32 = jnp.float32
    bf16 = jnp.bfloat16

    # ---- BertLayerNorm over the embed dim on the lane-dense (BB*N0, SD) slab.
    # P = kron(I_S, ones(D,D)/D) turns "mean over each D segment, broadcast
    # back" into one MXU matmul.  Kept in f32 (eps=1e-12 accuracy).
    x = x_ref[...]                                                 # (BB*N0, SD)
    P = p_ref[...]
    u = jnp.dot(x, P, preferred_element_type=f32)
    xc = x - u
    var = jnp.dot(xc * xc, P, preferred_element_type=f32)
    lnw = lnwb_ref[0:1, :]
    lnb = lnwb_ref[1:2, :]
    x0 = xc * lax.rsqrt(var + 1e-12) * lnw + lnb                   # (BB*N0, SD)

    x0_bf = x0.astype(bf16)
    x0_3d = x0.reshape(BB, N0, SD)

    # ---- all-layer queries hoisted into a single wide bf16 MXU dot ---------
    qk = qk_ref[...]                                               # (SD, 2*L*DQ)
    q_all = jnp.dot(x0_bf, qk[:, :L * DQ], preferred_element_type=f32)
    q_all = q_all.reshape(BB, N0, L * DQ)

    w3_all = w3_ref[...]                                           # (L,N0,mn,mr)

    hi_2d = x0                                                     # (BB*rf, SD)
    hi_3d = x0_3d                                                  # (BB, rf, SD)
    hs = []
    attns = []
    rf = N0
    for l, nr1 in enumerate(keep):
        gamma = scal_ref[l]

        # key of this layer (confuse_hi + key 1x1 conv fused into one matmul)
        kmat = qk[:, (L + l) * DQ:(L + l + 1) * DQ]                 # (SD, DQ)
        key = jnp.dot(hi_2d.astype(bf16), kmat, preferred_element_type=f32)
        key = key.reshape(BB, rf, DQ)
        q_l = q_all[:, :, l * DQ:(l + 1) * DQ]                      # (BB, N0, DQ)

        energy = jnp.einsum('bnd,brd->bnr', q_l.astype(bf16), key.astype(bf16),
                            preferred_element_type=f32)             # (BB,N0,rf)
        m = jnp.max(energy, axis=-1, keepdims=True)
        p = jnp.exp(energy - m)
        attn = p / jnp.sum(p, axis=-1, keepdims=True)                # exact
        attns.append(attn)

        # value + pfs collapsed into ONE batched MXU contraction per layer
        scale = 1.0 + gamma * attn                                   # (BB,N0,rf)
        w3 = w3_all[l, :, :nr1, :rf]                                 # (N0,nr1,rf)
        A = (w3[None, :, :, :] * scale[:, :, None, :]).reshape(BB, N0 * nr1, rf)
        V = jnp.einsum('bmr,brs->bms', A.astype(bf16), hi_3d.astype(bf16),
                       preferred_element_type=f32)                   # (BB,N0*nr1,SD)
        hi_3d = jnp.sum(V.reshape(BB, N0, nr1, SD) * x0_3d[:, :, None, :],
                        axis=1)                                      # (BB,nr1,SD)
        hi_2d = hi_3d.reshape(BB * nr1, SD)
        hs.append(hi_3d)
        rf = nr1

    hs.append(x0_3d)                                # NT = sum(keep) + N0 rows

    # ---- FeatureAttention: ONE stacked (BB*NT, SD) x (SD, S) dot -----------
    X3 = jnp.concatenate(hs, axis=1)                                 # (BB,NT,SD)
    X2 = X3.reshape(BB * NT, SD)
    sc = jnp.dot(X2.astype(bf16), wfa_ref[...], preferred_element_type=f32)
    sc3 = sc.reshape(BB, NT, S)
    m = jnp.max(jnp.max(sc3, axis=2, keepdims=True), axis=1, keepdims=True)
    p3 = jnp.exp(sc3 - m)
    den = jnp.sum(jnp.sum(p3, axis=2, keepdims=True), axis=1, keepdims=True)
    f3 = p3 / den                                                    # (BB,NT,S)

    # ---- gated residual: ONE (BB*NT,S)x(S,SD) lane-expansion dot, then a
    # single lane-dense store of all feature chunks.
    gtop = scal_ref[L]
    g2 = jnp.dot(f3.reshape(BB * NT, S).astype(bf16), e_ref[...],
                 preferred_element_type=f32)                         # (BB*NT,SD)
    xg_ref[...] = X2 * (1.0 + gtop * g2)

    # ---- pack all small outputs into one lane-dense aux slab (1 DMA) -------
    aux_ref[...] = jnp.zeros((BB, AUXR, SD), f32)
    rf = N0
    for l in range(L):
        aux_ref[:, l * N0:(l + 1) * N0, 0:rf] = attns[l]
        rf = keep[l]
    aux_ref[:, L * N0:L * N0 + NT, 0:S] = f3


def fused_features(x_fm2, scalars, P, ln_wb, qk, w3_all, wfa, E,
                   *, S, D, N0, keep, B):
    SD = S * D
    L = len(keep)
    NT = sum(keep) + N0
    BB = B if B <= 8 else 8                 # whole (small) batch per grid step
    B_pad = _round_up(B, BB)
    if B_pad != B:
        x_fm2 = jnp.pad(x_fm2, ((0, (B_pad - B) * N0), (0, 0)))
    AUXR = _round_up(L * N0 + NT, 8)
    grid = (B_pad // BB,)

    kernel = functools.partial(_fused_features_kernel, BB, S, D, N0, tuple(keep))
    # TODO(synk): set vmem_limit_bytes explicitly before scaling NT/S/D
    # (v7x has only 64 MiB physical VMEM); today's footprint is < 1 MiB.
    xg, aux = pl.pallas_call(
        kernel,
        out_shape=(jax.ShapeDtypeStruct((B_pad * NT, SD), jnp.float32),
                   jax.ShapeDtypeStruct((B_pad, AUXR, SD), jnp.float32)),
        grid=grid,
        in_specs=[
            pl.BlockSpec(memory_space=pltpu.MemorySpace.SMEM),       # gammas
            pl.BlockSpec((BB * N0, SD), lambda i: (i, 0)),           # raw feats
            pl.BlockSpec((SD, SD), lambda i: (0, 0)),                # LN avg mat
            pl.BlockSpec((2, SD), lambda i: (0, 0)),                 # LN w | b
            pl.BlockSpec(qk.shape, lambda i: (0, 0)),                # q|k convs
            pl.BlockSpec(w3_all.shape, lambda i: (0, 0, 0, 0)),      # pfs weights
            pl.BlockSpec(wfa.shape, lambda i: (0, 0)),               # feat-attn
            pl.BlockSpec(E.shape, lambda i: (0, 0)),                 # lane expand
        ],
        out_specs=(
            pl.BlockSpec((BB * NT, SD), lambda i: (i, 0)),           # gated feats
            pl.BlockSpec((BB, AUXR, SD), lambda i: (i, 0, 0)),       # aux slab
        ),
        compiler_params=pltpu.CompilerParams(
            dimension_semantics=("parallel",)),
    )(scalars, x_fm2, P, ln_wb, qk, w3_all, wfa, E)
    return xg, aux


# ============================================================================
# Kernel 2: fcLayer  Linear(Nin,256) -> PReLU -> Linear(256,nclass)
# grid = (hidden blocks ["parallel", v7x 2-TC split], K blocks ["arbitrary"]),
# bf16 weight streaming, f32 VMEM accumulator, partial logits summed outside.
# ============================================================================
def _mlp_kernel(a_ref, x_ref, w1_ref, b1_ref, w2_ref, o_ref, acc_ref):
    k = pl.program_id(1)

    @pl.when(k == 0)
    def _():
        acc_ref[...] = jnp.zeros_like(acc_ref)

    acc_ref[...] += jnp.dot(x_ref[...].astype(jnp.bfloat16), w1_ref[...],
                            preferred_element_type=jnp.float32)

    @pl.when(k == pl.num_programs(1) - 1)
    def _():
        h = acc_ref[...] + b1_ref[...]
        a = a_ref[0]
        h = jnp.where(h > 0, h, a * h)                               # PReLU
        o_ref[0] = jnp.dot(h.astype(jnp.bfloat16), w2_ref[...],
                           preferred_element_type=jnp.float32)


def mlp(x_flat, w1_bf16, b1, a_prelu, w2_bf16, b2):
    B, Nin = x_flat.shape
    H = w1_bf16.shape[1]
    C = w2_bf16.shape[1]
    TH = 128 if H % 128 == 0 else H
    nh = H // TH
    nk = 2 if Nin % 256 == 0 else 1          # K-tiling of the fc1 contraction
    TK = Nin // nk

    out = pl.pallas_call(
        _mlp_kernel,
        out_shape=jax.ShapeDtypeStruct((nh, B, C), jnp.float32),
        grid=(nh, nk),
        in_specs=[
            pl.BlockSpec(memory_space=pltpu.MemorySpace.SMEM),       # prelu a
            pl.BlockSpec((B, TK), lambda h, k: (0, k)),              # activations
            pl.BlockSpec((TK, TH), lambda h, k: (k, h)),             # fc1 (bf16)
            pl.BlockSpec((1, TH), lambda h, k: (0, h)),              # fc1 bias
            pl.BlockSpec((TH, C), lambda h, k: (h, 0)),              # fc2 (bf16)
        ],
        out_specs=pl.BlockSpec((1, B, C), lambda h, k: (h, 0, 0)),
        scratch_shapes=[pltpu.VMEM((B, TH), jnp.float32)],
        compiler_params=pltpu.CompilerParams(
            dimension_semantics=("parallel", "arbitrary")),
    )(a_prelu, x_flat, w1_bf16, b1, w2_bf16)
    return jnp.sum(out, axis=0) + b2


# ----------------------------------------------------------------------------
# Parameter construction (deterministic; canonical torch-like layouts).
# ----------------------------------------------------------------------------
def init_params(key, *, seq_len, n_num_feats, cls_feats, embed_dim,
                keep_cross_feats, nclass, hidden=256):
    D, S = embed_dim, seq_len
    N0 = n_num_feats + len(cls_feats)
    DQ = D // 2
    keys = iter(jax.random.split(key, 128))

    def nrm(shape, scale):
        return (scale * jax.random.normal(next(keys), shape)).astype(jnp.float32)

    params = {
        "emb_cls": [nrm((ncls, D), 1.0) for ncls in cls_feats],
        "emb_num": nrm((n_num_feats, D), 1.0),
        "ln_w": jnp.ones((D,), jnp.float32),
        "ln_b": jnp.zeros((D,), jnp.float32),
    }

    cross = []
    rf = N0
    for nr1 in keep_cross_feats:
        cross.append({
            "wch": nrm((S,), 2.0 ** 0.5),                     # Conv2d(S,1,1)
            "wcx": nrm((S,), 2.0 ** 0.5),                     # Conv2d(S,1,1)
            "wq": nrm((DQ, D), (2.0 / DQ) ** 0.5),            # Conv2d(D,D/2,1)
            "wk": nrm((DQ, D), (2.0 / DQ) ** 0.5),            # Conv2d(D,D/2,1)
            "wpfs": nrm((nr1, N0 * rf), (2.0 / nr1) ** 0.5),  # Conv2d(N0*rf,nr1,1)
            "gamma": jnp.zeros((1,), jnp.float32),            # torch: zeros init
        })
        rf = nr1
    params["cross"] = cross

    NT = sum(keep_cross_feats) + N0
    params["w_fa"] = nrm((S, S, D), (2.0 / (D * S)) ** 0.5)   # Conv2d(S,S,(1,D))
    params["gamma_top"] = jnp.zeros((1,), jnp.float32)        # torch: zeros init

    Nin = NT * D * S
    params["fc1_wt"] = nrm((Nin, hidden), 0.02)               # Linear(Nin,256).T
    params["fc1_b"] = jnp.zeros((1, hidden), jnp.float32)
    params["prelu_a"] = jnp.full((1,), 0.25, jnp.float32)     # nn.PReLU default
    params["fc2_wt"] = nrm((hidden, nclass), 0.05)            # Linear(256,ncls).T
    params["fc2_b"] = jnp.zeros((1, nclass), jnp.float32)
    return params


def _prepare_kernel_weights(params, *, S, D, N0, keep):
    """Map canonical (torch-layout) params to the fused-kernel layouts."""
    SD = S * D
    L = len(keep)
    NT = sum(keep) + N0
    eye_s = jnp.eye(S, dtype=jnp.float32)

    qmats, kmats, w3s = [], [], []
    maxn = max(keep)
    maxr = max([N0] + list(keep[:-1]))
    rf = N0
    for nr1, cp in zip(keep, params["cross"]):
        # Fuse confuse_* (weighted sum over s) with query/key 1x1 convs.
        qmats.append(jnp.kron(cp["wcx"].reshape(S, 1), cp["wq"].T))     # (SD,DQ)
        kmats.append(jnp.kron(cp["wch"].reshape(S, 1), cp["wk"].T))     # (SD,DQ)
        w3 = cp["wpfs"].reshape(nr1, N0, rf).transpose(1, 0, 2)          # (N0,nr1,rf)
        w3s.append(jnp.zeros((N0, maxn, maxr), jnp.float32)
                   .at[:, :nr1, :rf].set(w3))
        rf = nr1

    H = params["fc1_wt"].shape[1]
    # fc1 weight re-permuted so it consumes the kernel's (nt, s, d) flatten
    # order instead of torch's (s, nt, d); stored bf16 for halved HBM stream.
    fc1 = params["fc1_wt"].reshape(S, NT, D, H).transpose(1, 0, 2, 3)

    return {
        "P": jnp.kron(eye_s, jnp.full((D, D), 1.0 / D, jnp.float32)),    # (SD,SD)
        "E": jnp.kron(eye_s, jnp.ones((1, D), jnp.float32)).astype(jnp.bfloat16),
        "ln_wb": jnp.stack([jnp.tile(params["ln_w"], S),
                            jnp.tile(params["ln_b"], S)]),               # (2,SD)
        "qk": jnp.concatenate(qmats + kmats, axis=1).astype(jnp.bfloat16),
        "w3_all": jnp.stack(w3s),                                        # (L,N0,mn,mr)
        "wfa": jnp.transpose(params["w_fa"], (1, 2, 0)).reshape(SD, S)
                  .astype(jnp.bfloat16),
        "scalars": jnp.concatenate([cp["gamma"] for cp in params["cross"]]
                                   + [params["gamma_top"]]).astype(jnp.float32),
        "fc1_w": fc1.reshape(NT * S * D, H).astype(jnp.bfloat16),
        "fc2_w": params["fc2_wt"].astype(jnp.bfloat16),
    }


# ----------------------------------------------------------------------------
# CNNDLGA forward (inference path)
# ----------------------------------------------------------------------------
def cnndlga_forward(params, xc, xn):
    B, S, n_cls = xc.shape
    D = params["emb_num"].shape[1]
    N0 = params["emb_num"].shape[0] + len(params["emb_cls"])
    keep = tuple(cp["wpfs"].shape[0] for cp in params["cross"])
    L = len(keep)
    SD = S * D
    NT = sum(keep) + N0

    prep = _prepare_kernel_weights(params, S=S, D=D, N0=N0, keep=keep)

    # ---- FeatureEmbedding gathers (XLA glue); eval-mode dropout = identity --
    xc_embs = [params["emb_cls"][i][xc[:, :, i]][:, :, None, :]
               for i in range(n_cls)]
    xn_emb = xn[:, :, :, None] * params["emb_num"][None, None, :, :]
    x0 = jnp.concatenate(xc_embs + [xn_emb], axis=2)                  # (B,S,N0,D)
    x_fm2 = jnp.transpose(x0, (0, 2, 1, 3)).reshape(B * N0, SD)       # lane-dense

    xg, aux = fused_features(
        x_fm2, prep["scalars"], prep["P"], prep["ln_wb"], prep["qk"],
        prep["w3_all"], prep["wfa"], prep["E"], S=S, D=D, N0=N0, keep=keep, B=B)

    # gated features -> MLP input; (B*NT, SD) -> (B, NT*SD) is a free view.
    x_flat = xg[:B * NT].reshape(B, NT * SD)
    out = mlp(x_flat, prep["fc1_w"], params["fc1_b"], params["prelu_a"],
              prep["fc2_w"], params["fc2_b"])

    # small tensors recovered from the packed lane-dense aux slab.
    fst = aux[:B, L * N0:L * N0 + NT, :S]                             # (B,NT,S)
    feat_scores = jnp.transpose(fst, (0, 2, 1))[:, :, :, None]        # (B,S,NT,1)
    ws = []
    rf = N0
    for l in range(L):
        attn = aux[:B, l * N0:(l + 1) * N0, :rf]                      # (B,N0,rf)
        ws.append((attn, params["cross"][l]["wpfs"]))
        rf = keep[l]
    return out, feat_scores, ws


# ----------------------------------------------------------------------------
if __name__ == "__main__":
    key = jax.random.PRNGKey(0)
    pkey, ckey, nkey = jax.random.split(key, 3)

    # small config: batch=2, seq_len=4, 3 numerical feats, 1 categorical feat
    # (2 classes), embed_dim=32, keep_cross_feats=[8,6,4], nclass=5
    B, S, N_NUM, EMBED = 2, 4, 3, 32
    CLS_FEATS = (2,)
    KEEP = (8, 6, 4)
    NCLASS = 5

    params = init_params(pkey, seq_len=S, n_num_feats=N_NUM, cls_feats=CLS_FEATS,
                         embed_dim=EMBED, keep_cross_feats=KEEP, nclass=NCLASS)

    xc = jax.random.randint(ckey, (B, S, len(CLS_FEATS)), 0, CLS_FEATS[0],
                            dtype=jnp.int32)
    xn = jax.random.normal(nkey, (B, S, N_NUM), dtype=jnp.float32)

    fwd = jax.jit(cnndlga_forward)
    out, feat_scores, ws = fwd(params, xc, xn)
    jax.block_until_ready(out)
    jax.block_until_ready(feat_scores)

    total_feats = sum(KEEP) + N_NUM + len(CLS_FEATS)
    assert out.shape == (B, NCLASS)
    assert feat_scores.shape == (B, S, total_feats, 1)
    assert len(ws) == len(KEEP)
    print("KERNEL_OK")
</pallas_src>

<mosaic_0001>
module attributes {stable_mosaic.version = 11 : i64} {
  func.func @_fused_features_kernel(%arg0: i32, %arg1: memref<4xf32, #tpu.memory_space<smem>>, %arg2: memref<8x128xf32, #tpu.memory_space<vmem>>, %arg3: memref<128x128xf32, #tpu.memory_space<vmem>>, %arg4: memref<2x128xf32, #tpu.memory_space<vmem>>, %arg5: memref<128x96xbf16, #tpu.memory_space<vmem>>, %arg6: memref<3x4x8x8xf32, #tpu.memory_space<vmem>>, %arg7: memref<128x4xbf16, #tpu.memory_space<vmem>>, %arg8: memref<4x128xbf16, #tpu.memory_space<vmem>>, %arg9: memref<44x128xf32, #tpu.memory_space<vmem>>, %arg10: memref<2x40x128xf32, #tpu.memory_space<vmem>>) attributes {dimension_semantics = [#tpu.dimension_semantics<parallel>], iteration_bounds = array<i64: 1>, scalar_prefetch = 0 : i64, scratch_operands = 0 : i64, tpu.core_type = #tpu.core_type<tc>, window_params = [{transform_indices = @transform_0, window_bounds = array<i64: 4>}, {transform_indices = @transform_1, window_bounds = array<i64: 8, 128>}, {pipeline_mode = #tpu.pipeline_mode<synchronous>, transform_indices = @transform_2, window_bounds = array<i64: 128, 128>}, {pipeline_mode = #tpu.pipeline_mode<synchronous>, transform_indices = @transform_3, window_bounds = array<i64: 2, 128>}, {pipeline_mode = #tpu.pipeline_mode<synchronous>, transform_indices = @transform_4, window_bounds = array<i64: 128, 96>}, {pipeline_mode = #tpu.pipeline_mode<synchronous>, transform_indices = @transform_5, window_bounds = array<i64: 3, 4, 8, 8>}, {pipeline_mode = #tpu.pipeline_mode<synchronous>, transform_indices = @transform_6, window_bounds = array<i64: 128, 4>}, {pipeline_mode = #tpu.pipeline_mode<synchronous>, transform_indices = @transform_7, window_bounds = array<i64: 4, 128>}, {transform_indices = @transform_8, window_bounds = array<i64: 44, 128>}, {transform_indices = @transform_9, window_bounds = array<i64: 2, 40, 128>}]} {
    %c0 = arith.constant 0 : index
    %c0_0 = arith.constant 0 : index
    %0 = vector.load %arg2[%c0, %c0_0] : memref<8x128xf32, #tpu.memory_space<vmem>>, vector<8x128xf32>
    %c0_1 = arith.constant 0 : index
    %c0_2 = arith.constant 0 : index
    %1 = vector.load %arg3[%c0_1, %c0_2] : memref<128x128xf32, #tpu.memory_space<vmem>>, vector<128x128xf32>
    %cst = arith.constant dense<0.000000e+00> : vector<8x128xf32>
    %2 = tpu.matmul %0, %1, %cst {dimension_numbers = #tpu.dot_dimension_numbers<[1], [0], [0], [1], [0, 0, 1, 1], [], []>} : vector<8x128xf32>, vector<128x128xf32>, vector<8x128xf32> -> vector<8x128xf32>
    %3 = arith.subf %0, %2 : vector<8x128xf32>
    %4 = arith.mulf %3, %3 : vector<8x128xf32>
    %cst_3 = arith.constant dense<0.000000e+00> : vector<8x128xf32>
    %5 = tpu.matmul %4, %1, %cst_3 {dimension_numbers = #tpu.dot_dimension_numbers<[1], [0], [0], [1], [0, 0, 1, 1], [], []>} : vector<8x128xf32>, vector<128x128xf32>, vector<8x128xf32> -> vector<8x128xf32>
    %c0_4 = arith.constant 0 : index
    %c0_5 = arith.constant 0 : index
    %6 = vector.load %arg4[%c0_4, %c0_5] : memref<2x128xf32, #tpu.memory_space<vmem>>, vector<1x128xf32>
    %c1 = arith.constant 1 : index
    %c0_6 = arith.constant 0 : index
    %7 = vector.load %arg4[%c1, %c0_6] : memref<2x128xf32, #tpu.memory_space<vmem>>, vector<1x128xf32>
    %cst_7 = arith.constant 9.99999996E-13 : f32
    %8 = vector.broadcast %cst_7 : f32 to vector<8x128xf32>
    %9 = arith.addf %5, %8 : vector<8x128xf32>
    %10 = math.rsqrt %9 : vector<8x128xf32>
    %11 = arith.mulf %3, %10 : vector<8x128xf32>
    %12 = vector.broadcast %6 : vector<1x128xf32> to vector<8x128xf32>
    %13 = arith.mulf %11, %12 : vector<8x128xf32>
    %14 = vector.broadcast %7 : vector<1x128xf32> to vector<8x128xf32>
    %15 = arith.addf %13, %14 : vector<8x128xf32>
    %16 = arith.truncf %15 : vector<8x128xf32> to vector<8x128xbf16>
    %17 = vector.shape_cast %15 : vector<8x128xf32> to vector<2x4x128xf32>
    %c0_8 = arith.constant 0 : index
    %c0_9 = arith.constant 0 : index
    %18 = vector.load %arg5[%c0_8, %c0_9] : memref<128x96xbf16, #tpu.memory_space<vmem>>, vector<128x96xbf16>
    %19 = vector.extract_strided_slice %18 {offsets = [0, 0], sizes = [128, 48], strides = [1, 1]} : vector<128x96xbf16> to vector<128x48xbf16>
    %cst_10 = arith.constant dense<0.000000e+00> : vector<8x48xf32>
    %20 = tpu.matmul %16, %19, %cst_10 {dimension_numbers = #tpu.dot_dimension_numbers<[1], [0], [0], [1], [0, 0, 1, 1], [], []>} : vector<8x128xbf16>, vector<128x48xbf16>, vector<8x48xf32> -> vector<8x48xf32>
    %21 = vector.shape_cast %20 : vector<8x48xf32> to vector<2x4x48xf32>
    %c0_11 = arith.constant 0 : index
    %c0_12 = arith.constant 0 : index
    %c0_13 = arith.constant 0 : index
    %c0_14 = arith.constant 0 : index
    %22 = vector.load %arg6[%c0_11, %c0_12, %c0_13, %c0_14] : memref<3x4x8x8xf32, #tpu.memory_space<vmem>>, vector<3x4x8x8xf32>
    %c0_15 = arith.constant 0 : index
    %23 = memref.load %arg1[%c0_15] : memref<4xf32, #tpu.memory_space<smem>>
    %24 = vector.extract_strided_slice %18 {offsets = [0, 48], sizes = [128, 16], strides = [1, 1]} : vector<128x96xbf16> to vector<128x16xbf16>
    %25 = arith.truncf %15 : vector<8x128xf32> to vector<8x128xbf16>
    %cst_16 = arith.constant dense<0.000000e+00> : vector<8x16xf32>
    %26 = tpu.matmul %25, %24, %cst_16 {dimension_numbers = #tpu.dot_dimension_numbers<[1], [0], [0], [1], [0, 0, 1, 1], [], []>} : vector<8x128xbf16>, vector<128x16xbf16>, vector<8x16xf32> -> vector<8x16xf32>
    %27 = vector.shape_cast %26 : vector<8x16xf32> to vector<2x4x16xf32>
    %28 = vector.extract_strided_slice %21 {offsets = [0, 0, 0], sizes = [2, 4, 16], strides = [1, 1, 1]} : vector<2x4x48xf32> to vector<2x4x16xf32>
    %29 = arith.truncf %28 : vector<2x4x16xf32> to vector<2x4x16xbf16>
    %30 = arith.truncf %27 : vector<2x4x16xf32> to vector<2x4x16xbf16>
    "tpu.trace_start"() <{level = 10 : i32, message = "bnd,brd->bnr"}> : () -> ()
    %cst_17 = arith.constant dense<0.000000e+00> : vector<2x4x4xf32>
    %31 = tpu.matmul %29, %30, %cst_17 {dimension_numbers = #tpu.dot_dimension_numbers<[2], [2], [1], [1], [0, 0, 0, 1, 1, 1], [0], [0]>} : vector<2x4x16xbf16>, vector<2x4x16xbf16>, vector<2x4x4xf32> -> vector<2x4x4xf32>
    "tpu.trace_stop"() : () -> ()
    %cst_18 = arith.constant dense<0xFF800000> : vector<2x4xf32>
    %32 = vector.multi_reduction <maximumf>, %31, %cst_18 [2] : vector<2x4x4xf32> to vector<2x4xf32>
    %33 = vector.shape_cast %32 : vector<2x4xf32> to vector<2x4x1xf32>
    %34 = vector.broadcast %33 : vector<2x4x1xf32> to vector<2x4x4xf32>
    %35 = arith.subf %31, %34 : vector<2x4x4xf32>
    %36 = math.exp %35 : vector<2x4x4xf32>
    %cst_19 = arith.constant dense<0.000000e+00> : vector<2x4xf32>
    %37 = vector.multi_reduction <add>, %36, %cst_19 [2] : vector<2x4x4xf32> to vector<2x4xf32>
    %38 = vector.shape_cast %37 : vector<2x4xf32> to vector<2x4x1xf32>
    %39 = vector.broadcast %38 : vector<2x4x1xf32> to vector<2x4x4xf32>
    %40 = arith.divf %36, %39 : vector<2x4x4xf32>
    %41 = vector.broadcast %23 : f32 to vector<2x4x4xf32>
    %42 = arith.mulf %41, %40 : vector<2x4x4xf32>
    %cst_20 = arith.constant 1.000000e+00 : f32
    %43 = vector.broadcast %cst_20 : f32 to vector<2x4x4xf32>
    %44 = arith.addf %43, %42 : vector<2x4x4xf32>
    %45 = vector.extract_strided_slice %22 {offsets = [0, 0, 0, 0], sizes = [1, 4, 8, 4], strides = [1, 1, 1, 1]} : vector<3x4x8x8xf32> to vector<1x4x8x4xf32>
    %46 = vector.shape_cast %45 : vector<1x4x8x4xf32> to vector<4x8x4xf32>
    %47 = vector.shape_cast %46 : vector<4x8x4xf32> to vector<1x4x8x4xf32>
    %48 = vector.shape_cast %44 : vector<2x4x4xf32> to vector<2x4x1x4xf32>
    %49 = vector.broadcast %47 : vector<1x4x8x4xf32> to vector<2x4x8x4xf32>
    %50 = vector.broadcast %48 : vector<2x4x1x4xf32> to vector<2x4x8x4xf32>
    %51 = arith.mulf %49, %50 : vector<2x4x8x4xf32>
    %52 = vector.shape_cast %51 : vector<2x4x8x4xf32> to vector<2x32x4xf32>
    %53 = arith.truncf %52 : vector<2x32x4xf32> to vector<2x32x4xbf16>
    %54 = arith.truncf %17 : vector<2x4x128xf32> to vector<2x4x128xbf16>
    "tpu.trace_start"() <{level = 10 : i32, message = "bmr,brs->bms"}> : () -> ()
    %cst_21 = arith.constant dense<0.000000e+00> : vector<2x32x128xf32>
    %55 = tpu.matmul %53, %54, %cst_21 {dimension_numbers = #tpu.dot_dimension_numbers<[2], [1], [1], [2], [0, 0, 0, 1, 1, 2], [0], [0]>} : vector<2x32x4xbf16>, vector<2x4x128xbf16>, vector<2x32x128xf32> -> vector<2x32x128xf32>
    "tpu.trace_stop"() : () -> ()
    %56 = vector.shape_cast %55 : vector<2x32x128xf32> to vector<2x4x8x128xf32>
    %57 = vector.shape_cast %17 : vector<2x4x128xf32> to vector<2x4x1x128xf32>
    %58 = vector.broadcast %57 : vector<2x4x1x128xf32> to vector<2x4x8x128xf32>
    %59 = arith.mulf %56, %58 : vector<2x4x8x128xf32>
    %cst_22 = arith.constant dense<0.000000e+00> : vector<2x8x128xf32>
    %60 = vector.multi_reduction <add>, %59, %cst_22 [1] : vector<2x4x8x128xf32> to vector<2x8x128xf32>
    %61 = vector.shape_cast %60 : vector<2x8x128xf32> to vector<16x128xf32>
    %c1_23 = arith.constant 1 : index
    %62 = memref.load %arg1[%c1_23] : memref<4xf32, #tpu.memory_space<smem>>
    %63 = vector.extract_strided_slice %18 {offsets = [0, 64], sizes = [128, 16], strides = [1, 1]} : vector<128x96xbf16> to vector<128x16xbf16>
    %64 = arith.truncf %61 : vector<16x128xf32> to vector<16x128xbf16>
    %cst_24 = arith.constant dense<0.000000e+00> : vector<16x16xf32>
    %65 = tpu.matmul %64, %63, %cst_24 {dimension_numbers = #tpu.dot_dimension_numbers<[1], [0], [0], [1], [0, 0, 1, 1], [], []>} : vector<16x128xbf16>, vector<128x16xbf16>, vector<16x16xf32> -> vector<16x16xf32>
    %66 = vector.shape_cast %65 : vector<16x16xf32> to vector<2x8x16xf32>
    %67 = vector.extract_strided_slice %21 {offsets = [0, 0, 16], sizes = [2, 4, 16], strides = [1, 1, 1]} : vector<2x4x48xf32> to vector<2x4x16xf32>
    %68 = arith.truncf %67 : vector<2x4x16xf32> to vector<2x4x16xbf16>
    %69 = arith.truncf %66 : vector<2x8x16xf32> to vector<2x8x16xbf16>
    "tpu.trace_start"() <{level = 10 : i32, message = "bnd,brd->bnr"}> : () -> ()
    %cst_25 = arith.constant dense<0.000000e+00> : vector<2x4x8xf32>
    %70 = tpu.matmul %68, %69, %cst_25 {dimension_numbers = #tpu.dot_dimension_numbers<[2], [2], [1], [1], [0, 0, 0, 1, 1, 1], [0], [0]>} : vector<2x4x16xbf16>, vector<2x8x16xbf16>, vector<2x4x8xf32> -> vector<2x4x8xf32>
    "tpu.trace_stop"() : () -> ()
    %cst_26 = arith.constant dense<0xFF800000> : vector<2x4xf32>
    %71 = vector.multi_reduction <maximumf>, %70, %cst_26 [2] : vector<2x4x8xf32> to vector<2x4xf32>
    %72 = vector.shape_cast %71 : vector<2x4xf32> to vector<2x4x1xf32>
    %73 = vector.broadcast %72 : vector<2x4x1xf32> to vector<2x4x8xf32>
    %74 = arith.subf %70, %73 : vector<2x4x8xf32>
    %75 = math.exp %74 : vector<2x4x8xf32>
    %cst_27 = arith.constant dense<0.000000e+00> : vector<2x4xf32>
    %76 = vector.multi_reduction <add>, %75, %cst_27 [2] : vector<2x4x8xf32> to vector<2x4xf32>
    %77 = vector.shape_cast %76 : vector<2x4xf32> to vector<2x4x1xf32>
    %78 = vector.broadcast %77 : vector<2x4x1xf32> to vector<2x4x8xf32>
    %79 = arith.divf %75, %78 : vector<2x4x8xf32>
    %80 = vector.broadcast %62 : f32 to vector<2x4x8xf32>
    %81 = arith.mulf %80, %79 : vector<2x4x8xf32>
    %cst_28 = arith.constant 1.000000e+00 : f32
    %82 = vector.broadcast %cst_28 : f32 to vector<2x4x8xf32>
    %83 = arith.addf %82, %81 : vector<2x4x8xf32>
    %84 = vector.extract_strided_slice %22 {offsets = [1, 0, 0, 0], sizes = [1, 4, 6, 8], strides = [1, 1, 1, 1]} : vector<3x4x8x8xf32> to vector<1x4x6x8xf32>
    %85 = vector.shape_cast %84 : vector<1x4x6x8xf32> to vector<4x6x8xf32>
    %86 = vector.shape_cast %85 : vector<4x6x8xf32> to vector<1x4x6x8xf32>
    %87 = vector.shape_cast %83 : vector<2x4x8xf32> to vector<2x4x1x8xf32>
    %88 = vector.broadcast %86 : vector<1x4x6x8xf32> to vector<2x4x6x8xf32>
    %89 = vector.broadcast %87 : vector<2x4x1x8xf32> to vector<2x4x6x8xf32>
    %90 = arith.mulf %88, %89 : vector<2x4x6x8xf32>
    %91 = vector.shape_cast %90 : vector<2x4x6x8xf32> to vector<2x24x8xf32>
    %92 = arith.truncf %91 : vector<2x24x8xf32> to vector<2x24x8xbf16>
    %93 = arith.truncf %60 : vector<2x8x128xf32> to vector<2x8x128xbf16>
    "tpu.trace_start"() <{level = 10 : i32, message = "bmr,brs->bms"}> : () -> ()
    %cst_29 = arith.constant dense<0.000000e+00> : vector<2x24x128xf32>
    %94 = tpu.matmul %92, %93, %cst_29 {dimension_numbers = #tpu.dot_dimension_numbers<[2], [1], [1], [2], [0, 0, 0, 1, 1, 2], [0], [0]>} : vector<2x24x8xbf16>, vector<2x8x128xbf16>, vector<2x24x128xf32> -> vector<2x24x128xf32>
    "tpu.trace_stop"() : () -> ()
    %95 = vector.shape_cast %94 : vector<2x24x128xf32> to vector<2x4x6x128xf32>
    %96 = vector.shape_cast %17 : vector<2x4x128xf32> to vector<2x4x1x128xf32>
    %97 = vector.broadcast %96 : vector<2x4x1x128xf32> to vector<2x4x6x128xf32>
    %98 = arith.mulf %95, %97 : vector<2x4x6x128xf32>
    %cst_30 = arith.constant dense<0.000000e+00> : vector<2x6x128xf32>
    %99 = vector.multi_reduction <add>, %98, %cst_30 [1] : vector<2x4x6x128xf32> to vector<2x6x128xf32>
    %100 = vector.shape_cast %99 : vector<2x6x128xf32> to vector<12x128xf32>
    %c2 = arith.constant 2 : index
    %101 = memref.load %arg1[%c2] : memref<4xf32, #tpu.memory_space<smem>>
    %102 = vector.extract_strided_slice %18 {offsets = [0, 80], sizes = [128, 16], strides = [1, 1]} : vector<128x96xbf16> to vector<128x16xbf16>
    %103 = arith.truncf %100 : vector<12x128xf32> to vector<12x128xbf16>
    %cst_31 = arith.constant dense<0.000000e+00> : vector<12x16xf32>
    %104 = tpu.matmul %103, %102, %cst_31 {dimension_numbers = #tpu.dot_dimension_numbers<[1], [0], [0], [1], [0, 0, 1, 1], [], []>} : vector<12x128xbf16>, vector<128x16xbf16>, vector<12x16xf32> -> vector<12x16xf32>
    %105 = vector.shape_cast %104 : vector<12x16xf32> to vector<2x6x16xf32>
    %106 = vector.extract_strided_slice %21 {offsets = [0, 0, 32], sizes = [2, 4, 16], strides = [1, 1, 1]} : vector<2x4x48xf32> to vector<2x4x16xf32>
    %107 = arith.truncf %106 : vector<2x4x16xf32> to vector<2x4x16xbf16>
    %108 = arith.truncf %105 : vector<2x6x16xf32> to vector<2x6x16xbf16>
    "tpu.trace_start"() <{level = 10 : i32, message = "bnd,brd->bnr"}> : () -> ()
    %cst_32 = arith.constant dense<0.000000e+00> : vector<2x4x6xf32>
    %109 = tpu.matmul %107, %108, %cst_32 {dimension_numbers = #tpu.dot_dimension_numbers<[2], [2], [1], [1], [0, 0, 0, 1, 1, 1], [0], [0]>} : vector<2x4x16xbf16>, vector<2x6x16xbf16>, vector<2x4x6xf32> -> vector<2x4x6xf32>
    "tpu.trace_stop"() : () -> ()
    %cst_33 = arith.constant dense<0xFF800000> : vector<2x4xf32>
    %110 = vector.multi_reduction <maximumf>, %109, %cst_33 [2] : vector<2x4x6xf32> to vector<2x4xf32>
    %111 = vector.shape_cast %110 : vector<2x4xf32> to vector<2x4x1xf32>
    %112 = vector.broadcast %111 : vector<2x4x1xf32> to vector<2x4x6xf32>
    %113 = arith.subf %109, %112 : vector<2x4x6xf32>
    %114 = math.exp %113 : vector<2x4x6xf32>
    %cst_34 = arith.constant dense<0.000000e+00> : vector<2x4xf32>
    %115 = vector.multi_reduction <add>, %114, %cst_34 [2] : vector<2x4x6xf32> to vector<2x4xf32>
    %116 = vector.shape_cast %115 : vector<2x4xf32> to vector<2x4x1xf32>
    %117 = vector.broadcast %116 : vector<2x4x1xf32> to vector<2x4x6xf32>
    %118 = arith.divf %114, %117 : vector<2x4x6xf32>
    %119 = vector.broadcast %101 : f32 to vector<2x4x6xf32>
    %120 = arith.mulf %119, %118 : vector<2x4x6xf32>
    %cst_35 = arith.constant 1.000000e+00 : f32
    %121 = vector.broadcast %cst_35 : f32 to vector<2x4x6xf32>
    %122 = arith.addf %121, %120 : vector<2x4x6xf32>
    %123 = vector.extract_strided_slice %22 {offsets = [2, 0, 0, 0], sizes = [1, 4, 4, 6], strides = [1, 1, 1, 1]} : vector<3x4x8x8xf32> to vector<1x4x4x6xf32>
    %124 = vector.shape_cast %123 : vector<1x4x4x6xf32> to vector<4x4x6xf32>
    %125 = vector.shape_cast %124 : vector<4x4x6xf32> to vector<1x4x4x6xf32>
    %126 = vector.shape_cast %122 : vector<2x4x6xf32> to vector<2x4x1x6xf32>
    %127 = vector.broadcast %125 : vector<1x4x4x6xf32> to vector<2x4x4x6xf32>
    %128 = vector.broadcast %126 : vector<2x4x1x6xf32> to vector<2x4x4x6xf32>
    %129 = arith.mulf %127, %128 : vector<2x4x4x6xf32>
    %130 = vector.shape_cast %129 : vector<2x4x4x6xf32> to vector<2x16x6xf32>
    %131 = arith.truncf %130 : vector<2x16x6xf32> to vector<2x16x6xbf16>
    %132 = arith.truncf %99 : vector<2x6x128xf32> to vector<2x6x128xbf16>
    "tpu.trace_start"() <{level = 10 : i32, message = "bmr,brs->bms"}> : () -> ()
    %cst_36 = arith.constant dense<0.000000e+00> : vector<2x16x128xf32>
    %133 = tpu.matmul %131, %132, %cst_36 {dimension_numbers = #tpu.dot_dimension_numbers<[2], [1], [1], [2], [0, 0, 0, 1, 1, 2], [0], [0]>} : vector<2x16x6xbf16>, vector<2x6x128xbf16>, vector<2x16x128xf32> -> vector<2x16x128xf32>
    "tpu.trace_stop"() : () -> ()
    %134 = vector.shape_cast %133 : vector<2x16x128xf32> to vector<2x4x4x128xf32>
    %135 = vector.shape_cast %17 : vector<2x4x128xf32> to vector<2x4x1x128xf32>
    %136 = vector.broadcast %135 : vector<2x4x1x128xf32> to vector<2x4x4x128xf32>
    %137 = arith.mulf %134, %136 : vector<2x4x4x128xf32>
    %cst_37 = arith.constant dense<0.000000e+00> : vector<2x4x128xf32>
    %138 = vector.multi_reduction <add>, %137, %cst_37 [1] : vector<2x4x4x128xf32> to vector<2x4x128xf32>
    %139 = tpu.concatenate %60, %99, %138, %17 in 1 : vector<2x8x128xf32>, vector<2x6x128xf32>, vector<2x4x128xf32>, vector<2x4x128xf32> -> vector<2x22x128xf32>
    %140 = vector.shape_cast %139 : vector<2x22x128xf32> to vector<44x128xf32>
    %141 = arith.truncf %140 : vector<44x128xf32> to vector<44x128xbf16>
    %c0_38 = arith.constant 0 : index
    %c0_39 = arith.constant 0 : index
    %142 = vector.load %arg7[%c0_38, %c0_39] : memref<128x4xbf16, #tpu.memory_space<vmem>>, vector<128x4xbf16>
    %cst_40 = arith.constant dense<0.000000e+00> : vector<44x4xf32>
    %143 = tpu.matmul %141, %142, %cst_40 {dimension_numbers = #tpu.dot_dimension_numbers<[1], [0], [0], [1], [0, 0, 1, 1], [], []>} : vector<44x128xbf16>, vector<128x4xbf16>, vector<44x4xf32> -> vector<44x4xf32>
    %144 = vector.shape_cast %143 : vector<44x4xf32> to vector<2x22x4xf32>
    %cst_41 = arith.constant dense<0xFF800000> : vector<2x22xf32>
    %145 = vector.multi_reduction <maximumf>, %144, %cst_41 [2] : vector<2x22x4xf32> to vector<2x22xf32>
    %146 = vector.shape_cast %145 : vector<2x22xf32> to vector<2x22x1xf32>
    %cst_42 = arith.constant dense<0xFF800000> : vector<2x1xf32>
    %147 = vector.multi_reduction <maximumf>, %146, %cst_42 [1] : vector<2x22x1xf32> to vector<2x1xf32>
    %148 = vector.shape_cast %147 : vector<2x1xf32> to vector<2x1x1xf32>
    %149 = vector.broadcast %148 : vector<2x1x1xf32> to vector<2x22x4xf32>
    %150 = arith.subf %144, %149 : vector<2x22x4xf32>
    %151 = math.exp %150 : vector<2x22x4xf32>
    %cst_43 = arith.constant dense<0.000000e+00> : vector<2x22xf32>
    %152 = vector.multi_reduction <add>, %151, %cst_43 [2] : vector<2x22x4xf32> to vector<2x22xf32>
    %153 = vector.shape_cast %152 : vector<2x22xf32> to vector<2x22x1xf32>
    %cst_44 = arith.constant dense<0.000000e+00> : vector<2x1xf32>
    %154 = vector.multi_reduction <add>, %153, %cst_44 [1] : vector<2x22x1xf32> to vector<2x1xf32>
    %155 = vector.shape_cast %154 : vector<2x1xf32> to vector<2x1x1xf32>
    %156 = vector.broadcast %155 : vector<2x1x1xf32> to vector<2x22x4xf32>
    %157 = arith.divf %151, %156 : vector<2x22x4xf32>
    %c3 = arith.constant 3 : index
    %158 = memref.load %arg1[%c3] : memref<4xf32, #tpu.memory_space<smem>>
    %159 = vector.shape_cast %157 : vector<2x22x4xf32> to vector<44x4xf32>
    %160 = arith.truncf %159 : vector<44x4xf32> to vector<44x4xbf16>
    %c0_45 = arith.constant 0 : index
    %c0_46 = arith.constant 0 : index
    %161 = vector.load %arg8[%c0_45, %c0_46] : memref<4x128xbf16, #tpu.memory_space<vmem>>, vector<4x128xbf16>
    %cst_47 = arith.constant dense<0.000000e+00> : vector<44x128xf32>
    %162 = tpu.matmul %160, %161, %cst_47 {dimension_numbers = #tpu.dot_dimension_numbers<[1], [0], [0], [1], [0, 0, 1, 1], [], []>} : vector<44x4xbf16>, vector<4x128xbf16>, vector<44x128xf32> -> vector<44x128xf32>
    %163 = vector.broadcast %158 : f32 to vector<44x128xf32>
    %164 = arith.mulf %163, %162 : vector<44x128xf32>
    %cst_48 = arith.constant 1.000000e+00 : f32
    %165 = vector.broadcast %cst_48 : f32 to vector<44x128xf32>
    %166 = arith.addf %165, %164 : vector<44x128xf32>
    %167 = arith.mulf %140, %166 : vector<44x128xf32>
    %c0_49 = arith.constant 0 : index
    %c0_50 = arith.constant 0 : index
    %168 = vector.load %arg9[%c0_49, %c0_50] : memref<44x128xf32, #tpu.memory_space<vmem>>, vector<44x128xf32>
    tpu.vector_store %arg9[%c0_49, %c0_50], %167 {strides = array<i32>} : memref<44x128xf32, #tpu.memory_space<vmem>>, vector<44x128xf32>,
    %cst_51 = arith.constant 0.000000e+00 : f32
    %169 = vector.broadcast %cst_51 : f32 to vector<2x40x128xf32>
    %c0_52 = arith.constant 0 : index
    %c0_53 = arith.constant 0 : index
    %c0_54 = arith.constant 0 : index
    %170 = vector.load %arg10[%c0_52, %c0_53, %c0_54] : memref<2x40x128xf32, #tpu.memory_space<vmem>>, vector<2x40x128xf32>
    tpu.vector_store %arg10[%c0_52, %c0_53, %c0_54], %169 {strides = array<i32>} : memref<2x40x128xf32, #tpu.memory_space<vmem>>, vector<2x40x128xf32>,
    %c0_55 = arith.constant 0 : index
    %c0_56 = arith.constant 0 : index
    %c0_57 = arith.constant 0 : index
    %171 = vector.load %arg10[%c0_55, %c0_56, %c0_57] : memref<2x40x128xf32, #tpu.memory_space<vmem>>, vector<2x4x4xf32>
    tpu.vector_store %arg10[%c0_55, %c0_56, %c0_57], %40 {strides = array<i32>} : memref<2x40x128xf32, #tpu.memory_space<vmem>>, vector<2x4x4xf32>,
    %c0_58 = arith.constant 0 : index
    %c4 = arith.constant 4 : index
    %c0_59 = arith.constant 0 : index
    %172 = vector.load %arg10[%c0_58, %c4, %c0_59] : memref<2x40x128xf32, #tpu.memory_space<vmem>>, vector<2x4x8xf32>
    tpu.vector_store %arg10[%c0_58, %c4, %c0_59], %79 {strides = array<i32>} : memref<2x40x128xf32, #tpu.memory_space<vmem>>, vector<2x4x8xf32>,
    %c0_60 = arith.constant 0 : index
    %c8 = arith.constant 8 : index
    %c0_61 = arith.constant 0 : index
    %173 = vector.load %arg10[%c0_60, %c8, %c0_61] : memref<2x40x128xf32, #tpu.memory_space<vmem>>, vector<2x4x6xf32>
    tpu.vector_store %arg10[%c0_60, %c8, %c0_61], %118 {strides = array<i32>} : memref<2x40x128xf32, #tpu.memory_space<vmem>>, vector<2x4x6xf32>,
    %c0_62 = arith.constant 0 : index
    %c12 = arith.constant 12 : index
    %c0_63 = arith.constant 0 : index
    %174 = vector.load %arg10[%c0_62, %c12, %c0_63] : memref<2x40x128xf32, #tpu.memory_space<vmem>>, vector<2x22x4xf32>
    tpu.vector_store %arg10[%c0_62, %c12, %c0_63], %157 {strides = array<i32>} : memref<2x40x128xf32, #tpu.memory_space<vmem>>, vector<2x22x4xf32>,
    return
  }
  func.func @transform_0(%arg0: i32) -> i32 {
    %c0_i32 = arith.constant 0 : i32
    %c0_i32_0 = arith.constant 0 : i32
    return %c0_i32 : i32
  }
  func.func @transform_1(%arg0: i32) -> (i32, i32) {
    %c0_i32 = arith.constant 0 : i32
    %c0_i32_0 = arith.constant 0 : i32
    return %arg0, %c0_i32 : i32, i32
  }
  func.func @transform_2(%arg0: i32) -> (i32, i32) {
    %c0_i32 = arith.constant 0 : i32
    %c0_i32_0 = arith.constant 0 : i32
    %c0_i32_1 = arith.constant 0 : i32
    return %c0_i32, %c0_i32_0 : i32, i32
  }
  func.func @transform_3(%arg0: i32) -> (i32, i32) {
    %c0_i32 = arith.constant 0 : i32
    %c0_i32_0 = arith.constant 0 : i32
    %c0_i32_1 = arith.constant 0 : i32
    return %c0_i32, %c0_i32_0 : i32, i32
  }
  func.func @transform_4(%arg0: i32) -> (i32, i32) {
    %c0_i32 = arith.constant 0 : i32
    %c0_i32_0 = arith.constant 0 : i32
    %c0_i32_1 = arith.constant 0 : i32
    return %c0_i32, %c0_i32_0 : i32, i32
  }
  func.func @transform_5(%arg0: i32) -> (i32, i32, i32, i32) {
    %c0_i32 = arith.constant 0 : i32
    %c0_i32_0 = arith.constant 0 : i32
    %c0_i32_1 = arith.constant 0 : i32
    %c0_i32_2 = arith.constant 0 : i32
    %c0_i32_3 = arith.constant 0 : i32
    return %c0_i32, %c0_i32_0, %c0_i32_1, %c0_i32_2 : i32, i32, i32, i32
  }
  func.func @transform_6(%arg0: i32) -> (i32, i32) {
    %c0_i32 = arith.constant 0 : i32
    %c0_i32_0 = arith.constant 0 : i32
    %c0_i32_1 = arith.constant 0 : i32
    return %c0_i32, %c0_i32_0 : i32, i32
  }
  func.func @transform_7(%arg0: i32) -> (i32, i32) {
    %c0_i32 = arith.constant 0 : i32
    %c0_i32_0 = arith.constant 0 : i32
    %c0_i32_1 = arith.constant 0 : i32
    return %c0_i32, %c0_i32_0 : i32, i32
  }
  func.func @transform_8(%arg0: i32) -> (i32, i32) {
    %c0_i32 = arith.constant 0 : i32
    %c0_i32_0 = arith.constant 0 : i32
    return %arg0, %c0_i32 : i32, i32
  }
  func.func @transform_9(%arg0: i32) -> (i32, i32, i32) {
    %c0_i32 = arith.constant 0 : i32
    %c0_i32_0 = arith.constant 0 : i32
    %c0_i32_1 = arith.constant 0 : i32
    return %arg0, %c0_i32, %c0_i32_0 : i32, i32, i32
  }
}

module attributes {stable_mosaic.version = 11 : i64} {
  func.func @_mlp_kernel(%arg0: i32, %arg1: i32, %arg2: memref<1xf32, #tpu.memory_space<smem>>, %arg3: memref<2x1408xf32, #tpu.memory_space<vmem>>, %arg4: memref<1408x128xbf16, #tpu.memory_space<vmem>>, %arg5: memref<1x128xf32, #tpu.memory_space<vmem>>, %arg6: memref<128x5xbf16, #tpu.memory_space<vmem>>, %arg7: memref<1x2x5xf32, #tpu.memory_space<vmem>>, %arg8: memref<2x128xf32, #tpu.memory_space<vmem>>) attributes {dimension_semantics = [#tpu.dimension_semantics<parallel>, #tpu.dimension_semantics<arbitrary>], iteration_bounds = array<i64: 2, 2>, scalar_prefetch = 0 : i64, scratch_operands = 1 : i64, tpu.core_type = #tpu.core_type<tc>, window_params = [{transform_indices = @transform_0, window_bounds = array<i64: 1>}, {transform_indices = @transform_1, window_bounds = array<i64: 2, 1408>}, {transform_indices = @transform_2, window_bounds = array<i64: 1408, 128>}, {transform_indices = @transform_3, window_bounds = array<i64: 1, 128>}, {transform_indices = @transform_4, window_bounds = array<i64: 128, 5>}, {transform_indices = @transform_5, window_bounds = array<i64: 1, 2, 5>}]} {
    %c0_i32 = arith.constant 0 : i32
    %0 = arith.cmpi eq, %arg1, %c0_i32 : i32
    %1 = arith.extui %0 : i1 to i32
    %c0_i32_0 = arith.constant 0 : i32
    %2 = arith.cmpi ne, %1, %c0_i32_0 : i32
    scf.if %2 {
      %cst_9 = arith.constant 0.000000e+00 : f32
      %13 = vector.broadcast %cst_9 : f32 to vector<2x128xf32>
      %c0_10 = arith.constant 0 : index
      %c0_11 = arith.constant 0 : index
      %14 = vector.load %arg8[%c0_10, %c0_11] : memref<2x128xf32, #tpu.memory_space<vmem>>, vector<2x128xf32>
      tpu.vector_store %arg8[%c0_10, %c0_11], %13 {strides = array<i32>} : memref<2x128xf32, #tpu.memory_space<vmem>>, vector<2x128xf32>,
    } else {
    }
    %c0 = arith.constant 0 : index
    %c0_1 = arith.constant 0 : index
    %3 = vector.load %arg8[%c0, %c0_1] : memref<2x128xf32, #tpu.memory_space<vmem>>, vector<2x128xf32>
    %c0_2 = arith.constant 0 : index
    %c0_3 = arith.constant 0 : index
    %4 = vector.load %arg3[%c0_2, %c0_3] : memref<2x1408xf32, #tpu.memory_space<vmem>>, vector<2x1408xf32>
    %5 = arith.truncf %4 : vector<2x1408xf32> to vector<2x1408xbf16>
    %c0_4 = arith.constant 0 : index
    %c0_5 = arith.constant 0 : index
    %6 = vector.load %arg4[%c0_4, %c0_5] : memref<1408x128xbf16, #tpu.memory_space<vmem>>, vector<1408x128xbf16>
    %cst = arith.constant dense<0.000000e+00> : vector<2x128xf32>
    %7 = tpu.matmul %5, %6, %cst {dimension_numbers = #tpu.dot_dimension_numbers<[1], [0], [0], [1], [0, 0, 1, 1], [], []>} : vector<2x1408xbf16>, vector<1408x128xbf16>, vector<2x128xf32> -> vector<2x128xf32>
    %8 = arith.addf %3, %7 : vector<2x128xf32>
    %c0_6 = arith.constant 0 : index
    %c0_7 = arith.constant 0 : index
    %9 = vector.load %arg8[%c0_6, %c0_7] : memref<2x128xf32, #tpu.memory_space<vmem>>, vector<2x128xf32>
    tpu.vector_store %arg8[%c0_6, %c0_7], %8 {strides = array<i32>} : memref<2x128xf32, #tpu.memory_space<vmem>>, vector<2x128xf32>,
    %c1_i32 = arith.constant 1 : i32
    %10 = arith.cmpi eq, %arg1, %c1_i32 : i32
    %11 = arith.extui %10 : i1 to i32
    %c0_i32_8 = arith.constant 0 : i32
    %12 = arith.cmpi ne, %11, %c0_i32_8 : i32
    scf.if %12 {
      %c0_9 = arith.constant 0 : index
      %c0_10 = arith.constant 0 : index
      %13 = vector.load %arg8[%c0_9, %c0_10] : memref<2x128xf32, #tpu.memory_space<vmem>>, vector<2x128xf32>
      %c0_11 = arith.constant 0 : index
      %c0_12 = arith.constant 0 : index
      %14 = vector.load %arg5[%c0_11, %c0_12] : memref<1x128xf32, #tpu.memory_space<vmem>>, vector<1x128xf32>
      %15 = vector.broadcast %14 : vector<1x128xf32> to vector<2x128xf32>
      %16 = arith.addf %13, %15 : vector<2x128xf32>
      %c0_13 = arith.constant 0 : index
      %17 = memref.load %arg2[%c0_13] : memref<1xf32, #tpu.memory_space<smem>>
      %cst_14 = arith.constant 0.000000e+00 : f32
      %18 = vector.broadcast %cst_14 : f32 to vector<2x128xf32>
      %19 = arith.cmpf ogt, %16, %18 : vector<2x128xf32>
      %20 = vector.broadcast %17 : f32 to vector<2x128xf32>
      %21 = arith.mulf %20, %16 : vector<2x128xf32>
      %22 = arith.select %19, %16, %21 : vector<2x128xi1>, vector<2x128xf32>
      %23 = arith.truncf %22 : vector<2x128xf32> to vector<2x128xbf16>
      %c0_15 = arith.constant 0 : index
      %c0_16 = arith.constant 0 : index
      %24 = vector.load %arg6[%c0_15, %c0_16] : memref<128x5xbf16, #tpu.memory_space<vmem>>, vector<128x5xbf16>
      %cst_17 = arith.constant dense<0.000000e+00> : vector<2x5xf32>
      %25 = tpu.matmul %23, %24, %cst_17 {dimension_numbers = #tpu.dot_dimension_numbers<[1], [0], [0], [1], [0, 0, 1, 1], [], []>} : vector<2x128xbf16>, vector<128x5xbf16>, vector<2x5xf32> -> vector<2x5xf32>
      %c0_18 = arith.constant 0 : index
      %c0_19 = arith.constant 0 : index
      %c0_20 = arith.constant 0 : index
      %26 = vector.load %arg7[%c0_18, %c0_19, %c0_20] : memref<1x2x5xf32, #tpu.memory_space<vmem>>, vector<1x2x5xf32>
      %27 = vector.shape_cast %26 : vector<1x2x5xf32> to vector<2x5xf32>
      %28 = vector.shape_cast %25 : vector<2x5xf32> to vector<1x2x5xf32>
      tpu.vector_store %arg7[%c0_18, %c0_19, %c0_20], %28 {strides = array<i32>} : memref<1x2x5xf32, #tpu.memory_space<vmem>>, vector<1x2x5xf32>,
    } else {
    }
    return
  }
  func.func @transform_0(%arg0: i32, %arg1: i32) -> i32 {
    %c0_i32 = arith.constant 0 : i32
    %c0_i32_0 = arith.constant 0 : i32
    return %c0_i32 : i32
  }
  func.func @transform_1(%arg0: i32, %arg1: i32) -> (i32, i32) {
    %c0_i32 = arith.constant 0 : i32
    %c0_i32_0 = arith.constant 0 : i32
    return %c0_i32, %arg1 : i32, i32
  }
  func.func @transform_2(%arg0: i32, %arg1: i32) -> (i32, i32) {
    %c0_i32 = arith.constant 0 : i32
    return %arg1, %arg0 : i32, i32
  }
  func.func @transform_3(%arg0: i32, %arg1: i32) -> (i32, i32) {
    %c0_i32 = arith.constant 0 : i32
    %c0_i32_0 = arith.constant 0 : i32
    return %c0_i32, %arg0 : i32, i32
  }
  func.func @transform_4(%arg0: i32, %arg1: i32) -> (i32, i32) {
    %c0_i32 = arith.constant 0 : i32
    %c0_i32_0 = arith.constant 0 : i32
    return %arg0, %c0_i32 : i32, i32
  }
  func.func @transform_5(%arg0: i32, %arg1: i32) -> (i32, i32, i32) {
    %c0_i32 = arith.constant 0 : i32
    %c0_i32_0 = arith.constant 0 : i32
    %c0_i32_1 = arith.constant 0 : i32
    return %arg0, %c0_i32, %c0_i32_0 : i32, i32, i32
  }
}

</mosaic_0001>

<bundles_post_ra>
// kernel: tile.13
= control target key start
LH: loop header
LB: loop body
LE: loop exit
PB: predicated region body
PF: predicated region fallthrough
CT: control target
= control target key end

     0   :  { %s22_s0 = inlined_call_operand.vmem [shape: f32[32], index: 0, kind: input, shape index: {}]   ;;  %s23_s1 = inlined_call_operand.vmem [shape: f32[4,32], index: 1, kind: output, shape index: {}]  }
   0x1   :  { %v4_v0 = vld [vmem:[%s22_s0] ss:$0 sm:$0xff] }
   0x2   :  { %5 = vst [vmem:[%s23_s1] sm:$0xf] %v4_v0 }

// kernel: tile.18
= control target key start
LH: loop header
LB: loop body
LE: loop exit
PB: predicated region body
PF: predicated region fallthrough
CT: control target
= control target key end

     0   :  { %vm7_vm0 = vcmask 261120   ;;  %s37_s8 = smov 32   ;;  %s38_s9 = smov 64   ;;  %vm13_vm1 = vcmask 1048320   ;;  %vm19_vm2 = vcmask 785920   ;;  %vm25_vm3 = vcmask 523520   ;;  %s55_s0 = inlined_call_operand.vmem [shape: f32[4,32], index: 0, kind: input, shape index: {}]   ;;  %s56_s1 = inlined_call_operand.vmem [shape: f32[1,128], index: 1, kind: output, shape index: {}]  }
   0x1   :  { %v4_v0 = vld [vmem:[%s55_s0] sm:$0xf]  ;;  %s36_s0 = smov 96  }
   0x2   :  { %5 = vst [vmem:[#allocation1] sm:$0xf] %v4_v0 }
   0x9   :  { %v10_v1 = vld [vmem:[#allocation1 + $0x3] sm:$0x1]   ;;  %v22_v2 = vld [vmem:[#allocation1 + $0x1] sm:$0x1]   ;;  %v6_v3 = vld [vmem:[#allocation1] sm:$0x1]  }
   0xa   :  { %11 = vrot.lane.b32.xlu0 %v10_v1, %s36_s0  ;;  %23 = vrot.lane.b32.xlu1 %v22_v2, %s37_s8  ;;  %v16_v4 = vld [vmem:[#allocation1 + $0x2] sm:$0x1]   ;;  %8 = vst.msk [vmem:[#allocation0] sm:$0x1] %vm7_vm0, %v6_v3  }
   0xe   :  { %17 = vrot.lane.b32.xlu0 %v16_v4, %s38_s9 }
  0x7c   :  { %v12_v5 = vpop.permute.xlu0 %11   ;;  %v24_v6 = vpop.permute.xlu1 %23  }
  0x7d   :  { %14 = vst.msk [vmem:[#allocation0] sm:$0x1] %vm13_vm1, %v12_v5  }
  0x80   :  { %v18_v7 = vpop.permute.xlu0 %17  }
  0x81   :  { %20 = vst.msk [vmem:[#allocation0] sm:$0x1] %vm19_vm2, %v18_v7  }
  0x82   :  { %26 = vst.msk [vmem:[#allocation0] sm:$0x1] %vm25_vm3, %v24_v6  }
  0x89   :  { %v30_v8 = vld [vmem:[#allocation0] sm:$0x1] }
  0x8a   :  { %32 = vst [vmem:[%s56_s1] sm:$0x1] %v30_v8 }

// kernel: cnndlga_forward.3
= control target key start
LH: loop header
LB: loop body
LE: loop exit
PB: predicated region body
PF: predicated region fallthrough
CT: control target
= control target key end

     0   :  { %s3424_s0 = inlined_call_operand.<no memory space> [shape: f32[1], index: 0, kind: input, shape index: {}]   ;;  %s3425_s1 = inlined_call_operand.vmem [shape: f32[2,2816], index: 1, kind: input, shape index: {}]   ;;  %s3426_s2 = inlined_call_operand.vmem [shape: bf16[2816,256], index: 2, kind: input, shape index: {}]   ;;  %s3427_s3 = inlined_call_operand.vmem [shape: f32[1,256], index: 3, kind: input, shape index: {}]   ;;  %s3428_s4 = inlined_call_operand.vmem [shape: bf16[256,5], index: 4, kind: input, shape index: {}]   ;;  %s3429_s5 = inlined_call_operand.vmem [shape: f32[2,2,5], index: 5, kind: output, shape index: {}]  }
   0x1   :  { %10 = sst [smem:[#allocation3]] %s3424_s0 }
   0x2   :  { %s2841_s20 = smov 0   ;;  %s2843_s21 = smov 0  }
   0x3   :  { %s2845_s22 = smov 0   ;;  %s2847_s23 = smov 0  }
   0x4   :  { %s2849_s24 = smov 0   ;;  %s2851_s25 = smov 0  }
   0x5   :  { %s2853_s26 = smov 0  }
   0x6 LB: > { %s25_s0 = sadd.s32 1, %s2792_s24  ;;  %s28_s27 = sadd.s32 1, %s2796_s25  ;;  %s2800_s26 = sphi %s2853_s26, %s16_s26   ;;  %s2796_s25 = sphi %s2851_s25, %s3435_s25   ;;  %s2792_s24 = sphi %s2849_s24, %s3434_s24   ;;  %s2788_s23 = sphi %s2847_s23, %s3433_s23   ;;  %s2784_s22 = sphi %s2845_s22, %s3432_s22   ;;  %s2780_s21 = sphi %s2843_s21, %s3431_s21   ;;  %s2776_s20 = sphi %s2841_s20, %s3430_s20  }
   0x7   : > { %p26_p0 = scmp.ge.s32.totalorder %s25_s0, 2  ;;  %p91_p1 = scmp.ne.s32.totalorder %s2780_s21, %s2776_s20 }
   0x8   : > { %p92_p2 = scmp.eq.s32.totalorder %s2800_s26, 0  ;;  %s84_s6 = sadd.s32 1, %s2780_s21 }
   0x9   : > { %s3437_s0 = smov (%p26_p0, %s25_s0), 0  ;;  %s3439_s27 = smov (!%p26_p0, %s28_s27), %s2796_s25 }
   0xa   : > { %p93_p3 = por %p92_p2, %p91_p1  ;;  %p30_p4 = scmp.ge.s32.totalorder %s3439_s27, 2 }
   0xb   : > { %s79_s28 = ssub.s32 %s2792_s24, %s3437_s0  ;;  %p2305_p6 = scmp.ge.s32.totalorder %s2800_s26, 4 }
   0xc   : > { %s3441_s27 = smov (%p30_p4, %s3439_s27), 0 }
   0xd   : > { %s80_s29 = ssub.s32 %s2796_s25, %s3441_s27  ;;  %198 = sbr.rel (%p2305_p6) target bundleno = 144 (0x90), region = 20 }
   0xe   : > { %s81_s30 = sor.u32 %s80_s29, %s79_s28 }
   0xf   : > { %p82_p5 = scmp.eq.s32.totalorder %s81_s30, 0 }
  0x11   : > { %s2892_s7 = scalar_select %p82_p5, %s2780_s21, %s84_s6  }
  0x14   : > { %210 = sbr.rel (!%p93_p3) target bundleno = 144 (0x90), region = 28  ;;  %s212_s8 = sand.u32 (%p93_p3), 1, %s2780_s21  }
  0x15   : > { %s2414_s9 = smul.u32 (%p93_p3), 352, %s2792_s24 }
  0x16   : > { %s2583_s10 = smul.u32 (%p93_p3), 704, %s212_s8 }
  0x17   : > { %s217_s11 = sadd.s32 (%p93_p3), %s2796_s25, %s2414_s9 }
  0x18   : > { %s2307_s12 = sshll.u32 (%p93_p3), %s217_s11, 2  ;;  %s2906_s16 = scalar_lea.vmem (%p93_p3), [#allocation4], %s2583_s10 }
  0x19   : > { %s2901_s15 = scalar_lea.vmem (%p93_p3), %s3426_s2, %s2307_s12 }
  0x1a   : > { %v235_v0 = vld [vmem:[%s2901_s15] sm:$0xf] (%p93_p3)  ;;  %v237_v1 = vld [vmem:[%s2901_s15 + $0x8] sm:$0xf] (%p93_p3)  ;;  %v239_v2 = vld [vmem:[%s2901_s15 + $0x10] sm:$0xf] (%p93_p3) }
  0x1b   : > { %236 = vst [vmem:[%s2906_s16] sm:$0xf] %v235_v0  ;;  %238 = vst [vmem:[%s2906_s16 + $0x4] sm:$0xf] %v237_v1  ;;  %v241_v3 = vld [vmem:[%s2901_s15 + $0x18] sm:$0xf] }
  0x1c   : > { %240 = vst [vmem:[%s2906_s16 + $0x8] sm:$0xf] %v239_v2  ;;  %v243_v4 = vld [vmem:[%s2901_s15 + $0x20] sm:$0xf]  ;;  %v245_v5 = vld [vmem:[%s2901_s15 + $0x28] sm:$0xf] }
  0x1d   : > { %242 = vst [vmem:[%s2906_s16 + $0xc] sm:$0xf] %v241_v3  ;;  %244 = vst [vmem:[%s2906_s16 + $0x10] sm:$0xf] %v243_v4  ;;  %v247_v6 = vld [vmem:[%s2901_s15 + $0x30] sm:$0xf] }
  0x1e   : > { %246 = vst [vmem:[%s2906_s16 + $0x14] sm:$0xf] %v245_v5  ;;  %v249_v7 = vld [vmem:[%s2901_s15 + $0x38] sm:$0xf]  ;;  %v251_v8 = vld [vmem:[%s2901_s15 + $0x40] sm:$0xf] }
  0x1f   : > { %248 = vst [vmem:[%s2906_s16 + $0x18] sm:$0xf] %v247_v6  ;;  %250 = vst [vmem:[%s2906_s16 + $0x1c] sm:$0xf] %v249_v7  ;;  %v253_v9 = vld [vmem:[%s2901_s15 + $0x48] sm:$0xf] }
  0x20   : > { %252 = vst [vmem:[%s2906_s16 + $0x20] sm:$0xf] %v251_v8  ;;  %v255_v10 = vld [vmem:[%s2901_s15 + $0x50] sm:$0xf]  ;;  %v257_v11 = vld [vmem:[%s2901_s15 + $0x58] sm:$0xf] }
  0x21   : > { %254 = vst [vmem:[%s2906_s16 + $0x24] sm:$0xf] %v253_v9  ;;  %256 = vst [vmem:[%s2906_s16 + $0x28] sm:$0xf] %v255_v10  ;;  %v259_v12 = vld [vmem:[%s2901_s15 + $0x60] sm:$0xf] }
  0x22   : > { %258 = vst [vmem:[%s2906_s16 + $0x2c] sm:$0xf] %v257_v11  ;;  %v261_v13 = vld [vmem:[%s2901_s15 + $0x68] sm:$0xf]  ;;  %v263_v14 = vld [vmem:[%s2901_s15 + $0x70] sm:$0xf] }
  0x23   : > { %260 = vst [vmem:[%s2906_s16 + $0x30] sm:$0xf] %v259_v12  ;;  %262 = vst [vmem:[%s2906_s16 + $0x34] sm:$0xf] %v261_v13  ;;  %v265_v15 = vld [vmem:[%s2901_s15 + $0x78] sm:$0xf] }
  0x24   : > { %264 = vst [vmem:[%s2906_s16 + $0x38] sm:$0xf] %v263_v14  ;;  %v267_v16 = vld [vmem:[%s2901_s15 + $0x80] sm:$0xf]  ;;  %v269_v17 = vld [vmem:[%s2901_s15 + $0x88] sm:$0xf] }
  0x25   : > { %266 = vst [vmem:[%s2906_s16 + $0x3c] sm:$0xf] %v265_v15  ;;  %268 = vst [vmem:[%s2906_s16 + $0x40] sm:$0xf] %v267_v16  ;;  %v271_v18 = vld [vmem:[%s2901_s15 + $0x90] sm:$0xf] }
  0x26   : > { %270 = vst [vmem:[%s2906_s16 + $0x44] sm:$0xf] %v269_v17  ;;  %v273_v19 = vld [vmem:[%s2901_s15 + $0x98] sm:$0xf]  ;;  %v275_v20 = vld [vmem:[%s2901_s15 + $0xa0] sm:$0xf] }
  0x27   : > { %272 = vst [vmem:[%s2906_s16 + $0x48] sm:$0xf] %v271_v18  ;;  %274 = vst [vmem:[%s2906_s16 + $0x4c] sm:$0xf] %v273_v19  ;;  %v277_v21 = vld [vmem:[%s2901_s15 + $0xa8] sm:$0xf] }
  0x28   : > { %276 = vst [vmem:[%s2906_s16 + $0x50] sm:$0xf] %v275_v20  ;;  %v279_v22 = vld [vmem:[%s2901_s15 + $0xb0] sm:$0xf]  ;;  %v281_v23 = vld [vmem:[%s2901_s15 + $0xb8] sm:$0xf] }
  0x29   : > { %278 = vst [vmem:[%s2906_s16 + $0x54] sm:$0xf] %v277_v21  ;;  %280 = vst [vmem:[%s2906_s16 + $0x58] sm:$0xf] %v279_v22  ;;  %v283_v24 = vld [vmem:[%s2901_s15 + $0xc0] sm:$0xf] }
  0x2a   : > { %282 = vst [vmem:[%s2906_s16 + $0x5c] sm:$0xf] %v281_v23  ;;  %v285_v25 = vld [vmem:[%s2901_s15 + $0xc8] sm:$0xf]  ;;  %v287_v26 = vld [vmem:[%s2901_s15 + $0xd0] sm:$0xf] }
  0x2b   : > { %284 = vst [vmem:[%s2906_s16 + $0x60] sm:$0xf] %v283_v24  ;;  %286 = vst [vmem:[%s2906_s16 + $0x64] sm:$0xf] %v285_v25  ;;  %v289_v27 = vld [vmem:[%s2901_s15 + $0xd8] sm:$0xf] }
  0x2c   : > { %288 = vst [vmem:[%s2906_s16 + $0x68] sm:$0xf] %v287_v26  ;;  %v291_v28 = vld [vmem:[%s2901_s15 + $0xe0] sm:$0xf]  ;;  %v293_v29 = vld [vmem:[%s2901_s15 + $0xe8] sm:$0xf] }
  0x2d   : > { %290 = vst [vmem:[%s2906_s16 + $0x6c] sm:$0xf] %v289_v27  ;;  %292 = vst [vmem:[%s2906_s16 + $0x70] sm:$0xf] %v291_v28  ;;  %v295_v30 = vld [vmem:[%s2901_s15 + $0xf0] sm:$0xf] }
  0x2e   : > { %294 = vst [vmem:[%s2906_s16 + $0x74] sm:$0xf] %v293_v29  ;;  %v297_v31 = vld [vmem:[%s2901_s15 + $0xf8] sm:$0xf]  ;;  %v299_v32 = vld [vmem:[%s2901_s15 + $0x100] sm:$0xf] }
  0x2f   : > { %296 = vst [vmem:[%s2906_s16 + $0x78] sm:$0xf] %v295_v30  ;;  %298 = vst [vmem:[%s2906_s16 + $0x7c] sm:$0xf] %v297_v31  ;;  %v301_v33 = vld [vmem:[%s2901_s15 + $0x108] sm:$0xf] }
  0x30   : > { %300 = vst [vmem:[%s2906_s16 + $0x80] sm:$0xf] %v299_v32  ;;  %v303_v34 = vld [vmem:[%s2901_s15 + $0x110] sm:$0xf]  ;;  %v305_v35 = vld [vmem:[%s2901_s15 + $0x118] sm:$0xf] }
  0x31   : > { %302 = vst [vmem:[%s2906_s16 + $0x84] sm:$0xf] %v301_v33  ;;  %304 = vst [vmem:[%s2906_s16 + $0x88] sm:$0xf] %v303_v34  ;;  %v307_v36 = vld [vmem:[%s2901_s15 + $0x120] sm:$0xf] }
  0x32   : > { %306 = vst [vmem:[%s2906_s16 + $0x8c] sm:$0xf] %v305_v35  ;;  %v309_v37 = vld [vmem:[%s2901_s15 + $0x128] sm:$0xf]  ;;  %v311_v38 = vld [vmem:[%s2901_s15 + $0x130] sm:$0xf] }
  0x33   : > { %308 = vst [vmem:[%s2906_s16 + $0x90] sm:$0xf] %v307_v36  ;;  %310 = vst [vmem:[%s2906_s16 + $0x94] sm:$0xf] %v309_v37  ;;  %v313_v39 = vld [vmem:[%s2901_s15 + $0x138] sm:$0xf] }
  0x34   : > { %312 = vst [vmem:[%s2906_s16 + $0x98] sm:$0xf] %v311_v38  ;;  %v315_v40 = vld [vmem:[%s2901_s15 + $0x140] sm:$0xf]  ;;  %v317_v41 = vld [vmem:[%s2901_s15 + $0x148] sm:$0xf] }
  0x35   : > { %314 = vst [vmem:[%s2906_s16 + $0x9c] sm:$0xf] %v313_v39  ;;  %316 = vst [vmem:[%s2906_s16 + $0xa0] sm:$0xf] %v315_v40  ;;  %v319_v42 = vld [vmem:[%s2901_s15 + $0x150] sm:$0xf] }
  0x36   : > { %318 = vst [vmem:[%s2906_s16 + $0xa4] sm:$0xf] %v317_v41  ;;  %v321_v43 = vld [vmem:[%s2901_s15 + $0x158] sm:$0xf]  ;;  %v323_v44 = vld [vmem:[%s2901_s15 + $0x160] sm:$0xf] }
  0x37   : > { %320 = vst [vmem:[%s2906_s16 + $0xa8] sm:$0xf] %v319_v42  ;;  %322 = vst [vmem:[%s2906_s16 + $0xac] sm:$0xf] %v321_v43  ;;  %v325_v45 = vld [vmem:[%s2901_s15 + $0x168] sm:$0xf] }
  0x38   : > { %324 = vst [vmem:[%s2906_s16 + $0xb0] sm:$0xf] %v323_v44  ;;  %v327_v46 = vld [vmem:[%s2901_s15 + $0x170] sm:$0xf]  ;;  %v329_v47 = vld [vmem:[%s2901_s15 + $0x178] sm:$0xf] }
  0x39   : > { %326 = vst [vmem:[%s2906_s16 + $0xb4] sm:$0xf] %v325_v45  ;;  %328 = vst [vmem:[%s2906_s16 + $0xb8] sm:$0xf] %v327_v46  ;;  %v331_v48 = vld [vmem:[%s2901_s15 + $0x180] sm:$0xf] }
  0x3a   : > { %330 = vst [vmem:[%s2906_s16 + $0xbc] sm:$0xf] %v329_v47  ;;  %v333_v49 = vld [vmem:[%s2901_s15 + $0x188] sm:$0xf]  ;;  %v335_v50 = vld [vmem:[%s2901_s15 + $0x190] sm:$0xf] }
  0x3b   : > { %332 = vst [vmem:[%s2906_s16 + $0xc0] sm:$0xf] %v331_v48  ;;  %334 = vst [vmem:[%s2906_s16 + $0xc4] sm:$0xf] %v333_v49  ;;  %v337_v51 = vld [vmem:[%s2901_s15 + $0x198] sm:$0xf] }
  0x3c   : > { %336 = vst [vmem:[%s2906_s16 + $0xc8] sm:$0xf] %v335_v50  ;;  %v339_v52 = vld [vmem:[%s2901_s15 + $0x1a0] sm:$0xf]  ;;  %v341_v53 = vld [vmem:[%s2901_s15 + $0x1a8] sm:$0xf] }
  0x3d   : > { %338 = vst [vmem:[%s2906_s16 + $0xcc] sm:$0xf] %v337_v51  ;;  %340 = vst [vmem:[%s2906_s16 + $0xd0] sm:$0xf] %v339_v52  ;;  %v343_v54 = vld [vmem:[%s2901_s15 + $0x1b0] sm:$0xf] }
  0x3e   : > { %342 = vst [vmem:[%s2906_s16 + $0xd4] sm:$0xf] %v341_v53  ;;  %v345_v55 = vld [vmem:[%s2901_s15 + $0x1b8] sm:$0xf]  ;;  %v347_v56 = vld [vmem:[%s2901_s15 + $0x1c0] sm:$0xf] }
  0x3f   : > { %344 = vst [vmem:[%s2906_s16 + $0xd8] sm:$0xf] %v343_v54  ;;  %346 = vst [vmem:[%s2906_s16 + $0xdc] sm:$0xf] %v345_v55  ;;  %v349_v57 = vld [vmem:[%s2901_s15 + $0x1c8] sm:$0xf] }
  0x40   : > { %348 = vst [vmem:[%s2906_s16 + $0xe0] sm:$0xf] %v347_v56  ;;  %v351_v58 = vld [vmem:[%s2901_s15 + $0x1d0] sm:$0xf]  ;;  %v353_v59 = vld [vmem:[%s2901_s15 + $0x1d8] sm:$0xf] }
  0x41   : > { %350 = vst [vmem:[%s2906_s16 + $0xe4] sm:$0xf] %v349_v57  ;;  %352 = vst [vmem:[%s2906_s16 + $0xe8] sm:$0xf] %v351_v58  ;;  %v355_v60 = vld [vmem:[%s2901_s15 + $0x1e0] sm:$0xf] }
  0x42   : > { %354 = vst [vmem:[%s2906_s16 + $0xec] sm:$0xf] %v353_v59  ;;  %v357_v61 = vld [vmem:[%s2901_s15 + $0x1e8] sm:$0xf]  ;;  %v359_v62 = vld [vmem:[%s2901_s15 + $0x1f0] sm:$0xf] }
  0x43   : > { %356 = vst [vmem:[%s2906_s16 + $0xf0] sm:$0xf] %v355_v60  ;;  %358 = vst [vmem:[%s2906_s16 + $0xf4] sm:$0xf] %v357_v61  ;;  %v361_v63 = vld [vmem:[%s2901_s15 + $0x1f8] sm:$0xf] }
  0x44   : > { %360 = vst [vmem:[%s2906_s16 + $0xf8] sm:$0xf] %v359_v62  ;;  %v363_v0 = vld [vmem:[%s2901_s15 + $0x200] sm:$0xf]  ;;  %v365_v1 = vld [vmem:[%s2901_s15 + $0x208] sm:$0xf] }
  0x45   : > { %362 = vst [vmem:[%s2906_s16 + $0xfc] sm:$0xf] %v361_v63  ;;  %364 = vst [vmem:[%s2906_s16 + $0x100] sm:$0xf] %v363_v0  ;;  %v367_v2 = vld [vmem:[%s2901_s15 + $0x210] sm:$0xf] }
  0x46   : > { %366 = vst [vmem:[%s2906_s16 + $0x104] sm:$0xf] %v365_v1  ;;  %v369_v3 = vld [vmem:[%s2901_s15 + $0x218] sm:$0xf]  ;;  %v371_v4 = vld [vmem:[%s2901_s15 + $0x220] sm:$0xf] }
  0x47   : > { %368 = vst [vmem:[%s2906_s16 + $0x108] sm:$0xf] %v367_v2  ;;  %370 = vst [vmem:[%s2906_s16 + $0x10c] sm:$0xf] %v369_v3  ;;  %v373_v5 = vld [vmem:[%s2901_s15 + $0x228] sm:$0xf] }
  0x48   : > { %372 = vst [vmem:[%s2906_s16 + $0x110] sm:$0xf] %v371_v4  ;;  %v375_v6 = vld [vmem:[%s2901_s15 + $0x230] sm:$0xf]  ;;  %v377_v7 = vld [vmem:[%s2901_s15 + $0x238] sm:$0xf] }
  0x49   : > { %374 = vst [vmem:[%s2906_s16 + $0x114] sm:$0xf] %v373_v5  ;;  %376 = vst [vmem:[%s2906_s16 + $0x118] sm:$0xf] %v375_v6  ;;  %v379_v8 = vld [vmem:[%s2901_s15 + $0x240] sm:$0xf] }
  0x4a   : > { %378 = vst [vmem:[%s2906_s16 + $0x11c] sm:$0xf] %v377_v7  ;;  %v381_v9 = vld [vmem:[%s2901_s15 + $0x248] sm:$0xf]  ;;  %v383_v10 = vld [vmem:[%s2901_s15 + $0x250] sm:$0xf] }
  0x4b   : > { %380 = vst [vmem:[%s2906_s16 + $0x120] sm:$0xf] %v379_v8  ;;  %382 = vst [vmem:[%s2906_s16 + $0x124] sm:$0xf] %v381_v9  ;;  %v385_v11 = vld [vmem:[%s2901_s15 + $0x258] sm:$0xf] }
  0x4c   : > { %384 = vst [vmem:[%s2906_s16 + $0x128] sm:$0xf] %v383_v10  ;;  %v387_v12 = vld [vmem:[%s2901_s15 + $0x260] sm:$0xf]  ;;  %v389_v13 = vld [vmem:[%s2901_s15 + $0x268] sm:$0xf] }
  0x4d   : > { %386 = vst [vmem:[%s2906_s16 + $0x12c] sm:$0xf] %v385_v11  ;;  %388 = vst [vmem:[%s2906_s16 + $0x130] sm:$0xf] %v387_v12  ;;  %v391_v14 = vld [vmem:[%s2901_s15 + $0x270] sm:$0xf] }
  0x4e   : > { %390 = vst [vmem:[%s2906_s16 + $0x134] sm:$0xf] %v389_v13  ;;  %v393_v15 = vld [vmem:[%s2901_s15 + $0x278] sm:$0xf]  ;;  %v395_v16 = vld [vmem:[%s2901_s15 + $0x280] sm:$0xf] }
  0x4f   : > { %392 = vst [vmem:[%s2906_s16 + $0x138] sm:$0xf] %v391_v14  ;;  %394 = vst [vmem:[%s2906_s16 + $0x13c] sm:$0xf] %v393_v15  ;;  %v397_v17 = vld [vmem:[%s2901_s15 + $0x288] sm:$0xf] }
  0x50   : > { %396 = vst [vmem:[%s2906_s16 + $0x140] sm:$0xf] %v395_v16  ;;  %v399_v18 = vld [vmem:[%s2901_s15 + $0x290] sm:$0xf]  ;;  %v401_v19 = vld [vmem:[%s2901_s15 + $0x298] sm:$0xf] }
  0x51   : > { %398 = vst [vmem:[%s2906_s16 + $0x144] sm:$0xf] %v397_v17  ;;  %400 = vst [vmem:[%s2906_s16 + $0x148] sm:$0xf] %v399_v18  ;;  %v403_v20 = vld [vmem:[%s2901_s15 + $0x2a0] sm:$0xf] }
  0x52   : > { %402 = vst [vmem:[%s2906_s16 + $0x14c] sm:$0xf] %v401_v19  ;;  %v405_v21 = vld [vmem:[%s2901_s15 + $0x2a8] sm:$0xf]  ;;  %v407_v22 = vld [vmem:[%s2901_s15 + $0x2b0] sm:$0xf] }
  0x53   : > { %404 = vst [vmem:[%s2906_s16 + $0x150] sm:$0xf] %v403_v20  ;;  %406 = vst [vmem:[%s2906_s16 + $0x154] sm:$0xf] %v405_v21  ;;  %v409_v23 = vld [vmem:[%s2901_s15 + $0x2b8] sm:$0xf] }
  0x54   : > { %408 = vst [vmem:[%s2906_s16 + $0x158] sm:$0xf] %v407_v22  ;;  %v411_v24 = vld [vmem:[%s2901_s15 + $0x2c0] sm:$0xf]  ;;  %v413_v25 = vld [vmem:[%s2901_s15 + $0x2c8] sm:$0xf] }
  0x55   : > { %410 = vst [vmem:[%s2906_s16 + $0x15c] sm:$0xf] %v409_v23  ;;  %412 = vst [vmem:[%s2906_s16 + $0x160] sm:$0xf] %v411_v24  ;;  %v415_v26 = vld [vmem:[%s2901_s15 + $0x2d0] sm:$0xf] }
  0x56   : > { %414 = vst [vmem:[%s2906_s16 + $0x164] sm:$0xf] %v413_v25  ;;  %v417_v27 = vld [vmem:[%s2901_s15 + $0x2d8] sm:$0xf]  ;;  %v419_v28 = vld [vmem:[%s2901_s15 + $0x2e0] sm:$0xf] }
  0x57   : > { %416 = vst [vmem:[%s2906_s16 + $0x168] sm:$0xf] %v415_v26  ;;  %418 = vst [vmem:[%s2906_s16 + $0x16c] sm:$0xf] %v417_v27  ;;  %v421_v29 = vld [vmem:[%s2901_s15 + $0x2e8] sm:$0xf] }
  0x58   : > { %420 = vst [vmem:[%s2906_s16 + $0x170] sm:$0xf] %v419_v28  ;;  %v423_v30 = vld [vmem:[%s2901_s15 + $0x2f0] sm:$0xf]  ;;  %v425_v31 = vld [vmem:[%s2901_s15 + $0x2f8] sm:$0xf] }
  0x59   : > { %422 = vst [vmem:[%s2906_s16 + $0x174] sm:$0xf] %v421_v29  ;;  %424 = vst [vmem:[%s2906_s16 + $0x178] sm:$0xf] %v423_v30  ;;  %v427_v32 = vld [vmem:[%s2901_s15 + $0x300] sm:$0xf] }
  0x5a   : > { %426 = vst [vmem:[%s2906_s16 + $0x17c] sm:$0xf] %v425_v31  ;;  %v429_v33 = vld [vmem:[%s2901_s15 + $0x308] sm:$0xf]  ;;  %v431_v34 = vld [vmem:[%s2901_s15 + $0x310] sm:$0xf] }
  0x5b   : > { %428 = vst [vmem:[%s2906_s16 + $0x180] sm:$0xf] %v427_v32  ;;  %430 = vst [vmem:[%s2906_s16 + $0x184] sm:$0xf] %v429_v33  ;;  %v433_v35 = vld [vmem:[%s2901_s15 + $0x318] sm:$0xf] }
  0x5c   : > { %432 = vst [vmem:[%s2906_s16 + $0x188] sm:$0xf] %v431_v34  ;;  %v435_v36 = vld [vmem:[%s2901_s15 + $0x320] sm:$0xf]  ;;  %v437_v37 = vld [vmem:[%s2901_s15 + $0x328] sm:$0xf] }
  0x5d   : > { %434 = vst [vmem:[%s2906_s16 + $0x18c] sm:$0xf] %v433_v35  ;;  %436 = vst [vmem:[%s2906_s16 + $0x190] sm:$0xf] %v435_v36  ;;  %v439_v38 = vld [vmem:[%s2901_s15 + $0x330] sm:$0xf] }
  0x5e   : > { %438 = vst [vmem:[%s2906_s16 + $0x194] sm:$0xf] %v437_v37  ;;  %v441_v39 = vld [vmem:[%s2901_s15 + $0x338] sm:$0xf]  ;;  %v443_v40 = vld [vmem:[%s2901_s15 + $0x340] sm:$0xf] }
  0x5f   : > { %440 = vst [vmem:[%s2906_s16 + $0x198] sm:$0xf] %v439_v38  ;;  %442 = vst [vmem:[%s2906_s16 + $0x19c] sm:$0xf] %v441_v39  ;;  %v445_v41 = vld [vmem:[%s2901_s15 + $0x348] sm:$0xf] }
  0x60   : > { %444 = vst [vmem:[%s2906_s16 + $0x1a0] sm:$0xf] %v443_v40  ;;  %v447_v42 = vld [vmem:[%s2901_s15 + $0x350] sm:$0xf]  ;;  %v449_v43 = vld [vmem:[%s2901_s15 + $0x358] sm:$0xf] }
  0x61   : > { %446 = vst [vmem:[%s2906_s16 + $0x1a4] sm:$0xf] %v445_v41  ;;  %448 = vst [vmem:[%s2906_s16 + $0x1a8] sm:$0xf] %v447_v42  ;;  %v451_v44 = vld [vmem:[%s2901_s15 + $0x360] sm:$0xf] }
  0x62   : > { %450 = vst [vmem:[%s2906_s16 + $0x1ac] sm:$0xf] %v449_v43  ;;  %v453_v45 = vld [vmem:[%s2901_s15 + $0x368] sm:$0xf]  ;;  %v455_v46 = vld [vmem:[%s2901_s15 + $0x370] sm:$0xf] }
  0x63   : > { %452 = vst [vmem:[%s2906_s16 + $0x1b0] sm:$0xf] %v451_v44  ;;  %454 = vst [vmem:[%s2906_s16 + $0x1b4] sm:$0xf] %v453_v45  ;;  %v457_v47 = vld [vmem:[%s2901_s15 + $0x378] sm:$0xf] }
  0x64   : > { %456 = vst [vmem:[%s2906_s16 + $0x1b8] sm:$0xf] %v455_v46  ;;  %v459_v48 = vld [vmem:[%s2901_s15 + $0x380] sm:$0xf]  ;;  %v461_v49 = vld [vmem:[%s2901_s15 + $0x388] sm:$0xf] }
  0x65   : > { %458 = vst [vmem:[%s2906_s16 + $0x1bc] sm:$0xf] %v457_v47  ;;  %460 = vst [vmem:[%s2906_s16 + $0x1c0] sm:$0xf] %v459_v48  ;;  %v463_v50 = vld [vmem:[%s2901_s15 + $0x390] sm:$0xf] }
  0x66   : > { %462 = vst [vmem:[%s2906_s16 + $0x1c4] sm:$0xf] %v461_v49  ;;  %v465_v51 = vld [vmem:[%s2901_s15 + $0x398] sm:$0xf]  ;;  %v467_v52 = vld [vmem:[%s2901_s15 + $0x3a0] sm:$0xf] }
  0x67   : > { %464 = vst [vmem:[%s2906_s16 + $0x1c8] sm:$0xf] %v463_v50  ;;  %466 = vst [vmem:[%s2906_s16 + $0x1cc] sm:$0xf] %v465_v51  ;;  %v469_v53 = vld [vmem:[%s2901_s15 + $0x3a8] sm:$0xf] }
  0x68   : > { %468 = vst [vmem:[%s2906_s16 + $0x1d0] sm:$0xf] %v467_v52  ;;  %v471_v54 = vld [vmem:[%s2901_s15 + $0x3b0] sm:$0xf]  ;;  %v473_v55 = vld [vmem:[%s2901_s15 + $0x3b8] sm:$0xf] }
  0x69   : > { %470 = vst [vmem:[%s2906_s16 + $0x1d4] sm:$0xf] %v469_v53  ;;  %472 = vst [vmem:[%s2906_s16 + $0x1d8] sm:$0xf] %v471_v54  ;;  %v475_v56 = vld [vmem:[%s2901_s15 + $0x3c0] sm:$0xf] }
  0x6a   : > { %474 = vst [vmem:[%s2906_s16 + $0x1dc] sm:$0xf] %v473_v55  ;;  %v477_v57 = vld [vmem:[%s2901_s15 + $0x3c8] sm:$0xf]  ;;  %v479_v58 = vld [vmem:[%s2901_s15 + $0x3d0] sm:$0xf] }
  0x6b   : > { %476 = vst [vmem:[%s2906_s16 + $0x1e0] sm:$0xf] %v475_v56  ;;  %478 = vst [vmem:[%s2906_s16 + $0x1e4] sm:$0xf] %v477_v57  ;;  %v481_v59 = vld [vmem:[%s2901_s15 + $0x3d8] sm:$0xf] }
  0x6c   : > { %480 = vst [vmem:[%s2906_s16 + $0x1e8] sm:$0xf] %v479_v58  ;;  %v483_v60 = vld [vmem:[%s2901_s15 + $0x3e0] sm:$0xf]  ;;  %v485_v61 = vld [vmem:[%s2901_s15 + $0x3e8] sm:$0xf] }
  0x6d   : > { %482 = vst [vmem:[%s2906_s16 + $0x1ec] sm:$0xf] %v481_v59  ;;  %484 = vst [vmem:[%s2906_s16 + $0x1f0] sm:$0xf] %v483_v60  ;;  %v487_v62 = vld [vmem:[%s2901_s15 + $0x3f0] sm:$0xf] }
  0x6e   : > { %486 = vst [vmem:[%s2906_s16 + $0x1f4] sm:$0xf] %v485_v61  ;;  %v489_v63 = vld [vmem:[%s2901_s15 + $0x3f8] sm:$0xf]  ;;  %v491_v0 = vld [vmem:[%s2901_s15 + $0x400] sm:$0xf] }
  0x6f   : > { %488 = vst [vmem:[%s2906_s16 + $0x1f8] sm:$0xf] %v487_v62  ;;  %490 = vst [vmem:[%s2906_s16 + $0x1fc] sm:$0xf] %v489_v63  ;;  %v493_v1 = vld [vmem:[%s2901_s15 + $0x408] sm:$0xf] }
  0x70   : > { %492 = vst [vmem:[%s2906_s16 + $0x200] sm:$0xf] %v491_v0  ;;  %v495_v2 = vld [vmem:[%s2901_s15 + $0x410] sm:$0xf]  ;;  %v497_v3 = vld [vmem:[%s2901_s15 + $0x418] sm:$0xf] }
  0x71   : > { %494 = vst [vmem:[%s2906_s16 + $0x204] sm:$0xf] %v493_v1  ;;  %496 = vst [vmem:[%s2906_s16 + $0x208] sm:$0xf] %v495_v2  ;;  %v499_v4 = vld [vmem:[%s2901_s15 + $0x420] sm:$0xf] }
  0x72   : > { %498 = vst [vmem:[%s2906_s16 + $0x20c] sm:$0xf] %v497_v3  ;;  %v501_v5 = vld [vmem:[%s2901_s15 + $0x428] sm:$0xf]  ;;  %v503_v6 = vld [vmem:[%s2901_s15 + $0x430] sm:$0xf] }
  0x73   : > { %500 = vst [vmem:[%s2906_s16 + $0x210] sm:$0xf] %v499_v4  ;;  %502 = vst [vmem:[%s2906_s16 + $0x214] sm:$0xf] %v501_v5  ;;  %v505_v7 = vld [vmem:[%s2901_s15 + $0x438] sm:$0xf] }
  0x74   : > { %504 = vst [vmem:[%s2906_s16 + $0x218] sm:$0xf] %v503_v6  ;;  %v507_v8 = vld [vmem:[%s2901_s15 + $0x440] sm:$0xf]  ;;  %v509_v9 = vld [vmem:[%s2901_s15 + $0x448] sm:$0xf] }
  0x75   : > { %506 = vst [vmem:[%s2906_s16 + $0x21c] sm:$0xf] %v505_v7  ;;  %508 = vst [vmem:[%s2906_s16 + $0x220] sm:$0xf] %v507_v8  ;;  %v511_v10 = vld [vmem:[%s2901_s15 + $0x450] sm:$0xf] }
  0x76   : > { %510 = vst [vmem:[%s2906_s16 + $0x224] sm:$0xf] %v509_v9  ;;  %v513_v11 = vld [vmem:[%s2901_s15 + $0x458] sm:$0xf]  ;;  %v515_v12 = vld [vmem:[%s2901_s15 + $0x460] sm:$0xf] }
  0x77   : > { %512 = vst [vmem:[%s2906_s16 + $0x228] sm:$0xf] %v511_v10  ;;  %514 = vst [vmem:[%s2906_s16 + $0x22c] sm:$0xf] %v513_v11  ;;  %v517_v13 = vld [vmem:[%s2901_s15 + $0x468] sm:$0xf] }
  0x78   : > { %516 = vst [vmem:[%s2906_s16 + $0x230] sm:$0xf] %v515_v12  ;;  %v519_v14 = vld [vmem:[%s2901_s15 + $0x470] sm:$0xf]  ;;  %v521_v15 = vld [vmem:[%s2901_s15 + $0x478] sm:$0xf] }
  0x79   : > { %518 = vst [vmem:[%s2906_s16 + $0x234] sm:$0xf] %v517_v13  ;;  %520 = vst [vmem:[%s2906_s16 + $0x238] sm:$0xf] %v519_v14  ;;  %v523_v16 = vld [vmem:[%s2901_s15 + $0x480] sm:$0xf] }
  0x7a   : > { %522 = vst [vmem:[%s2906_s16 + $0x23c] sm:$0xf] %v521_v15  ;;  %v525_v17 = vld [vmem:[%s2901_s15 + $0x488] sm:$0xf]  ;;  %v527_v18 = vld [vmem:[%s2901_s15 + $0x490] sm:$0xf] }
  0x7b   : > { %524 = vst [vmem:[%s2906_s16 + $0x240] sm:$0xf] %v523_v16  ;;  %526 = vst [vmem:[%s2906_s16 + $0x244] sm:$0xf] %v525_v17  ;;  %v529_v19 = vld [vmem:[%s2901_s15 + $0x498] sm:$0xf] }
  0x7c   : > { %528 = vst [vmem:[%s2906_s16 + $0x248] sm:$0xf] %v527_v18  ;;  %v531_v20 = vld [vmem:[%s2901_s15 + $0x4a0] sm:$0xf]  ;;  %v533_v21 = vld [vmem:[%s2901_s15 + $0x4a8] sm:$0xf] }
  0x7d   : > { %530 = vst [vmem:[%s2906_s16 + $0x24c] sm:$0xf] %v529_v19  ;;  %532 = vst [vmem:[%s2906_s16 + $0x250] sm:$0xf] %v531_v20  ;;  %v535_v22 = vld [vmem:[%s2901_s15 + $0x4b0] sm:$0xf] }
  0x7e   : > { %534 = vst [vmem:[%s2906_s16 + $0x254] sm:$0xf] %v533_v21  ;;  %v537_v23 = vld [vmem:[%s2901_s15 + $0x4b8] sm:$0xf]  ;;  %v539_v24 = vld [vmem:[%s2901_s15 + $0x4c0] sm:$0xf] }
  0x7f   : > { %536 = vst [vmem:[%s2906_s16 + $0x258] sm:$0xf] %v535_v22  ;;  %538 = vst [vmem:[%s2906_s16 + $0x25c] sm:$0xf] %v537_v23  ;;  %v541_v25 = vld [vmem:[%s2901_s15 + $0x4c8] sm:$0xf] }
  0x80   : > { %540 = vst [vmem:[%s2906_s16 + $0x260] sm:$0xf] %v539_v24  ;;  %v543_v26 = vld [vmem:[%s2901_s15 + $0x4d0] sm:$0xf]  ;;  %v545_v27 = vld [vmem:[%s2901_s15 + $0x4d8] sm:$0xf] }
  0x81   : > { %542 = vst [vmem:[%s2906_s16 + $0x264] sm:$0xf] %v541_v25  ;;  %544 = vst [vmem:[%s2906_s16 + $0x268] sm:$0xf] %v543_v26  ;;  %v547_v28 = vld [vmem:[%s2901_s15 + $0x4e0] sm:$0xf] }
  0x82   : > { %546 = vst [vmem:[%s2906_s16 + $0x26c] sm:$0xf] %v545_v27  ;;  %v549_v29 = vld [vmem:[%s2901_s15 + $0x4e8] sm:$0xf]  ;;  %v551_v30 = vld [vmem:[%s2901_s15 + $0x4f0] sm:$0xf] }
  0x83   : > { %548 = vst [vmem:[%s2906_s16 + $0x270] sm:$0xf] %v547_v28  ;;  %550 = vst [vmem:[%s2906_s16 + $0x274] sm:$0xf] %v549_v29  ;;  %v553_v31 = vld [vmem:[%s2901_s15 + $0x4f8] sm:$0xf] }
  0x84   : > { %552 = vst [vmem:[%s2906_s16 + $0x278] sm:$0xf] %v551_v30  ;;  %v555_v32 = vld [vmem:[%s2901_s15 + $0x500] sm:$0xf]  ;;  %v557_v33 = vld [vmem:[%s2901_s15 + $0x508] sm:$0xf] }
  0x85   : > { %554 = vst [vmem:[%s2906_s16 + $0x27c] sm:$0xf] %v553_v31  ;;  %556 = vst [vmem:[%s2906_s16 + $0x280] sm:$0xf] %v555_v32  ;;  %v559_v34 = vld [vmem:[%s2901_s15 + $0x510] sm:$0xf] }
  0x86   : > { %558 = vst [vmem:[%s2906_s16 + $0x284] sm:$0xf] %v557_v33  ;;  %v561_v35 = vld [vmem:[%s2901_s15 + $0x518] sm:$0xf]  ;;  %v563_v36 = vld [vmem:[%s2901_s15 + $0x520] sm:$0xf] }
  0x87   : > { %560 = vst [vmem:[%s2906_s16 + $0x288] sm:$0xf] %v559_v34  ;;  %562 = vst [vmem:[%s2906_s16 + $0x28c] sm:$0xf] %v561_v35  ;;  %v565_v37 = vld [vmem:[%s2901_s15 + $0x528] sm:$0xf] }
  0x88   : > { %564 = vst [vmem:[%s2906_s16 + $0x290] sm:$0xf] %v563_v36  ;;  %v567_v38 = vld [vmem:[%s2901_s15 + $0x530] sm:$0xf]  ;;  %v569_v39 = vld [vmem:[%s2901_s15 + $0x538] sm:$0xf] }
  0x89   : > { %566 = vst [vmem:[%s2906_s16 + $0x294] sm:$0xf] %v565_v37  ;;  %568 = vst [vmem:[%s2906_s16 + $0x298] sm:$0xf] %v567_v38  ;;  %v571_v40 = vld [vmem:[%s2901_s15 + $0x540] sm:$0xf] }
  0x8a   : > { %570 = vst [vmem:[%s2906_s16 + $0x29c] sm:$0xf] %v569_v39  ;;  %v573_v41 = vld [vmem:[%s2901_s15 + $0x548] sm:$0xf]  ;;  %v575_v42 = vld [vmem:[%s2901_s15 + $0x550] sm:$0xf] }
  0x8b   : > { %572 = vst [vmem:[%s2906_s16 + $0x2a0] sm:$0xf] %v571_v40  ;;  %574 = vst [vmem:[%s2906_s16 + $0x2a4] sm:$0xf] %v573_v41  ;;  %v577_v43 = vld [vmem:[%s2901_s15 + $0x558] sm:$0xf] }
  0x8c   : > { %576 = vst [vmem:[%s2906_s16 + $0x2a8] sm:$0xf] %v575_v42  ;;  %v579_v44 = vld [vmem:[%s2901_s15 + $0x560] sm:$0xf]  ;;  %v581_v45 = vld [vmem:[%s2901_s15 + $0x568] sm:$0xf] }
  0x8d   : > { %578 = vst [vmem:[%s2906_s16 + $0x2ac] sm:$0xf] %v577_v43  ;;  %580 = vst [vmem:[%s2906_s16 + $0x2b0] sm:$0xf] %v579_v44  ;;  %v583_v46 = vld [vmem:[%s2901_s15 + $0x570] sm:$0xf] }
  0x8e   : > { %582 = vst [vmem:[%s2906_s16 + $0x2b4] sm:$0xf] %v581_v45  ;;  %v585_v47 = vld [vmem:[%s2901_s15 + $0x578] sm:$0xf]  ;;  %584 = vst [vmem:[%s2906_s16 + $0x2b8] sm:$0xf] %v583_v46 }
  0x8f   : > { %586 = vst [vmem:[%s2906_s16 + $0x2bc] sm:$0xf] %v585_v47 }
  0x90 PF: > { %p2308_p7 = scmp.ge.s32.totalorder %s2800_s26, 1  ;;  %p975_p8 = scmp.lt.s32.totalorder %s2800_s26, 5 }
  0x92   : > { %p976_p9 = pnand %p2308_p7, %p975_p8 }
  0x93   : > { %s982_s17 = sand.u32 (!%p976_p9), 1, %s2776_s20   ;;  %s1021_s18 = smul.u32 (!%p976_p9), 11, %s2784_s22 }
  0x94   : > { %979 = sbr.rel (%p976_p9) target bundleno = 716 (0x2cc), region = 77  ;;  %p1028_p10 = scmp.lt.s32.totalorder (!%p976_p9), %s2788_s23, 1 }
  0x95   : > { %s2584_s19 = smul.u32 (!%p976_p9), 704, %s982_s17  ;;  %p1022_p11 = scmp.lt.s32.totalorder (!%p976_p9), %s1021_s18, 21 }
  0x96   : > { %s2310_s28 = sshll.u32 (!%p976_p9), %s2788_s23, 4  ;;  %p2313_p13 = scmp.ne.s32.totalorder (!%p976_p9), %s2784_s22, 0 }
  0x97   : > { %p1032_p12 = scmp.lt.s32.totalorder (!%p976_p9), %s2310_s28, 31  ;;  %s3286_s30 = scalar_lea.vmem (!%p976_p9), [#allocation4], %s2584_s19 }
  0x9b   : > { %s3443_s18 = smov (!%p1022_p11, %s1021_s18), 21  ;;  %s3445_s23 = smov (!%p1028_p10, %s2788_s23), 1 }
  0x9c   : > { %s2309_s29 = sshll.u32 %s3443_s18, 1  ;;  %s1030_s20 = scalar_lea.vmem %s3427_s3, %s3445_s23  ;;  %v2802_v48 = vmov (!%p2313_p13), 0.0  }
  0x9d   : > { %s3269_s8 = scalar_lea.vmem %s3425_s1, %s2309_s29  ;;  %s3447_s28 = smov (!%p1032_p12, %s2310_s28), 31  ;;  %1046 = vst [vmem:[#allocation2] sm:$0x3] (!%p2313_p13), %v2802_v48 }
  0x9e   : > { %s2312_s11 = sshll.u32 %s3445_s23, 1  ;;  %s2311_s12 = sshll.u32 %s3447_s28, 2 }
  0x9f   : > { %s3279_s15 = scalar_lea.vmem %s3429_s5, %s2312_s11  ;;  %s3284_s18 = scalar_lea.vmem %s3428_s4, %s2311_s12 }
  0xa0   : > { %1045 = sbr.rel (%p2313_p13) target bundleno = 167 (0xa7), region = 85 }
  0xa7 PF: > { %v2647_v49 = vld [vmem:[%s3286_s30 + $0x40] sm:$0xff]   ;;  %v2651_v53 = vld [vmem:[%s3286_s30 + $0x48] sm:$0xff]   ;;  %v2655_v57 = vld [vmem:[%s3286_s30 + $0x50] sm:$0xff]   ;;  %v1058_v13 = vlaneseq  ;;  %v2803_v21 = vmov 1983009808   ;;  %vm2805_vm0 = vmmov 0  }
  0xa8   : > { %v2648_v50 = vld [vmem:[%s3286_s30 + $0xc0] sm:$0xff]   ;;  %2415 = vmatprep.subr.bf16.mxu0 %v2647_v49  ;;  %v2652_v54 = vld [vmem:[%s3286_s30 + $0xc8] sm:$0xff]   ;;  %v2656_v58 = vld [vmem:[%s3286_s30 + $0xd0] sm:$0xff]   ;;  %v1056_v22 = vunpack.c.l.s4 %v2803_v21  ;;  %p2402_p0 = scmp.ne.s32.totalorder %s2784_s22, 1 }
  0xa9   : > { %v2649_v51 = vld [vmem:[%s3286_s30] sm:$0xff]   ;;  %2437 = vmatprep.subr.bf16.mxu1 %v2648_v50  ;;  %v2653_v55 = vld [vmem:[%s3286_s30 + $0x8] sm:$0xff]   ;;  %v2657_v59 = vld [vmem:[%s3286_s30 + $0x10] sm:$0xff]   ;;  %v1059_v18 = vshrl.u32 %v1058_v13, 7  ;;  %vm2807_vm1 = vmmov (!%p2402_p0), 0   ;;  %s2085_s22 = sld [smem:[#allocation3]] (!%p2402_p0) }
  0xaa   : > { %v2650_v52 = vld [vmem:[%s3286_s30 + $0x80] sm:$0xff]   ;;  %2416 = vmatpush3.bf16.msra.mxu0 %v2649_v51  ;;  %v2654_v56 = vld [vmem:[%s3286_s30 + $0x88] sm:$0xff]   ;;  %v2658_v60 = vld [vmem:[%s3286_s30 + $0x90] sm:$0xff]   ;;  %v1057_v23 = vunpack.c.0.s8 %v1056_v22  ;;  %vm2195_vm3 = vcmask (!%p2402_p0), 33792  }
  0xab   : > { %2438 = vmatpush3.bf16.msra.mxu1 %v2650_v52  ;;  %2417 = vmatprep.subr.bf16.mxu0 %v2651_v53  ;;  %v2659_v61 = vld [vmem:[%s3286_s30 + $0x58] sm:$0xff]   ;;  %v2663_v1 = vld [vmem:[%s3286_s30 + $0x60] sm:$0xff]   ;;  %v2667_v5 = vld [vmem:[%s3286_s30 + $0x68] sm:$0xff]  }
  0xac   : > { %2439 = vmatprep.subr.bf16.mxu1 %v2652_v54  ;;  %v2660_v62 = vld [vmem:[%s3286_s30 + $0xd8] sm:$0xff]   ;;  %v2664_v2 = vld [vmem:[%s3286_s30 + $0xe0] sm:$0xff]   ;;  %v2668_v6 = vld [vmem:[%s3286_s30 + $0xe8] sm:$0xff]   ;;  %v3324_v26 = vsub.s32 %v1057_v23, %v1059_v18 }
  0xad   : > { %v2661_v63 = vld [vmem:[%s3286_s30 + $0x18] sm:$0xff]   ;;  %v2665_v3 = vld [vmem:[%s3286_s30 + $0x20] sm:$0xff]   ;;  %v2669_v7 = vld [vmem:[%s3286_s30 + $0x28] sm:$0xff]  }
  0xae   : > { %2418 = vmatpush3.bf16.msra.mxu0 %v2653_v55  ;;  %v2662_v0 = vld [vmem:[%s3286_s30 + $0x98] sm:$0xff]   ;;  %v2666_v4 = vld [vmem:[%s3286_s30 + $0xa0] sm:$0xff]   ;;  %v2670_v8 = vld [vmem:[%s3286_s30 + $0xa8] sm:$0xff]  }
  0xaf   : > { %2440 = vmatpush3.bf16.msra.mxu1 %v2654_v56  ;;  %2419 = vmatprep.subr.bf16.mxu0 %v2655_v57  ;;  %v2671_v9 = vld [vmem:[%s3286_s30 + $0x70] sm:$0xff]   ;;  %v2675_v14 = vld [vmem:[%s3286_s30 + $0x78] sm:$0xff]   ;;  %v2680_v20 = vld [vmem:[%s3286_s30 + $0x140] sm:$0xff]  }
  0xb0   : > { %2441 = vmatprep.subr.bf16.mxu1 %v2656_v58  ;;  %v2672_v10 = vld [vmem:[%s3286_s30 + $0xf0] sm:$0xff]   ;;  %v2676_v15 = vld [vmem:[%s3286_s30 + $0xf8] sm:$0xff]   ;;  %v2682_v25 = vld [vmem:[%s3286_s30 + $0x1c0] sm:$0xff]  }
  0xb1   : > { %v2673_v11 = vld [vmem:[%s3286_s30 + $0x30] sm:$0xff]   ;;  %v2677_v16 = vld [vmem:[%s3286_s30 + $0x38] sm:$0xff]   ;;  %v2681_v31 = vld [vmem:[%s3286_s30 + $0x100] sm:$0xff]  }
  0xb2   : > { %2420 = vmatpush3.bf16.msra.mxu0 %v2657_v59  ;;  %v2674_v12 = vld [vmem:[%s3286_s30 + $0xb0] sm:$0xff]   ;;  %v2678_v17 = vld [vmem:[%s3286_s30 + $0xb8] sm:$0xff]   ;;  %v2683_v34 = vld [vmem:[%s3286_s30 + $0x180] sm:$0xff]  }
  0xb3   : > { %2442 = vmatpush3.bf16.msra.mxu1 %v2658_v60  ;;  %2421 = vmatprep.subr.bf16.mxu0 %v2659_v61  ;;  %v1048_v19 = vld [vmem:[%s3269_s8] sm:$0xff]  ;;  %v2684_v37 = vld [vmem:[%s3286_s30 + $0x148] sm:$0xff]   ;;  %v2688_v41 = vld [vmem:[%s3286_s30 + $0x150] sm:$0xff]  }
  0xb4   : > { %2443 = vmatprep.subr.bf16.mxu1 %v2660_v62  ;;  %v1054_v24 = vcombine.high %v1048_v19, %v1048_v19  ;;  %v1061_v27 = vrot.slane %v1048_v19, %v3324_v26  ;;  %v2686_v38 = vld [vmem:[%s3286_s30 + $0x1c8] sm:$0xff]   ;;  %v2690_v42 = vld [vmem:[%s3286_s30 + $0x1d0] sm:$0xff]   ;;  %v2692_v45 = vld [vmem:[%s3286_s30 + $0x158] sm:$0xff]  }
  0xb5   : > { %v2685_v39 = vld [vmem:[%s3286_s30 + $0x108] sm:$0xff]   ;;  %v2689_v43 = vld [vmem:[%s3286_s30 + $0x110] sm:$0xff]   ;;  %v2694_v46 = vld [vmem:[%s3286_s30 + $0x1d8] sm:$0xff]  }
  0xb6   : > { %2422 = vmatpush3.bf16.msra.mxu0 %v2661_v63  ;;  %v1068_v28 = vrot.slane %v1054_v24, %v3324_v26  ;;  %v1069_v29 = vcombine.high %v1061_v27, %v1061_v27  ;;  %v1115_v32 = vpack.c.bf16 %v1061_v27, %v1061_v27  ;;  %v2687_v40 = vld [vmem:[%s3286_s30 + $0x188] sm:$0xff]   ;;  %v2691_v44 = vld [vmem:[%s3286_s30 + $0x190] sm:$0xff]   ;;  %v2693_v47 = vld [vmem:[%s3286_s30 + $0x118] sm:$0xff]  }
  0xb7   : > { %2444 = vmatpush3.bf16.msra.mxu1 %v2662_v0  ;;  %2423 = vmatprep.subr.bf16.mxu0 %v2663_v1  ;;  %v2695_v48 = vld [vmem:[%s3286_s30 + $0x198] sm:$0xff]   ;;  %v2696_v49 = vld [vmem:[%s3286_s30 + $0x160] sm:$0xff]   ;;  %v2700_v53 = vld [vmem:[%s3286_s30 + $0x168] sm:$0xff]  }
  0xb8   : > { %2445 = vmatprep.subr.bf16.mxu1 %v2664_v2  ;;  %v1070_v30 = vcombine.high %v1068_v28, %v1068_v28  ;;  %v1117_v33 = vpack.c.bf16 %v1068_v28, %v1068_v28  ;;  %v1116_v35 = vpack.c.bf16 %v1069_v29, %v1069_v29  ;;  %v2698_v50 = vld [vmem:[%s3286_s30 + $0x1e0] sm:$0xff]   ;;  %v2702_v54 = vld [vmem:[%s3286_s30 + $0x1e8] sm:$0xff]   ;;  %v2704_v57 = vld [vmem:[%s3286_s30 + $0x170] sm:$0xff]  }
  0xb9   : > { %v2697_v51 = vld [vmem:[%s3286_s30 + $0x120] sm:$0xff]   ;;  %v2701_v55 = vld [vmem:[%s3286_s30 + $0x128] sm:$0xff]   ;;  %v2706_v59 = vld [vmem:[%s3286_s30 + $0x1f0] sm:$0xff]  }
  0xba   : > { %2424 = vmatpush3.bf16.msra.mxu0 %v2665_v3  ;;  %v1118_v36 = vpack.c.bf16 %v1070_v30, %v1070_v30  ;;  %1862 = vmatprep.mubr.bf16.mxu0 %v1116_v35  ;;  %v2699_v52 = vld [vmem:[%s3286_s30 + $0x1a0] sm:$0xff]   ;;  %v2703_v56 = vld [vmem:[%s3286_s30 + $0x1a8] sm:$0xff]   ;;  %v2705_v62 = vld [vmem:[%s3286_s30 + $0x130] sm:$0xff]  }
  0xbb   : > { %2446 = vmatpush3.bf16.msra.mxu1 %v2666_v4  ;;  %2425 = vmatprep.subr.bf16.mxu0 %v2667_v5  ;;  %v1049_v58 = vld [vmem:[%s3269_s8 + $0x8] sm:$0xff]  ;;  %v2707_v63 = vld [vmem:[%s3286_s30 + $0x1b0] sm:$0xff]   ;;  %v2708_v2 = vld [vmem:[%s3286_s30 + $0x178] sm:$0xff]  }
  0xbc   : > { %2447 = vmatprep.subr.bf16.mxu1 %v2668_v6  ;;  %1902 = vmatprep.mubr.bf16.mxu1 %v1118_v36  ;;  %v1078_v60 = vrot.slane %v1049_v58, %v3324_v26  ;;  %v1071_v61 = vcombine.high %v1049_v58, %v1049_v58  ;;  %v2710_v3 = vld [vmem:[%s3286_s30 + $0x1f8] sm:$0xff]   ;;  %v2715_v13 = vld [vmem:[%s3286_s30 + $0x280] sm:$0xff]   ;;  %v2719_v18 = vld [vmem:[%s3286_s30 + $0x250] sm:$0xff]  }
  0xbd   : > { %v2709_v6 = vld [vmem:[%s3286_s30 + $0x138] sm:$0xff]   ;;  %v2720_v19 = vld [vmem:[%s3286_s30 + $0x210] sm:$0xff]   ;;  %v2726_v29 = vld [vmem:[%s3286_s30 + $0x220] sm:$0xff]  }
  0xbe   : > { %2426 = vmatpush3.bf16.msra.mxu0 %v2669_v7  ;;  %v1086_v0 = vcombine.high %v1078_v60, %v1078_v60  ;;  %v1085_v1 = vrot.slane %v1071_v61, %v3324_v26  ;;  %v2722_v21 = vld [vmem:[%s3286_s30 + $0x258] sm:$0xff]   ;;  %v1050_v24 = vld [vmem:[%s3269_s8 + $0x10] sm:$0x3f]  ;;  %v2727_v30 = vld [vmem:[%s3286_s30 + $0x2a0] sm:$0xff]  }
  0xbf   : > { %2448 = vmatpush3.bf16.msra.mxu1 %v2670_v8  ;;  %2427 = vmatprep.subr.bf16.mxu0 %v2671_v9  ;;  %v2711_v8 = vld [vmem:[%s3286_s30 + $0x1b8] sm:$0xff]   ;;  %v2712_v9 = vld [vmem:[%s3286_s30 + $0x240] sm:$0xff]   ;;  %v1095_v27 = vrot.slane %v1050_v24, %v3324_v26  ;;  %v2731_v35 = vld [vmem:[%s3286_s30 + $0x270] sm:$0xff]   ;;  %v1088_v36 = vcombine.high %v1050_v24, %v1050_v24 }
  0xc0   : > { %2449 = vmatprep.subr.bf16.mxu1 %v2672_v10  ;;  %v1120_v4 = vpack.c.bf16 %v1086_v0, %v1086_v0  ;;  %v1087_v5 = vcombine.high %v1085_v1, %v1085_v1  ;;  %v1119_v10 = vpack.c.bf16 %v1078_v60, %v1078_v60  ;;  %v2723_v22 = vld [vmem:[%s3286_s30 + $0x218] sm:$0xff]   ;;  %v2743_v24 = vld [vmem:[%s3284_s18 + $0x28] sm:$0xff] (!%p2402_p0)  }
  0xc1   : > { %v2724_v23 = vld [vmem:[%s3286_s30 + $0x298] sm:$0xff]   ;;  %v1103_v28 = vcombine.high %v1095_v27, %v1095_v27 }
  0xc2   : > { %2428 = vmatpush3.bf16.msra.mxu0 %v2673_v11  ;;  %v1122_v7 = vpack.c.bf16 %v1087_v5, %v1087_v5  ;;  %v2714_v11 = vld [vmem:[%s3286_s30 + $0x200] sm:$0xff]  }
  0xc3   : > { %2450 = vmatpush3.bf16.msra.mxu1 %v2674_v12  ;;  %2429 = vmatprep.subr.bf16.mxu0 %v2675_v14  ;;  %v1121_v12 = vpack.c.bf16 %v1085_v1, %v1085_v1  ;;  %v2804_v14 = vmov 0.0  }
  0xc4   : > { %2451 = vmatprep.subr.bf16.mxu1 %v2676_v15  ;;  %v2716_v15 = vld [vmem:[%s3286_s30 + $0x248] sm:$0xff]  }
  0xc6   : > { %2430 = vmatpush3.bf16.msra.mxu0 %v2677_v16  ;;  %v2717_v16 = vld [vmem:[%s3286_s30 + $0x208] sm:$0xff]  }
  0xc7   : > { %2452 = vmatpush3.bf16.msra.mxu1 %v2678_v17  ;;  %2459 = vmatprep.subr.bf16.mxu0 %v2680_v20  ;;  %v2718_v17 = vld [vmem:[%s3286_s30 + $0x288] sm:$0xff]   ;;  %v2721_v20 = vld [vmem:[%s3286_s30 + $0x290] sm:$0xff]  }
  0xc8   : > { %2481 = vmatprep.subr.bf16.mxu1 %v2682_v25  ;;  %v2725_v25 = vld [vmem:[%s3286_s30 + $0x260] sm:$0xff]  }
  0xc9   : > { %1863 = vmatmul.mubr.bf16.vlgmr.msra.gmra.mrb[0].mxu0 %v1115_v32  ;;  %v1124_v32 = vpack.c.bf16 %v1103_v28, %v1103_v28  ;;  %v2744_v28 = vld [vmem:[%s3284_s18 + $0x30] sm:$0xff] (!%p2402_p0)  }
  0xca   : > { %1903 = vmatmul.mubr.bf16.vlgmr.msra.gmra.mrb[0].mxu1 %v1117_v33  ;;  %2460 = vmatpush3.bf16.msra.mxu0 %v2681_v31  ;;  %v2728_v31 = vld [vmem:[%s3286_s30 + $0x268] sm:$0xff]  }
  0xcb   : > { %2482 = vmatpush3.bf16.msra.mxu1 %v2683_v34  ;;  %2461 = vmatprep.subr.bf16.mxu0 %v2684_v37  ;;  %v2729_v33 = vld [vmem:[%s3286_s30 + $0x228] sm:$0xff]   ;;  %v2732_v37 = vld [vmem:[%s3286_s30 + $0x230] sm:$0xff]  }
  0xcc   : > { %2483 = vmatprep.subr.bf16.mxu1 %v2686_v38  ;;  %1942 = vmatprep.mubr.bf16.mxu0 %v1120_v4  ;;  %v2730_v34 = vld [vmem:[%s3286_s30 + $0x2a8] sm:$0xff]   ;;  %v2733_v38 = vld [vmem:[%s3286_s30 + $0x2b0] sm:$0xff]  }
  0xcd   : > { %1982 = vmatprep.mubr.bf16.mxu1 %v1122_v7 }
  0xce   : > { %2462 = vmatpush3.bf16.msra.mxu0 %v2685_v39  ;;  %v2734_v39 = vld [vmem:[%s3286_s30 + $0x278] sm:$0xff]  }
  0xcf   : > { %2484 = vmatpush3.bf16.msra.mxu1 %v2687_v40  ;;  %2463 = vmatprep.subr.bf16.mxu0 %v2688_v41  ;;  %v1102_v40 = vrot.slane %v1088_v36, %v3324_v26  ;;  %v2735_v41 = vld [vmem:[%s3286_s30 + $0x238] sm:$0xff]  }
  0xd0   : > { %2485 = vmatprep.subr.bf16.mxu1 %v2690_v42  ;;  %v2737_v42 = vld [vmem:[%s3286_s30 + $0x2b8] sm:$0xff]  }
  0xd2   : > { %2464 = vmatpush3.bf16.msra.mxu0 %v2689_v43  ;;  %v1123_v43 = vpack.c.bf16 %v1095_v27, %v1095_v27  ;;  %v2087_v27 = vstv (!%p2402_p0), %s2085_s22 }
  0xd3   : > { %2486 = vmatpush3.bf16.msra.mxu1 %v2691_v44  ;;  %2465 = vmatprep.subr.bf16.mxu0 %v2692_v45  ;;  %v1125_v44 = vpack.c.bf16 %v1102_v40, %v1102_v40 }
  0xd4   : > { %2487 = vmatprep.subr.bf16.mxu1 %v2694_v46 }
  0xd6   : > { %2466 = vmatpush3.bf16.msra.mxu0 %v2693_v47 }
  0xd7   : > { %2488 = vmatpush3.bf16.msra.mxu1 %v2695_v48  ;;  %2467 = vmatprep.subr.bf16.mxu0 %v2696_v49 }
  0xd8   : > { %2489 = vmatprep.subr.bf16.mxu1 %v2698_v50 }
  0xda   : > { %2468 = vmatpush3.bf16.msra.mxu0 %v2697_v51 }
  0xdb   : > { %2490 = vmatpush3.bf16.msra.mxu1 %v2699_v52  ;;  %2469 = vmatprep.subr.bf16.mxu0 %v2700_v53 }
  0xdc   : > { %2491 = vmatprep.subr.bf16.mxu1 %v2702_v54 }
  0xde   : > { %2470 = vmatpush3.bf16.msra.mxu0 %v2701_v55 }
  0xdf   : > { %2492 = vmatpush3.bf16.msra.mxu1 %v2703_v56  ;;  %2471 = vmatprep.subr.bf16.mxu0 %v2704_v57 }
  0xe0   : > { %2493 = vmatprep.subr.bf16.mxu1 %v2706_v59 }
  0xe2   : > { %2472 = vmatpush3.bf16.msra.mxu0 %v2705_v62 }
  0xe3   : > { %2494 = vmatpush3.bf16.msra.mxu1 %v2707_v63  ;;  %2473 = vmatprep.subr.bf16.mxu0 %v2708_v2 }
  0xe4   : > { %2495 = vmatprep.subr.bf16.mxu1 %v2710_v3 }
  0xe6   : > { %2474 = vmatpush3.bf16.msra.mxu0 %v2709_v6 }
  0xe7   : > { %2496 = vmatpush3.bf16.msra.mxu1 %v2711_v8  ;;  %2503 = vmatprep.subr.bf16.mxu0 %v2712_v9 }
  0xe8   : > { %2543 = vmatprep.subr.bf16.mxu1 %v2804_v14 }
  0xe9   : > { %1943 = vmatmul.mubr.bf16.vlgmr.msra.gmra.mrb[4].mxu0 %v1119_v10 }
  0xea   : > { %1983 = vmatmul.mubr.bf16.vlgmr.msra.gmra.mrb[4].mxu1 %v1121_v12  ;;  %2504 = vmatpush3.bf16.msra.mxu0 %v2714_v11 }
  0xeb   : > { %2544 = vmatpush3.bf16.msra.mxu1 %v2715_v13  ;;  %2505 = vmatprep.subr.bf16.mxu0 %v2716_v15  ;;  %v1047_v13 = vld [vmem:[#allocation2] sm:$0x3] }
  0xec   : > { %2545 = vmatprep.subr.bf16.mxu1 %v2804_v14  ;;  %2559 = vmatprep.mubr.msk.bf16.mxu1 %vm2805_vm0, %v2804_v14 }
  0xed   : > { %2022 = vmatprep.mubr.bf16.mxu0 %v1124_v32 }
  0xee   : > { %2506 = vmatpush3.bf16.msra.mxu0 %v2717_v16  ;;  %v2738_v16 = vld [vmem:[%s3284_s18] sm:$0xff] (!%p2402_p0)  }
  0xef   : > { %2546 = vmatpush3.bf16.msra.mxu1 %v2718_v17  ;;  %2507 = vmatprep.subr.bf16.mxu0 %v2719_v18  ;;  %v2806_v17 = vmov (!%p2402_p0), 0.0   ;;  %v2739_v18 = vld [vmem:[%s3284_s18 + $0x8] sm:$0xff] (!%p2402_p0)  }
  0xf0   : > { %2547 = vmatprep.subr.bf16.mxu1 %v2804_v14 }
  0xf2   : > { %2508 = vmatpush3.bf16.msra.mxu0 %v2720_v19  ;;  %v2740_v19 = vld [vmem:[%s3284_s18 + $0x10] sm:$0xff] (!%p2402_p0)  }
  0xf3   : > { %2548 = vmatpush3.bf16.msra.mxu1 %v2721_v20  ;;  %2509 = vmatprep.subr.bf16.mxu0 %v2722_v21  ;;  %v2741_v20 = vld [vmem:[%s3284_s18 + $0x18] sm:$0xff] (!%p2402_p0)   ;;  %v2742_v21 = vld [vmem:[%s3284_s18 + $0x20] sm:$0xff] (!%p2402_p0)  }
  0xf4   : > { %2549 = vmatprep.subr.bf16.mxu1 %v2804_v14 }
  0xf6   : > { %2510 = vmatpush3.bf16.msra.mxu0 %v2723_v22 }
  0xf7   : > { %2550 = vmatpush3.bf16.msra.mxu1 %v2724_v23  ;;  %2511 = vmatprep.subr.bf16.mxu0 %v2725_v25  ;;  %v2403_v23 = vld [vmem:[%s1030_s20] ss:$0 sm:$0xff] (!%p2402_p0) }
  0xf8   : > { %2551 = vmatprep.subr.bf16.mxu1 %v2804_v14 }
  0xfa   : > { %2512 = vmatpush3.bf16.msra.mxu0 %v2726_v29 }
  0xfb   : > { %2552 = vmatpush3.bf16.msra.mxu1 %v2727_v30  ;;  %2513 = vmatprep.subr.bf16.mxu0 %v2728_v31  ;;  %v2745_v30 = vld [vmem:[%s3284_s18 + $0x38] sm:$0xff] (!%p2402_p0)  }
  0xfc   : > { %2553 = vmatprep.subr.bf16.mxu1 %v2804_v14 }
  0xfe   : > { %2514 = vmatpush3.bf16.msra.mxu0 %v2729_v33 }
  0xff   : > { %2554 = vmatpush3.bf16.msra.mxu1 %v2730_v34  ;;  %2515 = vmatprep.subr.bf16.mxu0 %v2731_v35 }
 0x100   : > { %2555 = vmatprep.subr.bf16.mxu1 %v2804_v14 }
 0x102   : > { %2516 = vmatpush3.bf16.msra.mxu0 %v2732_v37 }
 0x103   : > { %2556 = vmatpush3.bf16.msra.mxu1 %v2733_v38  ;;  %2517 = vmatprep.subr.bf16.mxu0 %v2734_v39 }
 0x104   : > { %2557 = vmatprep.subr.bf16.mxu1 %v2804_v14 }
 0x106   : > { %2518 = vmatpush3.bf16.msra.mxu0 %v2735_v41 }
 0x107   : > { %2558 = vmatpush3.bf16.msra.mxu1 %v2737_v42  ;;  %2563 = vmatprep.subr.bf16.mxu0 (!%p2402_p0), %v2806_v17 }
 0x109   : > { %2023 = vmatmul.mubr.bf16.vlgmr.msra.gmra.mrb[8].mxu0 %v1123_v43 }
 0x10a   : > { %2560 = vmatmul.mubr.bf16.vlgmr.msra.gmra.mrb[8].mxu1 %v1125_v44  ;;  %2564 = vmatpush3.bf16.msra.mxu0 (!%p2402_p0), %v2738_v16 }
 0x10b   : > { %2579 = vmatprep.mubr.msk.bf16.mxu0 (!%p2402_p0), %vm2807_vm1, %v2806_v17  ;;  %2565 = vmatprep.subr.bf16.mxu0 (!%p2402_p0), %v2806_v17 }
 0x10e   : > { %2566 = vmatpush3.bf16.msra.mxu0 (!%p2402_p0), %v2739_v18 }
 0x10f   : > { %2567 = vmatprep.subr.bf16.mxu0 (!%p2402_p0), %v2806_v17 }
 0x112   : > { %2568 = vmatpush3.bf16.msra.mxu0 (!%p2402_p0), %v2740_v19 }
 0x113   : > { %2569 = vmatprep.subr.bf16.mxu0 (!%p2402_p0), %v2806_v17 }
 0x116   : > { %2570 = vmatpush3.bf16.msra.mxu0 (!%p2402_p0), %v2741_v20 }
 0x117   : > { %2571 = vmatprep.subr.bf16.mxu0 (!%p2402_p0), %v2806_v17 }
 0x11a   : > { %2572 = vmatpush3.bf16.msra.mxu0 (!%p2402_p0), %v2742_v21 }
 0x11b   : > { %2573 = vmatprep.subr.bf16.mxu0 (!%p2402_p0), %v2806_v17 }
 0x11e   : > { %2574 = vmatpush3.bf16.msra.mxu0 (!%p2402_p0), %v2743_v24 }
 0x11f   : > { %2575 = vmatprep.subr.bf16.mxu0 (!%p2402_p0), %v2806_v17 }
 0x122   : > { %2576 = vmatpush3.bf16.msra.mxu0 (!%p2402_p0), %v2744_v28 }
 0x123   : > { %2577 = vmatprep.subr.bf16.mxu0 (!%p2402_p0), %v2806_v17 }
 0x126   : > { %2578 = vmatpush3.bf16.msra.mxu0 (!%p2402_p0), %v2745_v30 }
 0x19c   : > { %v2431_v45 = vpop.f32.mrb[0].mxu0 }
 0x19d   : > { %v2453_v46 = vpop.f32.mrb[0].mxu1  ;;  %v2432_v47 = vpop.f32.mrb[1].mxu0 }
 0x19e   : > { %v2454_v48 = vpop.f32.mrb[1].mxu1  ;;  %v2433_v49 = vadd.f32 %v2432_v47, %v2431_v45  ;;  %v2434_v51 = vpop.f32.mrb[2].mxu0 }
 0x19f   : > { %v2455_v50 = vadd.f32 %v2454_v48, %v2453_v46  ;;  %v2456_v26 = vpop.f32.mrb[2].mxu1  ;;  %v2435_v52 = vpop.f32.mrb[3].mxu0 }
 0x1a0   : > { %v2457_v53 = vpop.f32.mrb[3].mxu1 }
 0x1a1   : > { %v1905_v54 = vadd.f32 %v2455_v50, %v2433_v49 }
 0x1bc   : > { %v2475_v55 = vpop.f32.mrb[4].mxu0 }
 0x1bd   : > { %v2497_v56 = vpop.f32.mrb[4].mxu1  ;;  %v2476_v57 = vpop.f32.mrb[5].mxu0 }
 0x1be   : > { %v2498_v58 = vpop.f32.mrb[5].mxu1  ;;  %v2477_v59 = vadd.f32 %v2476_v57, %v2475_v55  ;;  %v2478_v60 = vpop.f32.mrb[6].mxu0 }
 0x1bf   : > { %v2499_v61 = vadd.f32 %v2498_v58, %v2497_v56  ;;  %v2500_v62 = vpop.f32.mrb[6].mxu1  ;;  %v2479_v63 = vpop.f32.mrb[7].mxu0 }
 0x1c0   : > { %v2501_v0 = vpop.f32.mrb[7].mxu1  ;;  %v1945_v1 = vadd.f32 %v2477_v59, %v1905_v54 }
 0x1c2   : > { %v1985_v2 = vadd.f32 %v2499_v61, %v1945_v1 }
 0x1dc   : > { %v2519_v3 = vpop.f32.mrb[8].mxu0 }
 0x1dd   : > { %v2064_v4 = vpop.f32.mrb[8].mxu1  ;;  %v2520_v5 = vpop.f32.mrb[9].mxu0 }
 0x1de   : > { %v2561_v6 = vpop.f32.mrb[9].mxu1  ;;  %v2521_v7 = vadd.f32 %v2520_v5, %v2519_v3  ;;  %v2522_v8 = vpop.f32.mrb[10].mxu0 }
 0x1df   : > { %v2067_v9 = vpop.f32.mrb[10].mxu1  ;;  %v2523_v10 = vpop.f32.mrb[11].mxu0 }
 0x1e0   : > { %v2562_v11 = vpop.f32.mrb[11].mxu1  ;;  %v2025_v12 = vadd.f32 %v2521_v7, %v1985_v2  ;;  %2075 = sbr.rel (%p2402_p0) target bundleno = 716 (0x2cc), region = 89 }
 0x1e2   : > { %v2065_v14 = vadd.f32 %v2064_v4, %v2025_v12 }
 0x1e4   : > { %v2070_v15 = vadd.f32 %v2065_v14, %v1047_v13 }
 0x1e6   : > { %2071 = vst [vmem:[#allocation2] sm:$0x3] %v2070_v15 }
 0x1ed   : > { %v2076_v22 = vld [vmem:[#allocation2] sm:$0x3] }
 0x1ee   : > { %v2084_v25 = vadd.f32 %v2403_v23, %v2076_v22 }
 0x1f0   : > { %v2088_v29 = vmul.f32 %v2087_v27, %v2084_v25  ;;  %vm2086_vm2 = vcmp.gt.f32.partialorder %v2084_v25, 0.0 }
 0x1f2   : > { %v2089_v31 = vsel %vm2086_vm2, %v2084_v25, %v2088_v29 }
 0x1f3   : > { %v2090_v32 = vpack.c.bf16 %v2089_v31, %v2089_v31 }
 0x1f5   : > { %2580 = vmatmul.mubr.bf16.vlgmr.msra.gmra.mrb[0].mxu0 %v2090_v32 }
 0x2c8   : > { %v2189_v33 = vpop.f32.mrb[0].mxu0 }
 0x2c9   : > { %2196 = vst.msk [vmem:[%s3279_s15] sm:$0x3] %vm2195_vm3, %v2189_v33  ;;  %v2581_v34 = vpop.f32.mrb[1].mxu0 }
 0x2ca   : > { %v2192_v35 = vpop.f32.mrb[2].mxu0 }
 0x2cb   : > { %v2582_v36 = vpop.f32.mrb[3].mxu0 }
 0x2cc PF: > { %s16_s26 = sadd.s32 1, %s2800_s26   ;;  %s3430_s20 = smov %s2780_s21 }
 0x2cd   : > { %p13_p1 = scmp.ge.s32.totalorder %s16_s26, 6   ;;  %s3431_s21 = smov %s2892_s7 }
 0x2ce   : > { %s3432_s22 = smov %s2792_s24  ;;  %s3433_s23 = smov %s2796_s25 }
 0x2cf   : > { %s3434_s24 = smov %s3437_s0  ;;  %s3435_s25 = smov %s3441_s27 }
 0x2d0   :  { %15 = sbr.rel (!%p13_p1) target bundleno = 6 (0x6), region = 133 }

// kernel: cnndlga_forward.2
= control target key start
LH: loop header
LB: loop body
LE: loop exit
PB: predicated region body
PF: predicated region fallthrough
CT: control target
= control target key end

     0   :  { %15 = vsyncpa [#allocation3], 0  ;;  %s5869_s0 = inlined_call_operand.vmem [shape: f32[4], index: 0, kind: input, shape index: {}]   ;;  %s5870_s1 = inlined_call_operand.vmem [shape: f32[8,128], index: 1, kind: input, shape index: {}]   ;;  %s5871_s2 = inlined_call_operand.vmem [shape: f32[128,128], index: 2, kind: input, shape index: {}]   ;;  %s5872_s3 = inlined_call_operand.vmem [shape: f32[2,128], index: 3, kind: input, shape index: {}]   ;;  %s5873_s4 = inlined_call_operand.vmem [shape: bf16[128,96], index: 4, kind: input, shape index: {}]   ;;  %s5874_s5 = inlined_call_operand.vmem [shape: f32[3,4,8,8], index: 5, kind: input, shape index: {}]   ;;  %s5875_s6 = inlined_call_operand.vmem [shape: bf16[128,4], index: 6, kind: input, shape index: {}]   ;;  %s5876_s7 = inlined_call_operand.vmem [shape: bf16[4,128], index: 7, kind: input, shape index: {}]   ;;  %s5877_s8 = inlined_call_operand.vmem [shape: f32[44,128], index: 8, kind: output, shape index: {0}]   ;;  %s5878_s9 = inlined_call_operand.vmem [shape: f32[2,40,128], index: 9, kind: output, shape index: {1}]  }
   0x1   :  { %s22_s11 = sshll.u32 %s5869_s0, 4  ;;  %s23_s11 = int_to_ptr.vmem [resolvable:$true] %s22_s11 }
   0x2   :  { %s4589_s12 = scalar_lea.vmem %s23_s11, 16  ;;  %p4594_p1 = scmp.lt.s32.totalorder %s23_s11, %s23_s11 }
   0x3   :  { %p4590_p0 = scmp.ne.s32.totalorder %s23_s11, %s4589_s12  ;;  %p4595_p2 = scmp.lt.s32.totalorder %s4589_s12, %s4589_s12 }
   0x5   :  { %p4596_p3 = por %p4595_p2, %p4594_p1 }
   0x7   :  { %p4597_p4 = pnand %p4596_p3, %p4590_p0 }
   0x9   :  { %4600 = shalt.err (!%p4597_p4)
}
   0xa   :  { %s4603_s13 = smov [#allocation2]  }
   0xb   :  { %25 = dma.vmem_to_smem %s23_s11, 16, %s4603_s13, [#allocation3]  }
   0xc   :  { %4601 = dma.done.wait [#allocation3], 16  }
   0xd   :  { %4602 = vsyncadd [#allocation3], 4294967280 }
   0xe   :  { %43 = sfence }
   0xf   :  { %v46_v0 = vld [vmem:[%s5871_s2] sm:$0xff]  ;;  %v47_v1 = vld [vmem:[%s5871_s2 + $0x8] sm:$0xff]  ;;  %v48_v2 = vld [vmem:[%s5871_s2 + $0x10] sm:$0xff]  ;;  %v4604_v3 = vmov 0.0|0.0   ;;  %vm4605_vm0 = vmmov 0   ;;  %v4606_v6 = vmov 0.0  }
  0x10   :  { %4434 = vmatprep.subr.bf16.mxu0 %v4604_v3  ;;  %v4435_v4 = vpack.c.bf16 %v47_v1, %v46_v0  ;;  %v49_v5 = vld [vmem:[%s5871_s2 + $0x18] sm:$0xff]  ;;  %4202 = vmatprep.mubr.msk.f32.mxu0 %vm4605_vm0, %v4606_v6  ;;  %3923 = vst [vmem:[%s5878_s9] sm:$0xff] %v4606_v6  ;;  %3924 = vst [vmem:[%s5878_s9 + $0x8] sm:$0xff] %v4606_v6  ;;  %v50_v8 = vld [vmem:[%s5871_s2 + $0x20] sm:$0xff]  ;;  %vm644_vm1 = vcmask 1041408   ;;  %vm413_vm2 = vcmask 130048   ;;  %vm506_vm3 = vcmask 27648  }
  0x11   :  { %3925 = vst [vmem:[%s5878_s9 + $0x10] sm:$0xff] %v4606_v6  ;;  %3926 = vst [vmem:[%s5878_s9 + $0x18] sm:$0xff] %v4606_v6  ;;  %4458 = vmatprep.subr.bf16.mxu1 %v4604_v3  ;;  %4237 = vmatprep.mubr.msk.f32.mxu1 %vm4605_vm0, %v4606_v6  ;;  %v4438_v7 = vpack.c.bf16 %v49_v5, %v48_v2  ;;  %v51_v9 = vld [vmem:[%s5871_s2 + $0x28] sm:$0xff]  ;;  %v52_v10 = vld [vmem:[%s5871_s2 + $0x30] sm:$0xff]  ;;  %s4609_s19 = smov 112   ;;  %s341_s20 = sld [smem:[#allocation2]] }
  0x12   :  { %3927 = vst [vmem:[%s5878_s9 + $0x20] sm:$0xff] %v4606_v6  ;;  %3928 = vst [vmem:[%s5878_s9 + $0x28] sm:$0xff] %v4606_v6  ;;  %4436 = vmatpush3.bf16.msra.mxu0 %v4435_v4  ;;  %4460 = vmatpush3.bf16.msra.mxu1 %v4435_v4  ;;  %v53_v11 = vld [vmem:[%s5871_s2 + $0x38] sm:$0xff]  ;;  %v4441_v12 = vpack.c.bf16 %v51_v9, %v50_v8  ;;  %v54_v13 = vld [vmem:[%s5871_s2 + $0x40] sm:$0xff]  ;;  %vm637_vm4 = vcmask 31744   ;;  %vm1407_vm5 = vcmask 1043456  }
  0x13   :  { %3929 = vst [vmem:[%s5878_s9 + $0x30] sm:$0xff] %v4606_v6  ;;  %3930 = vst [vmem:[%s5878_s9 + $0x38] sm:$0xff] %v4606_v6  ;;  %4437 = vmatprep.subr.bf16.mxu0 %v4604_v3  ;;  %4461 = vmatprep.subr.bf16.mxu1 %v4604_v3  ;;  %v55_v14 = vld [vmem:[%s5871_s2 + $0x48] sm:$0xff]  ;;  %v4444_v15 = vpack.c.bf16 %v53_v11, %v52_v10  ;;  %v56_v17 = vld [vmem:[%s5871_s2 + $0x50] sm:$0xff]  ;;  %vm1024_vm6 = vcmask 60416   ;;  %s4611_s10 = smov 48  }
  0x14   :  { %3931 = vst [vmem:[%s5878_s9 + $0x40] sm:$0xff] %v4606_v6  ;;  %3932 = vst [vmem:[%s5878_s9 + $0x48] sm:$0xff] %v4606_v6  ;;  %v4447_v16 = vpack.c.bf16 %v55_v14, %v54_v13  ;;  %v57_v18 = vld [vmem:[%s5871_s2 + $0x58] sm:$0xff]  ;;  %v58_v20 = vld [vmem:[%s5871_s2 + $0x60] sm:$0xff]  ;;  %s4612_s11 = smov 96   ;;  %s4032_s12 = sld [smem:[#allocation2 + $0x1]] }
  0x15   :  { %v4450_v19 = vpack.c.bf16 %v57_v18, %v56_v17  ;;  %v59_v21 = vld [vmem:[%s5871_s2 + $0x68] sm:$0xff]  ;;  %v60_v23 = vld [vmem:[%s5871_s2 + $0x70] sm:$0xff]  ;;  %v61_v24 = vld [vmem:[%s5871_s2 + $0x78] sm:$0xff]  ;;  %vm1400_vm7 = vcmask 64512   ;;  %vm1984_vm8 = vcmask 1045504   ;;  %vm2436_vm9 = vcmask 1042432  }
  0x16   :  { %4439 = vmatpush3.bf16.msra.mxu0 %v4438_v7  ;;  %4463 = vmatpush3.bf16.msra.mxu1 %v4438_v7  ;;  %v4453_v22 = vpack.c.bf16 %v59_v21, %v58_v20  ;;  %v4456_v25 = vpack.c.bf16 %v61_v24, %v60_v23  ;;  %v45_v26 = vld [vmem:[%s5870_s1] sm:$0xff]  ;;  %v4790_v28 = vld [vmem:[%s5873_s4 + $0x10] sm:$0xff]   ;;  %s4607_s1 = smov 80   ;;  %v4796_v29 = vld [vmem:[%s5873_s4 + $0x8] sm:$0xff]   ;;  %vm2286_vm10 = vcmask 44032   ;;  %s4039_s25 = sld [smem:[#allocation2 + $0x2]] }
  0x17   :  { %4440 = vmatprep.subr.bf16.mxu0 %v4604_v3  ;;  %4464 = vmatprep.subr.bf16.mxu1 %v4604_v3  ;;  %v4785_v27 = vld [vmem:[%s5873_s4] sm:$0xff]   ;;  %v4802_v30 = vld [vmem:[%s5873_s4 + $0x18] sm:$0xff]   ;;  %v4816_v32 = vld [vmem:[%s5873_s4 + $0x28] sm:$0xff]   ;;  %vm2432_vm11 = vcmask 48128   ;;  %vm3160_vm12 = vcmask 29696   ;;  %s4052_s16 = sld [smem:[#allocation2 + $0x3]] }
  0x18   :  { %342 = vrot.lane.b32.xlu0 %v4785_v27, %s4607_s1  ;;  %346 = vrot.lane.b32.xlu1 %v4790_v28, %s4607_s1  ;;  %v4811_v31 = vld [vmem:[%s5873_s4 + $0x20] sm:$0xff]   ;;  %v4825_v33 = vld [vmem:[%s5873_s4 + $0x30] sm:$0xff]  }
  0x19   :  { %v4830_v34 = vld [vmem:[%s5873_s4 + $0x38] sm:$0xff]   ;;  %v4016_v51 = vld [vmem:[%s5872_s3] ss:$0 sm:$0xff]  ;;  %v4017_v53 = vld [vmem:[%s5872_s3 + $0x1] ss:$0 sm:$0xff]  ;;  %s4608_s3 = smov 64  }
  0x1a   :  { %4442 = vmatpush3.bf16.msra.mxu0 %v4441_v12  ;;  %4466 = vmatpush3.bf16.msra.mxu1 %v4441_v12 }
  0x1b   :  { %4443 = vmatprep.subr.bf16.mxu0 %v4604_v3  ;;  %4467 = vmatprep.subr.bf16.mxu1 %v4604_v3 }
  0x1c   :  { %344 = vrot.lane.b32.xlu0 %v4796_v29, %s4607_s1  ;;  %348 = vrot.lane.b32.xlu1 %v4802_v30, %s4607_s1 }
  0x1e   :  { %4445 = vmatpush3.bf16.msra.mxu0 %v4444_v15  ;;  %4469 = vmatpush3.bf16.msra.mxu1 %v4444_v15 }
  0x1f   :  { %4446 = vmatprep.subr.bf16.mxu0 %v4604_v3  ;;  %4470 = vmatprep.subr.bf16.mxu1 %v4604_v3 }
  0x20   :  { %350 = vrot.lane.b32.xlu0 %v4811_v31, %s4607_s1  ;;  %352 = vrot.lane.b32.xlu1 %v4816_v32, %s4607_s1 }
  0x22   :  { %4448 = vmatpush3.bf16.msra.mxu0 %v4447_v16  ;;  %4472 = vmatpush3.bf16.msra.mxu1 %v4447_v16 }
  0x23   :  { %4449 = vmatprep.subr.bf16.mxu0 %v4604_v3  ;;  %4473 = vmatprep.subr.bf16.mxu1 %v4604_v3 }
  0x24   :  { %354 = vrot.lane.b32.xlu0 %v4825_v33, %s4607_s1  ;;  %356 = vrot.lane.b32.xlu1 %v4830_v34, %s4607_s1 }
  0x26   :  { %4451 = vmatpush3.bf16.msra.mxu0 %v4450_v19  ;;  %4475 = vmatpush3.bf16.msra.mxu1 %v4450_v19 }
  0x27   :  { %4452 = vmatprep.subr.bf16.mxu0 %v4604_v3  ;;  %4476 = vmatprep.subr.bf16.mxu1 %v4604_v3 }
  0x2a   :  { %4454 = vmatpush3.bf16.msra.mxu0 %v4453_v22  ;;  %4478 = vmatpush3.bf16.msra.mxu1 %v4453_v22 }
  0x2b   :  { %4455 = vmatprep.subr.bf16.mxu0 %v4604_v3  ;;  %4479 = vmatprep.subr.bf16.mxu1 %v4604_v3 }
  0x2e   :  { %4457 = vmatpush3.bf16.msra.mxu0 %v4456_v25  ;;  %4481 = vmatpush3.bf16.msra.mxu1 %v4456_v25 }
  0x2f   :  { %4240 = vmatprep.subr.bf16.mxu0 %v4606_v6  ;;  %4260 = vmatprep.subr.bf16.mxu1 %v4606_v6 }
  0x31   :  { %4203 = vmatmul.mubr.f32.vlgmr.msra.gmra.mrb[0].mxu0 %v45_v26 }
  0x32   :  { %4256 = vmatprep.mubr.msk.bf16.mxu0 %vm4605_vm0, %v4606_v6  ;;  %4241 = vmatpush3.bf16.msra.mxu0 %v4785_v27 }
  0x33   :  { %4242 = vmatprep.subr.bf16.mxu0 %v4606_v6 }
  0x36   :  { %4243 = vmatpush3.bf16.msra.mxu0 %v4796_v29 }
  0x37   :  { %4244 = vmatprep.subr.bf16.mxu0 %v4606_v6 }
  0x3a   :  { %4245 = vmatpush3.bf16.msra.mxu0 %v4790_v28 }
  0x3b   :  { %4246 = vmatprep.subr.bf16.mxu0 %v4606_v6 }
  0x3e   :  { %4247 = vmatpush3.bf16.msra.mxu0 %v4802_v30 }
  0x3f   :  { %4248 = vmatprep.subr.bf16.mxu0 %v4606_v6 }
  0x42   :  { %4249 = vmatpush3.bf16.msra.mxu0 %v4811_v31 }
  0x43   :  { %4250 = vmatprep.subr.bf16.mxu0 %v4606_v6 }
  0x46   :  { %4251 = vmatpush3.bf16.msra.mxu0 %v4816_v32 }
  0x47   :  { %4252 = vmatprep.subr.bf16.mxu0 %v4606_v6 }
  0x4a   :  { %4253 = vmatpush3.bf16.msra.mxu0 %v4825_v33 }
  0x4b   :  { %4254 = vmatprep.subr.bf16.mxu0 %v4606_v6 }
  0x4e   :  { %4255 = vmatpush3.bf16.msra.mxu0 %v4830_v34 }
  0x8a   :  { %v343_v38 = vpop.permute.xlu0 %342  ;;  %v347_v41 = vpop.permute.xlu1 %346 }
  0x8e   :  { %v345_v40 = vpop.permute.xlu0 %344  ;;  %v349_v42 = vpop.permute.xlu1 %348 }
  0x92   :  { %v351_v43 = vpop.permute.xlu0 %350  ;;  %v353_v44 = vpop.permute.xlu1 %352 }
  0x96   :  { %v355_v45 = vpop.permute.xlu0 %354  ;;  %v357_v46 = vpop.permute.xlu1 %356 }
 0x104   :  { %v128_v35 = vpop.f32.mrb[0].mxu0 }
 0x105   :  { %v132_v36 = vsub.f32 %v45_v26, %v128_v35  ;;  %v4204_v37 = vpop.f32.mrb[1].mxu0 }
 0x107   :  { %v133_v39 = vmul.f32 %v132_v36, %v132_v36 }
 0x109   :  { %4238 = vmatmul.mubr.f32.vlgmr.msra.gmra.mrb[0].mxu1 %v133_v39 }
 0x10a   :  { %4261 = vmatpush3.bf16.msra.mxu1 %v343_v38  ;;  %4276 = vmatprep.mubr.msk.bf16.mxu1 %vm4605_vm0, %v4606_v6 }
 0x10b   :  { %4262 = vmatprep.subr.bf16.mxu1 %v4606_v6 }
 0x10e   :  { %4263 = vmatpush3.bf16.msra.mxu1 %v345_v40 }
 0x10f   :  { %4264 = vmatprep.subr.bf16.mxu1 %v4606_v6 }
 0x112   :  { %4265 = vmatpush3.bf16.msra.mxu1 %v347_v41 }
 0x113   :  { %4266 = vmatprep.subr.bf16.mxu1 %v4606_v6 }
 0x116   :  { %4267 = vmatpush3.bf16.msra.mxu1 %v349_v42 }
 0x117   :  { %4268 = vmatprep.subr.bf16.mxu1 %v4606_v6 }
 0x11a   :  { %4269 = vmatpush3.bf16.msra.mxu1 %v351_v43 }
 0x11b   :  { %4270 = vmatprep.subr.bf16.mxu1 %v4606_v6 }
 0x11e   :  { %4271 = vmatpush3.bf16.msra.mxu1 %v353_v44  ;;  %v4610_v44 = vmov 1966171168  }
 0x11f   :  { %4272 = vmatprep.subr.bf16.mxu1 %v4606_v6 }
 0x122   :  { %4273 = vmatpush3.bf16.msra.mxu1 %v355_v45  ;;  %v537_v45 = vunpack.c.l.s4 %v4610_v44 }
 0x123   :  { %4274 = vmatprep.subr.bf16.mxu1 %v4606_v6 }
 0x126   :  { %4275 = vmatpush3.bf16.msra.mxu1 %v357_v46  ;;  %v539_v46 = vlaneseq }
 0x127   :  { %4280 = vmatprep.subr.bf16.mxu1 %v4606_v6 }
 0x1dc   :  { %v202_v47 = vpop.f32.mrb[0].mxu1 }
 0x1dd   :  { %v203_v48 = vadd.f32 1e-12, %v202_v47  ;;  %v4239_v49 = vpop.f32.mrb[1].mxu1 }
 0x1df   :  { %4513 = vrsqrt.f32 %v203_v48  ;;  %v529_v48 = vstv %s341_s20 }
 0x1e9   :  { %v4514_v50 = vpop.eup %4513 }
 0x1ea   :  { %v207_v52 = vmul.f32 %v4514_v50, %v132_v36  ;;  %v538_v50 = vunpack.c.0.s8 %v537_v45 }
 0x1ec   :  { %v212_v54 = vmul.f32 %v4016_v51, %v207_v52  ;;  %v4906_v51 = vshrl.u32 %v539_v46, 7 }
 0x1ee   :  { %v4861_v55 = vadd.f32 %v4017_v53, %v212_v54  ;;  %v4913_v54 = vsub.s32 %v538_v50, %v4906_v51 }
 0x1f0   :  { %v218_v56 = vpack.c.bf16 %v4861_v55, %v4861_v55  ;;  %v4874_v7 = vcombine.high %v4861_v55, %v4861_v55 }
 0x1f2   :  { %4257 = vmatmul.mubr.bf16.vlgmr.msra.gmra.mrb[4].mxu0 %v218_v56  ;;  %4277 = vmatmul.mubr.bf16.vlgmr.msra.gmra.mrb[4].mxu1 %v218_v56  ;;  %v646_v57 = vsel %vm644_vm1, %v218_v56, 0  ;;  %v636_v10 = vpack.c.bf16 %v4874_v7, %v4874_v7 }
 0x1f3   :  { %4482 = vmatprep.subr.msk.bf16.mxu0 %vm644_vm1, %v218_v56  ;;  %4282 = vmatprep.mubr.msk.bf16.mxu1 %vm4605_vm0, %v4606_v6 }
 0x1f4   :  { %4293 = vmatpush3.bf16.msra.mxu0 %v646_v57  ;;  %v704_v13 = vsel %vm644_vm1, %v636_v10, 0 }
 0x1f5   :  { %4304 = vmatprep.subr.bf16.mxu0 %v4606_v6 }
 0x2c5   :  { %v320_v58 = vpop.f32.mrb[4].mxu0  ;;  %v400_v59 = vpop.f32.mrb[4].mxu1 }
 0x2c6   :  { %v411_v60 = vpack.c.bf16 %v400_v59, %v400_v59  ;;  %v4258_v61 = vpop.f32.mrb[5].mxu0  ;;  %v4278_v62 = vpop.f32.mrb[5].mxu1  ;;  %v407_v1 = vcombine.high %v400_v59, %v400_v59  ;;  %v4876_v8 = vpack.c.bf16 %v320_v58, %v320_v58  ;;  %v327_v11 = vcombine.high %v320_v58, %v320_v58 }
 0x2c7   :  { %v323_v63 = vpop.f32.mrb[6].mxu0  ;;  %v403_v0 = vpop.f32.mrb[6].mxu1  ;;  %v4918_v61 = vsub.s32 0, %v4906_v51 }
 0x2c8   :  { %v4259_v2 = vpop.f32.mrb[7].mxu0  ;;  %v4279_v3 = vpop.f32.mrb[7].mxu1  ;;  %v418_v4 = vsel %vm413_vm2, %v411_v60, 0  ;;  %v412_v5 = vpack.c.bf16 %v407_v1, %v407_v1  ;;  %v4886_v12 = vpack.c.bf16 %v327_v11, %v327_v11  ;;  %v332_v11 = vld [vmem:[%s5874_s5 + $0x18] sm:$0xff] }
 0x2c9   :  { %4281 = vmatpush3.bf16.xpose.msra.mxu1 %v418_v4  ;;  %v329_v2 = vld [vmem:[%s5874_s5] sm:$0xff]  ;;  %v330_v3 = vld [vmem:[%s5874_s5 + $0x8] sm:$0xff] }
 0x2ca   :  { %4286 = vmatprep.subr.bf16.mxu1 %v4606_v6  ;;  %v464_v9 = vsel %vm413_vm2, %v412_v5, 0 }
 0x2d0   :  { %4283 = vmatmul.mubr.msk.bf16.vlgmr.msra.gmra.mrb[8].mxu1 %vm413_vm2, %v4876_v8 }
 0x2d1   :  { %4287 = vmatpush3.bf16.xpose.msra.mxu1 %v464_v9  ;;  %4288 = vmatprep.mubr.msk.bf16.mxu1 %vm4605_vm0, %v4606_v6 }
 0x2d2   :  { %4483 = vmatprep.subr.msk.bf16.mxu1 %vm644_vm1, %v636_v10  ;;  %v331_v10 = vld [vmem:[%s5874_s5 + $0x10] sm:$0xff] }
 0x2d8   :  { %4289 = vmatmul.mubr.msk.bf16.vlgmr.msra.gmra.mrb[12].mxu1 %vm413_vm2, %v4886_v12 }
 0x2d9   :  { %4299 = vmatpush3.bf16.msra.mxu1 %v704_v13 }
 0x2da   :  { %4324 = vmatprep.subr.bf16.mxu1 %v4606_v6 }
 0x3a3   :  { %v454_v14 = vpop.f32.mrb[8].mxu1 }
 0x3a4   :  { %v4284_v15 = vpop.f32.mrb[9].mxu1  ;;  %v507_v16 = vsel %vm506_vm3, %v454_v14, -inf }
 0x3a5   :  { %508 = vmax.xlane.f32.xlu0 %v507_v16  ;;  %v457_v17 = vpop.f32.mrb[10].mxu1 }
 0x3a6   :  { %v4285_v18 = vpop.f32.mrb[11].mxu1 }
 0x3ab   :  { %v500_v19 = vpop.f32.mrb[12].mxu1 }
 0x3ac   :  { %v4290_v20 = vpop.f32.mrb[13].mxu1  ;;  %v510_v21 = vsel %vm506_vm3, %v500_v19, -inf }
 0x3ad   :  { %511 = vmax.xlane.f32.xlu1 %v510_v21  ;;  %v503_v22 = vpop.f32.mrb[14].mxu1 }
 0x3ae   :  { %v4291_v23 = vpop.f32.mrb[15].mxu1 }
 0x3be   :  { %859 = vrot.lane.b32.xlu1 %v4785_v27, %s4608_s3 }
 0x3c2   :  { %863 = vrot.lane.b32.xlu1 %v4790_v28, %s4608_s3 }
 0x3c6   :  { %865 = vrot.lane.b32.xlu1 %v4802_v30, %s4608_s3 }
 0x3ca   :  { %869 = vrot.lane.b32.xlu1 %v4816_v32, %s4608_s3 }
 0x3ce   :  { %873 = vrot.lane.b32.xlu1 %v4830_v34, %s4608_s3 }
 0x3d2   :  { %976 = vrot.lane.b32.xlu1 %v4886_v12, %s4609_s19 }
 0x432   :  { %v509_v24 = vpop.xlane.xlu0 %508 }
 0x433   :  { %v513_v25 = vsub.f32 %v454_v14, %v509_v24 }
 0x435   :  { %v515_v26 = vmul.f32 1.442695, %v513_v25 }
 0x437   :  { %4515 = vpow2.f32 %v515_v26 }
 0x43a   :  { %v512_v35 = vpop.xlane.xlu1 %511 }
 0x43b   :  { %v514_v36 = vsub.f32 %v500_v19, %v512_v35 }
 0x43d   :  { %v517_v37 = vmul.f32 1.442695, %v514_v36 }
 0x43e   :  { %v860_v35 = vpop.permute.xlu1 %859 }
 0x43f   :  { %4517 = vpow2.f32 %v517_v37 }
 0x441   :  { %v4516_v38 = vpop.eup %4515 }
 0x442   :  { %v519_v39 = vsel %vm506_vm3, %v4516_v38, 0.0  ;;  %v864_v46 = vpop.permute.xlu1 %863 }
 0x443   :  { %520 = vadd.xlane.f32.xlu0 %v519_v39 }
 0x449   :  { %v4518_v40 = vpop.eup %4517 }
 0x44a   :  { %v522_v41 = vsel %vm506_vm3, %v4518_v40, 0.0 }
 0x44b   :  { %523 = vadd.xlane.f32.xlu0 %v522_v41 }
 0x461   :  { %861 = vrot.lane.b32.xlu0 %v4796_v29, %s4608_s3 }
 0x465   :  { %867 = vrot.lane.b32.xlu0 %v4811_v31, %s4608_s3 }
 0x469   :  { %871 = vrot.lane.b32.xlu0 %v4825_v33, %s4608_s3 }
 0x46d   :  { %927 = vrot.lane.b32.xlu0 %v4876_v8, %s4609_s19 }
 0x4d0   :  { %v521_v42 = vpop.xlane.xlu0 %520 }
 0x4d1   :  { %4519 = vrcp.f32 %v521_v42 }
 0x4d8   :  { %v524_v43 = vpop.xlane.xlu0 %523 }
 0x4d9   :  { %4521 = vrcp.f32 %v524_v43 }
 0x4db   :  { %v4520_v47 = vpop.eup %4519 }
 0x4dc   :  { %v526_v49 = vmul.f32 %v4520_v47, %v4516_v38  ;;  %v862_v42 = vpop.permute.xlu0 %861 }
 0x4de   :  { %v530_v52 = vmul.f32 %v529_v48, %v526_v49  ;;  %3933 = vst.msk [vmem:[%s5878_s9] sm:$0xf] %vm506_vm3, %v526_v49 }
 0x4e0   :  { %v532_v53 = vadd.f32 1.0, %v530_v52  ;;  %v868_v49 = vpop.permute.xlu0 %867 }
 0x4e2   :  { %v542_v56 = vrot.slane %v532_v53, %v4913_v54 }
 0x4e3   :  { %v4522_v57 = vpop.eup %4521 }
 0x4e4   :  { %v528_v58 = vmul.f32 %v4522_v57, %v4518_v40  ;;  %v543_v59 = vcombine.high %v542_v56, %v542_v56  ;;  %v550_v60 = vrot.slane %v542_v56, %v4913_v54  ;;  %v872_v52 = vpop.permute.xlu0 %871  ;;  %v761_v56 = vrot.slane %v4861_v55, %v4913_v54 }
 0x4e6   :  { %v531_v62 = vmul.f32 %v529_v48, %v528_v58  ;;  %3934 = vst.msk [vmem:[%s5878_s9 + $0x28] sm:$0xf] %vm506_vm3, %v528_v58  ;;  %v557_v63 = vrot.slane %v543_v59, %v4913_v54  ;;  %v558_v0 = vcombine.high %v550_v60, %v550_v60  ;;  %v587_v1 = vrot.slane %v550_v60, %v4918_v61  ;;  %v866_v48 = vpop.permute.xlu1 %865 }
 0x4e7   :  { %v769_v57 = vcombine.high %v761_v56, %v761_v56  ;;  %v777_v58 = vrot.slane %v761_v56, %v4913_v54  ;;  %v768_v60 = vrot.slane %v4874_v7, %v4913_v54 }
 0x4e8   :  { %v533_v4 = vadd.f32 1.0, %v531_v62  ;;  %v559_v5 = vcombine.high %v557_v63, %v557_v63  ;;  %v591_v9 = vrot.slane %v557_v63, %v4918_v61  ;;  %v595_v13 = vrot.slane %v558_v0, %v4918_v61 }
 0x4e9   :  { %v624_v14 = vmul.f32 %v587_v1, %v329_v2  ;;  %v791_v59 = vrot.slane %v769_v57, %v4913_v54  ;;  %v799_v63 = vcombine.high %v777_v58, %v777_v58  ;;  %v4971_v1 = vrot.slane %v777_v58, %v4918_v61  ;;  %v928_v58 = vpop.permute.xlu0 %927 }
 0x4ea   :  { %v625_v15 = vmul.f32 %v591_v9, %v330_v3  ;;  %v599_v16 = vrot.slane %v559_v5, %v4918_v61  ;;  %v566_v17 = vrot.slane %v533_v4, %v4913_v54  ;;  %v626_v18 = vmul.f32 %v595_v13, %v331_v10  ;;  %v870_v50 = vpop.permute.xlu1 %869 }
 0x4eb   :  { %v4974_v4 = vrot.slane %v791_v59, %v4918_v61  ;;  %v770_v5 = vcombine.high %v768_v60, %v768_v60 }
 0x4ec   :  { %v632_v19 = vpack.c.bf16 %v625_v15, %v624_v14  ;;  %v627_v20 = vmul.f32 %v599_v16, %v332_v11  ;;  %v567_v21 = vcombine.high %v566_v17, %v566_v17  ;;  %v574_v22 = vrot.slane %v566_v17, %v4913_v54 }
 0x4ed   :  { %v784_v14 = vrot.slane %v768_v60, %v4913_v54 }
 0x4ee   :  { %4294 = vmatprep.mubr.msk.bf16.mxu0 %vm637_vm4, %v632_v19  ;;  %v633_v23 = vpack.c.bf16 %v627_v20, %v626_v18  ;;  %v581_v24 = vrot.slane %v567_v21, %v4913_v54  ;;  %v582_v25 = vcombine.high %v574_v22, %v574_v22  ;;  %v603_v26 = vrot.slane %v574_v22, %v4918_v61  ;;  %v874_v53 = vpop.permute.xlu1 %873 }
 0x4ef   :  { %v798_v18 = vrot.slane %v770_v5, %v4913_v54  ;;  %v800_v22 = vcombine.high %v784_v14, %v784_v14 }
 0x4f0   :  { %4295 = vmatmul.mubr.msk.bf16.vlgmr.msra.gmra.mrb[8].mxu0 %vm637_vm4, %v633_v23  ;;  %v583_v36 = vcombine.high %v581_v24, %v581_v24  ;;  %v607_v37 = vrot.slane %v581_v24, %v4918_v61  ;;  %v611_v38 = vrot.slane %v582_v25, %v4918_v61  ;;  %v628_v39 = vmul.f32 %v603_v26, %v329_v2 }
 0x4f1   :  { %4305 = vmatpush3.bf16.msra.mxu0 %v860_v35  ;;  %4320 = vmatprep.mubr.msk.bf16.mxu0 %vm4605_vm0, %v4606_v6  ;;  %v4991_v25 = vrot.slane %v784_v14, %v4918_v61  ;;  %v802_v35 = vcombine.high %v798_v18, %v798_v18 }
 0x4f2   :  { %v629_v40 = vmul.f32 %v607_v37, %v330_v3  ;;  %v615_v41 = vrot.slane %v583_v36, %v4918_v61  ;;  %4306 = vmatprep.subr.bf16.mxu0 %v4606_v6  ;;  %v630_v44 = vmul.f32 %v611_v38, %v331_v10  ;;  %v801_v3 = vcombine.high %v791_v59, %v791_v59 }
 0x4f3   :  { %v4977_v10 = vrot.slane %v799_v63, %v4918_v61  ;;  %v4994_v36 = vrot.slane %v798_v18, %v4918_v61  ;;  %v4997_v38 = vrot.slane %v800_v22, %v4918_v61 }
 0x4f4   :  { %v634_v43 = vpack.c.bf16 %v629_v40, %v628_v39  ;;  %v631_v45 = vmul.f32 %v615_v41, %v332_v11  ;;  %v4984_v16 = vrot.slane %v801_v3, %v4918_v61 }
 0x4f5   :  { %4307 = vmatpush3.bf16.msra.mxu0 %v862_v42  ;;  %v5003_v42 = vrot.slane %v802_v35, %v4918_v61 }
 0x4f6   :  { %4300 = vmatprep.mubr.msk.bf16.mxu1 %vm637_vm4, %v634_v43  ;;  %v635_v47 = vpack.c.bf16 %v631_v45, %v630_v44  ;;  %4308 = vmatprep.subr.bf16.mxu0 %v4606_v6 }
 0x4f8   :  { %4301 = vmatmul.mubr.msk.bf16.vlgmr.msra.gmra.mrb[16].mxu1 %vm637_vm4, %v635_v47 }
 0x4f9   :  { %4309 = vmatpush3.bf16.msra.mxu0 %v864_v46  ;;  %4326 = vmatprep.mubr.msk.bf16.mxu1 %vm4605_vm0, %v4606_v6 }
 0x4fa   :  { %4310 = vmatprep.subr.bf16.mxu0 %v4606_v6 }
 0x4fd   :  { %4311 = vmatpush3.bf16.msra.mxu0 %v866_v48 }
 0x4fe   :  { %4312 = vmatprep.subr.bf16.mxu0 %v4606_v6 }
 0x501   :  { %4313 = vmatpush3.bf16.msra.mxu0 %v868_v49 }
 0x502   :  { %4314 = vmatprep.subr.bf16.mxu0 %v4606_v6 }
 0x505   :  { %4315 = vmatpush3.bf16.msra.mxu0 %v870_v50 }
 0x506   :  { %4316 = vmatprep.subr.bf16.mxu0 %v4606_v6 }
 0x509   :  { %4317 = vmatpush3.bf16.msra.mxu0 %v872_v52 }
 0x50a   :  { %4318 = vmatprep.subr.bf16.mxu0 %v4606_v6 }
 0x50d   :  { %4319 = vmatpush3.bf16.msra.mxu0 %v874_v53 }
 0x50e   :  { %4348 = vmatprep.subr.bf16.mxu0 %v4606_v6 }
 0x5c3   :  { %v4296_v62 = vpop.f32.mrb[8].mxu0 }
 0x5c4   :  { %v682_v0 = vpop.f32.mrb[9].mxu0  ;;  %v845_v15 = vmul.f32 %v4296_v62, %v4977_v10  ;;  %v977_v62 = vpop.permute.xlu1 %976 }
 0x5c5   :  { %v4297_v2 = vpop.f32.mrb[10].mxu0  ;;  %v843_v11 = vmul.f32 %v4971_v1, %v682_v0 }
 0x5c6   :  { %v685_v9 = vpop.f32.mrb[11].mxu0  ;;  %v846_v19 = vmul.f32 %v4297_v2, %v4984_v16 }
 0x5c7   :  { %v844_v13 = vmul.f32 %v4974_v4, %v685_v9 }
 0x5c9   :  { %v851_v17 = vadd.f32 %v844_v13, %v843_v11 }
 0x5cb   :  { %v852_v20 = vadd.f32 %v851_v17, %v845_v15  ;;  %v4302_v21 = vpop.f32.mrb[16].mxu1 }
 0x5cc   :  { %v740_v23 = vpop.f32.mrb[17].mxu1  ;;  %v849_v41 = vmul.f32 %v4302_v21, %v4997_v38 }
 0x5cd   :  { %v4988_v24 = vadd.f32 %v852_v20, %v846_v19  ;;  %v4303_v26 = vpop.f32.mrb[18].mxu1  ;;  %v847_v39 = vmul.f32 %v4991_v25, %v740_v23 }
 0x5ce   :  { %v743_v37 = vpop.f32.mrb[19].mxu1  ;;  %v850_v44 = vmul.f32 %v4303_v26, %v5003_v42 }
 0x5cf   :  { %v848_v40 = vmul.f32 %v4994_v36, %v743_v37  ;;  %v1398_v60 = vpack.c.bf16 %v4988_v24, %v4988_v24 }
 0x5d1   :  { %v854_v43 = vadd.f32 %v848_v40, %v847_v39  ;;  %v1409_v63 = vsel %vm1407_vm5, %v1398_v60, 0  ;;  %v1047_v39 = vstv %s4032_s12 }
 0x5d3   :  { %v855_v45 = vadd.f32 %v854_v43, %v849_v41 }
 0x5d5   :  { %v5006_v46 = vadd.f32 %v855_v45, %v850_v44 }
 0x5d7   :  { %v858_v47 = vpack.c.bf16 %v5006_v46, %v4988_v24  ;;  %v5025_v0 = vpack.c.bf16 %v5006_v46, %v5006_v46 }
 0x5d9   :  { %4321 = vmatmul.mubr.bf16.vlgmr.msra.gmra.mrb[12].mxu0 %v858_v47 }
 0x5da   :  { %4364 = vmatprep.mubr.msk.bf16.mxu0 %vm4605_vm0, %v4606_v6 }
 0x6ac   :  { %v917_v48 = vpop.f32.mrb[12].mxu0 }
 0x6ad   :  { %v924_v49 = vpack.c.bf16 %v917_v48, %v917_v48  ;;  %v4322_v50 = vpop.f32.mrb[13].mxu0 }
 0x6ae   :  { %v920_v52 = vpop.f32.mrb[14].mxu0 }
 0x6af   :  { %v933_v53 = vsel %vm413_vm2, %v924_v49, 0  ;;  %v4323_v56 = vpop.f32.mrb[15].mxu0  ;;  %v925_v57 = vpack.c.bf16 %v920_v52, %v920_v52 }
 0x6b0   :  { %4325 = vmatpush3.bf16.xpose.msra.mxu1 %v933_v53 }
 0x6b1   :  { %4330 = vmatprep.subr.bf16.mxu1 %v4606_v6  ;;  %v982_v59 = vsel %vm413_vm2, %v925_v57, 0 }
 0x6b7   :  { %4327 = vmatmul.mubr.msk.bf16.vlgmr.msra.gmra.mrb[20].mxu1 %vm413_vm2, %v928_v58  ;;  %v333_v58 = vld [vmem:[%s5874_s5 + $0x20] sm:$0xff] }
 0x6b8   :  { %4331 = vmatpush3.bf16.xpose.msra.mxu1 %v982_v59  ;;  %4332 = vmatprep.mubr.msk.bf16.mxu1 %vm4605_vm0, %v4606_v6 }
 0x6b9   :  { %4484 = vmatprep.subr.msk.bf16.mxu1 %vm1407_vm5, %v1398_v60  ;;  %v334_v60 = vld [vmem:[%s5874_s5 + $0x28] sm:$0xff] }
 0x6bf   :  { %4333 = vmatmul.mubr.msk.bf16.vlgmr.msra.gmra.mrb[24].mxu1 %vm413_vm2, %v977_v62  ;;  %v335_v62 = vld [vmem:[%s5874_s5 + $0x30] sm:$0xff] }
 0x6c0   :  { %4337 = vmatpush3.bf16.msra.mxu1 %v1409_v63 }
 0x6c1   :  { %4485 = vmatprep.subr.msk.bf16.mxu1 %vm1407_vm5, %v5025_v0 }
 0x78a   :  { %v969_v2 = vpop.f32.mrb[20].mxu1 }
 0x78b   :  { %v4328_v3 = vpop.f32.mrb[21].mxu1  ;;  %v1025_v5 = vsel %vm1024_vm6, %v969_v2, -inf }
 0x78c   :  { %1026 = vmax.xlane.f32.xlu0 %v1025_v5  ;;  %v972_v9 = vpop.f32.mrb[22].mxu1 }
 0x78d   :  { %v4329_v11 = vpop.f32.mrb[23].mxu1 }
 0x792   :  { %v1018_v13 = vpop.f32.mrb[24].mxu1 }
 0x793   :  { %v4334_v14 = vpop.f32.mrb[25].mxu1  ;;  %v1028_v15 = vsel %vm1024_vm6, %v1018_v13, -inf }
 0x794   :  { %1029 = vmax.xlane.f32.xlu1 %v1028_v15  ;;  %v1021_v17 = vpop.f32.mrb[26].mxu1 }
 0x795   :  { %v4335_v18 = vpop.f32.mrb[27].mxu1 }
 0x7a5   :  { %2062 = vrot.lane.b32.xlu1 %v4785_v27, %s4611_s10 }
 0x7a9   :  { %2066 = vrot.lane.b32.xlu1 %v4790_v28, %s4611_s10 }
 0x7ad   :  { %2068 = vrot.lane.b32.xlu1 %v4802_v30, %s4611_s10 }
 0x7b1   :  { %2072 = vrot.lane.b32.xlu1 %v4816_v32, %s4611_s10 }
 0x7b5   :  { %2076 = vrot.lane.b32.xlu1 %v4830_v34, %s4611_s10 }
 0x7b9   :  { %2238 = vrot.lane.b32.xlu1 %v4886_v12, %s4612_s11 }
 0x819   :  { %v1027_v19 = vpop.xlane.xlu0 %1026 }
 0x81a   :  { %v1031_v20 = vsub.f32 %v969_v2, %v1027_v19 }
 0x81c   :  { %v1033_v21 = vmul.f32 1.442695, %v1031_v20 }
 0x81e   :  { %4523 = vpow2.f32 %v1033_v21 }
 0x821   :  { %v1030_v22 = vpop.xlane.xlu1 %1029 }
 0x822   :  { %v1032_v23 = vsub.f32 %v1018_v13, %v1030_v22 }
 0x824   :  { %v1035_v26 = vmul.f32 1.442695, %v1032_v23 }
 0x825   :  { %v2063_v35 = vpop.permute.xlu1 %2062 }
 0x826   :  { %4525 = vpow2.f32 %v1035_v26  ;;  %4349 = vmatpush3.bf16.msra.mxu0 %v2063_v35  ;;  %v336_v35 = vld [vmem:[%s5874_s5 + $0x38] sm:$0xff] }
 0x827   :  { %4350 = vmatprep.subr.bf16.mxu0 %v4606_v6 }
 0x828   :  { %v4524_v27 = vpop.eup %4523 }
 0x829   :  { %v1037_v28 = vsel %vm1024_vm6, %v4524_v27, 0.0  ;;  %v2067_v43 = vpop.permute.xlu1 %2066 }
 0x82a   :  { %1038 = vadd.xlane.f32.xlu0 %v1037_v28 }
 0x82d   :  { %v2069_v47 = vpop.permute.xlu1 %2068 }
 0x830   :  { %v4526_v30 = vpop.eup %4525 }
 0x831   :  { %v1040_v32 = vsel %vm1024_vm6, %v4526_v30, 0.0  ;;  %v2073_v21 = vpop.permute.xlu1 %2072 }
 0x832   :  { %1041 = vadd.xlane.f32.xlu0 %v1040_v32 }
 0x848   :  { %2064 = vrot.lane.b32.xlu0 %v4796_v29, %s4611_s10 }
 0x84c   :  { %2070 = vrot.lane.b32.xlu0 %v4811_v31, %s4611_s10  ;;  %v4613_v31 = vmov 1983009808  }
 0x850   :  { %2074 = vrot.lane.b32.xlu0 %v4825_v33, %s4611_s10  ;;  %v1160_v33 = vunpack.c.l.s4 %v4613_v31 }
 0x852   :  { %v1161_v52 = vunpack.c.0.s8 %v1160_v33 }
 0x854   :  { %2190 = vrot.lane.b32.xlu0 %v4876_v8, %s4612_s11  ;;  %v5071_v11 = vsub.s32 %v1161_v52, %v4906_v51 }
 0x8b7   :  { %v1039_v34 = vpop.xlane.xlu0 %1038 }
 0x8b8   :  { %4527 = vrcp.f32 %v1039_v34 }
 0x8bf   :  { %v1042_v12 = vpop.xlane.xlu0 %1041 }
 0x8c0   :  { %4529 = vrcp.f32 %v1042_v12 }
 0x8c2   :  { %v4528_v37 = vpop.eup %4527 }
 0x8c3   :  { %v1044_v40 = vmul.f32 %v4528_v37, %v4524_v27  ;;  %v2065_v41 = vpop.permute.xlu0 %2064 }
 0x8c4   :  { %4351 = vmatpush3.bf16.msra.mxu0 %v2065_v41 }
 0x8c5   :  { %v1048_v44 = vmul.f32 %v1047_v39, %v1044_v40  ;;  %3935 = vst.msk [vmem:[%s5878_s9 + $0x4] sm:$0xf] %vm1024_vm6, %v1044_v40  ;;  %4352 = vmatprep.subr.bf16.mxu0 %v4606_v6 }
 0x8c7   :  { %v1050_v29 = vadd.f32 1.0, %v1048_v44  ;;  %v2071_v3 = vpop.permute.xlu0 %2070 }
 0x8c8   :  { %4353 = vmatpush3.bf16.msra.mxu0 %v2067_v43 }
 0x8c9   :  { %v1060_v8 = vrot.slane %v1050_v29, %v4913_v54  ;;  %4354 = vmatprep.subr.bf16.mxu0 %v4606_v6 }
 0x8ca   :  { %v4530_v45 = vpop.eup %4529 }
 0x8cb   :  { %v1061_v48 = vcombine.high %v1060_v8, %v1060_v8  ;;  %v1068_v49 = vrot.slane %v1060_v8, %v4913_v54  ;;  %v1046_v50 = vmul.f32 %v4530_v45, %v4526_v30  ;;  %v2075_v31 = vpop.permute.xlu0 %2074 }
 0x8cc   :  { %4355 = vmatpush3.bf16.msra.mxu0 %v2069_v47 }
 0x8cd   :  { %v1075_v53 = vrot.slane %v1061_v48, %v4913_v54  ;;  %v1076_v56 = vcombine.high %v1068_v49, %v1068_v49  ;;  %v1049_v57 = vmul.f32 %v1047_v39, %v1046_v50  ;;  %3936 = vst.msk [vmem:[%s5878_s9 + $0x2c] sm:$0xf] %vm1024_vm6, %v1046_v50  ;;  %v1105_v59 = vrot.slane %v1068_v49, %v4918_v61  ;;  %v5089_v39 = vld [vmem:[%s5878_s9 + $0x8] sm:$0xff] }
 0x8ce   :  { %4356 = vmatprep.subr.bf16.mxu0 %v4606_v6 }
 0x8cf   :  { %v1077_v63 = vcombine.high %v1075_v53, %v1075_v53  ;;  %v1051_v2 = vadd.f32 1.0, %v1049_v57  ;;  %v1109_v5 = vrot.slane %v1075_v53, %v4918_v61  ;;  %v1113_v9 = vrot.slane %v1076_v56, %v4918_v61 }
 0x8d0   :  { %v1142_v13 = vmul.f32 %v1105_v59, %v333_v58  ;;  %4357 = vmatpush3.bf16.msra.mxu0 %v2071_v3 }
 0x8d1   :  { %v1084_v14 = vrot.slane %v1051_v2, %v4913_v54  ;;  %v1143_v15 = vmul.f32 %v1109_v5, %v334_v60  ;;  %v1144_v17 = vmul.f32 %v1113_v9, %v335_v62  ;;  %4358 = vmatprep.subr.bf16.mxu0 %v4606_v6  ;;  %v1117_v20 = vrot.slane %v1077_v63, %v4918_v61  ;;  %v2077_v5 = vpop.permute.xlu1 %2076 }
 0x8d2   :  { %v1158_v18 = vcombine.high %v1142_v13, %v1142_v13  ;;  %v1165_v19 = vrot.slane %v1142_v13, %v5071_v11 }
 0x8d3   :  { %v1085_v22 = vcombine.high %v1084_v14, %v1084_v14  ;;  %v1092_v23 = vrot.slane %v1084_v14, %v4913_v54  ;;  %v1174_v26 = vcombine.high %v1143_v15, %v1143_v15  ;;  %v1181_v51 = vrot.slane %v1143_v15, %v5071_v11 }
 0x8d4   :  { %v1172_v27 = vrot.slane %v1158_v18, %v5071_v11  ;;  %v1173_v28 = vcombine.high %v1165_v19, %v1165_v19  ;;  %v1190_v6 = vcombine.high %v1144_v17, %v1144_v17  ;;  %v1197_v30 = vrot.slane %v1144_v17, %v5071_v11  ;;  %4359 = vmatpush3.bf16.msra.mxu0 %v2073_v21 }
 0x8d5   :  { %v1099_v32 = vrot.slane %v1085_v22, %v4913_v54  ;;  %v1100_v34 = vcombine.high %v1092_v23, %v1092_v23  ;;  %v1188_v12 = vrot.slane %v1174_v26, %v5071_v11  ;;  %v1189_v37 = vcombine.high %v1181_v51, %v1181_v51  ;;  %4360 = vmatprep.subr.bf16.mxu0 %v5089_v39 }
 0x8d6   :  { %v1205_v40 = vcombine.high %v1197_v30, %v1197_v30  ;;  %v1286_v41 = vcombine.low %v1165_v19, %v1173_v28  ;;  %v1287_v43 = vcombine.low %v1172_v27, %v1181_v51  ;;  %v1145_v44 = vmul.f32 %v1117_v20, %v336_v35 }
 0x8d7   :  { %v1101_v29 = vcombine.high %v1099_v32, %v1099_v32  ;;  %v1303_v33 = vcombine.low %v1189_v37, %v1188_v12  ;;  %v1204_v8 = vrot.slane %v1190_v6, %v5071_v11  ;;  %v1121_v45 = vrot.slane %v1092_v23, %v4918_v61 }
 0x8d8   :  { %v1294_v47 = vrot.slane %v1286_v41, %v5071_v11  ;;  %v1301_v48 = vrot.slane %v1287_v43, %v5071_v11  ;;  %v1304_v49 = vcombine.low %v1197_v30, %v1205_v40  ;;  %v1206_v50 = vcombine.high %v1145_v44, %v1145_v44  ;;  %4361 = vmatpush3.bf16.msra.mxu0 %v2075_v31 }
 0x8d9   :  { %v1311_v52 = vrot.slane %v1303_v33, %v5071_v11  ;;  %v1213_v53 = vrot.slane %v1145_v44, %v5071_v11  ;;  %v1125_v56 = vrot.slane %v1099_v32, %v4918_v61  ;;  %v1129_v57 = vrot.slane %v1100_v34, %v4918_v61  ;;  %4362 = vmatprep.subr.bf16.mxu0 %v5089_v39 }
 0x8da   :  { %v1302_v59 = vcombine.low %v1294_v47, %v1301_v48  ;;  %v1318_v63 = vrot.slane %v1304_v49, %v5071_v11  ;;  %v1220_v2 = vrot.slane %v1206_v50, %v5071_v11  ;;  %v1146_v3 = vmul.f32 %v1121_v45, %v333_v58 }
 0x8db   :  { %v1221_v9 = vcombine.high %v1213_v53, %v1213_v53  ;;  %v1320_v13 = vcombine.low %v1204_v8, %v1213_v53  ;;  %v1147_v14 = vmul.f32 %v1125_v56, %v334_v60  ;;  %v1148_v15 = vmul.f32 %v1129_v57, %v335_v62 }
 0x8dc   :  { %v1319_v17 = vcombine.low %v1311_v52, %v1318_v63  ;;  %v1222_v18 = vcombine.high %v1146_v3, %v1146_v3  ;;  %v1229_v19 = vrot.slane %v1146_v3, %v5071_v11  ;;  %v1133_v20 = vrot.slane %v1101_v29, %v4918_v61  ;;  %4363 = vmatpush3.bf16.msra.mxu0 %v2077_v5 }
 0x8dd   :  { %v1321_v21 = vcombine.low %v1221_v9, %v1220_v2  ;;  %v1328_v22 = vrot.slane %v1320_v13, %v5071_v11  ;;  %v1238_v23 = vcombine.high %v1147_v14, %v1147_v14  ;;  %v1245_v26 = vrot.slane %v1147_v14, %v5071_v11  ;;  %4392 = vmatprep.subr.bf16.mxu0 %v5089_v39 }
 0x8de   :  { %v1394_v58 = vpack.c.bf16 %v1319_v17, %v1302_v59  ;;  %v1236_v51 = vrot.slane %v1222_v18, %v5071_v11  ;;  %v1237_v60 = vcombine.high %v1229_v19, %v1229_v19  ;;  %v1254_v62 = vcombine.high %v1148_v15, %v1148_v15 }
 0x8df   :  { %v1335_v27 = vrot.slane %v1321_v21, %v5071_v11  ;;  %v1252_v28 = vrot.slane %v1238_v23, %v5071_v11  ;;  %v1253_v6 = vcombine.high %v1245_v26, %v1245_v26  ;;  %v1261_v30 = vrot.slane %v1148_v15, %v5071_v11 }
 0x8e0   :  { %4338 = vmatprep.mubr.msk.bf16.mxu1 %vm1400_vm7, %v1394_v58  ;;  %v1337_v32 = vcombine.low %v1229_v19, %v1237_v60  ;;  %v1338_v34 = vcombine.low %v1236_v51, %v1245_v26  ;;  %v1149_v12 = vmul.f32 %v1133_v20, %v336_v35  ;;  %v1268_v37 = vrot.slane %v1254_v62, %v5071_v11 }
 0x8e1   :  { %v1336_v40 = vcombine.low %v1328_v22, %v1335_v27  ;;  %v1269_v41 = vcombine.high %v1261_v30, %v1261_v30  ;;  %v1354_v43 = vcombine.low %v1253_v6, %v1252_v28  ;;  %v1466_v50 = vsel %vm1407_vm5, %v5025_v0, 0 }
 0x8e2   :  { %v1345_v44 = vrot.slane %v1337_v32, %v5071_v11  ;;  %v1270_v29 = vcombine.high %v1149_v12, %v1149_v12  ;;  %v1277_v31 = vrot.slane %v1149_v12, %v5071_v11  ;;  %v1352_v8 = vrot.slane %v1338_v34, %v5071_v11 }
 0x8e3   :  { %v1395_v33 = vpack.c.bf16 %v1336_v40, %v1336_v40  ;;  %v1355_v45 = vcombine.low %v1261_v30, %v1269_v41  ;;  %v1362_v47 = vrot.slane %v1354_v43, %v5071_v11  ;;  %v1648_v0 = vcombine.high %v4971_v1, %v4971_v1 }
 0x8e4   :  { %v1284_v48 = vrot.slane %v1270_v29, %v5071_v11  ;;  %v1285_v49 = vcombine.high %v1277_v31, %v1277_v31  ;;  %v1371_v35 = vcombine.low %v1268_v37, %v1277_v31  ;;  %v1353_v56 = vcombine.low %v1345_v44, %v1352_v8 }
 0x8e5   :  { %4339 = vmatmul.mubr.msk.bf16.vlgmr.msra.gmra.mrb[28].mxu1 %vm1400_vm7, %v1395_v33  ;;  %v1369_v52 = vrot.slane %v1355_v45, %v5071_v11  ;;  %v1655_v9 = vrot.slane %v4971_v1, %v5071_v11  ;;  %v1680_v13 = vcombine.high %v4977_v10, %v4977_v10  ;;  %v1696_v14 = vcombine.high %v4984_v16, %v4984_v16 }
 0x8e6   :  { %4343 = vmatpush3.bf16.msra.mxu1 %v1466_v50  ;;  %v1372_v53 = vcombine.low %v1285_v49, %v1284_v48  ;;  %v1379_v59 = vrot.slane %v1371_v35, %v5071_v11  ;;  %v1664_v15 = vcombine.high %v4974_v4, %v4974_v4  ;;  %v1703_v17 = vrot.slane %v4984_v16, %v5071_v11 }
 0x8e7   :  { %v1370_v57 = vcombine.low %v1362_v47, %v1369_v52  ;;  %4368 = vmatprep.subr.bf16.mxu1 %v5089_v39  ;;  %v1671_v18 = vrot.slane %v4974_v4, %v5071_v11  ;;  %v1687_v19 = vrot.slane %v4977_v10, %v5071_v11  ;;  %v1744_v20 = vcombine.high %v4997_v38, %v4997_v38 }
 0x8e8   :  { %v1386_v63 = vrot.slane %v1372_v53, %v5071_v11  ;;  %v1662_v21 = vrot.slane %v1648_v0, %v5071_v11  ;;  %v1663_v22 = vcombine.high %v1655_v9, %v1655_v9  ;;  %v1712_v23 = vcombine.high %v4991_v25, %v4991_v25 }
 0x8e9   :  { %v1396_v2 = vpack.c.bf16 %v1370_v57, %v1353_v56  ;;  %v1694_v26 = vrot.slane %v1680_v13, %v5071_v11  ;;  %v1710_v58 = vrot.slane %v1696_v14, %v5071_v11  ;;  %v1678_v51 = vrot.slane %v1664_v15, %v5071_v11 }
 0x8ea   :  { %v1387_v3 = vcombine.low %v1379_v59, %v1386_v63  ;;  %v1760_v60 = vcombine.high %v5003_v42, %v5003_v42  ;;  %v1711_v27 = vcombine.high %v1703_v17, %v1703_v17  ;;  %v1679_v28 = vcombine.high %v1671_v18, %v1671_v18 }
 0x8eb   :  { %4344 = vmatprep.mubr.msk.bf16.mxu1 %vm1400_vm7, %v1396_v2  ;;  %v1695_v6 = vcombine.high %v1687_v19, %v1687_v19  ;;  %v5158_v30 = vrot.slane %v5003_v42, %v5071_v11  ;;  %v5162_v37 = vrot.slane %v1744_v20, %v5071_v11  ;;  %v5166_v40 = vrot.slane %v4991_v25, %v5071_v11 }
 0x8ec   :  { %v1397_v5 = vpack.c.bf16 %v1387_v3, %v1387_v3  ;;  %v5170_v29 = vrot.slane %v1712_v23, %v5071_v11  ;;  %v1728_v31 = vcombine.high %v4994_v36, %v4994_v36  ;;  %v5176_v47 = vrot.slane %v1760_v60, %v5071_v11 }
 0x8ed   :  { %v5180_v48 = vrot.slane %v4994_v36, %v5071_v11  ;;  %v1775_v52 = vcombine.high %v5158_v30, %v5158_v30  ;;  %v5189_v15 = vrot.slane %v4997_v38, %v5071_v11 }
 0x8ee   :  { %4345 = vmatmul.mubr.msk.bf16.vlgmr.msra.gmra.mrb[32].mxu1 %vm1400_vm7, %v1397_v5 }
 0x8ef   :  { %4370 = vmatprep.mubr.msk.bf16.mxu1 %vm4605_vm0, %v5089_v39 }
 0x9b8   :  { %v4340_v62 = vpop.f32.mrb[28].mxu1 }
 0x9b9   :  { %v1556_v32 = vcombine.high %v4340_v62, %v4340_v62  ;;  %v1563_v34 = vrot.slane %v4340_v62, %v5071_v11  ;;  %v1445_v12 = vpop.f32.mrb[29].mxu1 }
 0x9ba   :  { %v1522_v41 = vcombine.high %v1445_v12, %v1445_v12  ;;  %v1529_v43 = vrot.slane %v1445_v12, %v5071_v11  ;;  %v4341_v44 = vpop.f32.mrb[30].mxu1 }
 0x9bb   :  { %v1570_v33 = vrot.slane %v1556_v32, %v5071_v11  ;;  %v1571_v8 = vcombine.high %v1563_v34, %v1563_v34  ;;  %v1448_v45 = vpop.f32.mrb[31].mxu1  ;;  %v1808_v20 = vmul.f32 %v1694_v26, %v1563_v34 }
 0x9bc   :  { %v1536_v49 = vrot.slane %v1522_v41, %v5071_v11  ;;  %v1537_v35 = vcombine.high %v1529_v43, %v1529_v43  ;;  %v1539_v50 = vcombine.high %v1448_v45, %v1448_v45  ;;  %v1800_v59 = vmul.f32 %v1655_v9, %v1529_v43 }
 0x9bd   :  { %v1572_v53 = vcombine.high %v1570_v33, %v1570_v33  ;;  %v1809_v56 = vmul.f32 %v1703_v17, %v1571_v8  ;;  %v1810_v57 = vmul.f32 %v1711_v27, %v1570_v33  ;;  %v1546_v5 = vrot.slane %v1448_v45, %v5071_v11 }
 0x9be   :  { %v1538_v63 = vcombine.high %v1536_v49, %v1536_v49  ;;  %v1801_v2 = vmul.f32 %v1663_v22, %v1537_v35  ;;  %v1802_v3 = vmul.f32 %v1662_v21, %v1536_v49  ;;  %v1553_v14 = vrot.slane %v1539_v50, %v5071_v11 }
 0x9bf   :  { %v1811_v0 = vmul.f32 %v1710_v58, %v1572_v53  ;;  %v1896_v13 = vcombine.low %v1809_v56, %v1810_v57  ;;  %v1554_v60 = vcombine.high %v1546_v5, %v1546_v5  ;;  %v1804_v21 = vmul.f32 %v1679_v28, %v1546_v5 }
 0x9c0   :  { %v1848_v23 = vcombine.low %v1800_v59, %v1801_v2  ;;  %v1803_v62 = vmul.f32 %v1671_v18, %v1538_v63  ;;  %v1862_v9 = vrot.slane %v1802_v3, %v5071_v11  ;;  %v1555_v22 = vcombine.high %v1553_v14, %v1553_v14 }
 0x9c1   :  { %v1903_v17 = vrot.slane %v1896_v13, %v5071_v11  ;;  %v4346_v27 = vpop.f32.mrb[32].mxu1  ;;  %v1910_v58 = vrot.slane %v1811_v0, %v5071_v11  ;;  %v1805_v12 = vmul.f32 %v1678_v51, %v1554_v60  ;;  %v1806_v44 = vmul.f32 %v1687_v19, %v1553_v14 }
 0x9c2   :  { %v1855_v32 = vrot.slane %v1848_v23, %v5071_v11  ;;  %v1607_v41 = vcombine.high %v4346_v27, %v4346_v27  ;;  %v1502_v43 = vpop.f32.mrb[33].mxu1  ;;  %v1807_v33 = vmul.f32 %v1695_v6, %v1555_v22  ;;  %v1864_v26 = vcombine.low %v1803_v62, %v1804_v21 }
 0x9c3   :  { %v1614_v34 = vrot.slane %v4346_v27, %v5071_v11  ;;  %v4347_v18 = vpop.f32.mrb[34].mxu1  ;;  %v1573_v49 = vcombine.high %v1502_v43, %v1502_v43  ;;  %v1878_v50 = vrot.slane %v1805_v12, %v5071_v11  ;;  %v1894_v56 = vrot.slane %v1808_v20, %v5071_v11 }
 0x9c4   :  { %v1863_v8 = vcombine.low %v1855_v32, %v1862_v9  ;;  %v1621_v45 = vrot.slane %v1607_v41, %v5071_v11  ;;  %v1505_v28 = vpop.f32.mrb[35].mxu1  ;;  %v1871_v35 = vrot.slane %v1864_v26, %v5071_v11  ;;  %v1880_v53 = vcombine.low %v1806_v44, %v1807_v33 }
 0x9c5   :  { %v1622_v51 = vcombine.high %v1614_v34, %v1614_v34  ;;  %v1911_v19 = vcombine.low %v1903_v17, %v1910_v58  ;;  %v1727_v6 = vcombine.high %v5166_v40, %v5166_v40  ;;  %v1742_v57 = vrot.slane %v1728_v31, %v5071_v11 }
 0x9c6   :  { %v1985_v59 = vsel %vm1984_vm8, %v1863_v8, 0.0  ;;  %v1879_v63 = vcombine.low %v1871_v35, %v1878_v50  ;;  %v1887_v2 = vrot.slane %v1880_v53, %v5071_v11  ;;  %v1580_v3 = vrot.slane %v1502_v43, %v5071_v11 }
 0x9c7   :  { %v1623_v5 = vcombine.high %v1621_v45, %v1621_v45  ;;  %v1822_v0 = vmul.f32 %v1775_v52, %v1621_v45  ;;  %v1587_v13 = vrot.slane %v1573_v49, %v5071_v11  ;;  %v1590_v14 = vcombine.high %v1505_v28, %v1505_v28 }
 0x9c8   :  { %v1895_v23 = vcombine.low %v1887_v2, %v1894_v56  ;;  %v1986_v20 = vsel %vm1984_vm8, %v1879_v63, 0.0  ;;  %v1821_v60 = vmul.f32 %v5158_v30, %v1622_v51  ;;  %v1588_v62 = vcombine.high %v1580_v3, %v1580_v3 }
 0x9c9   :  { %v1987_v17 = vadd.f32 %v1986_v20, %v1985_v59  ;;  %v1589_v31 = vcombine.high %v1587_v13, %v1587_v13  ;;  %v1743_v9 = vcombine.high %v5180_v48, %v5180_v48  ;;  %v1759_v22 = vcombine.high %v5189_v15, %v5189_v15 }
 0x9ca   :  { %v1988_v21 = vsel %vm1984_vm8, %v1895_v23, 0.0  ;;  %v1812_v52 = vmul.f32 %v5166_v40, %v1580_v3  ;;  %v1813_v27 = vmul.f32 %v1727_v6, %v1588_v62  ;;  %v1814_v58 = vmul.f32 %v5170_v29, %v1587_v13 }
 0x9cb   :  { %v1989_v32 = vadd.f32 %v1988_v21, %v1987_v17  ;;  %v1597_v12 = vrot.slane %v1505_v28, %v5071_v11  ;;  %v1604_v30 = vrot.slane %v1590_v14, %v5071_v11  ;;  %v1815_v41 = vmul.f32 %v5180_v48, %v1589_v31 }
 0x9cc   :  { %v1990_v43 = vsel %vm1984_vm8, %v1911_v19, 0.0  ;;  %v1823_v44 = vmul.f32 %v5176_v47, %v1623_v5  ;;  %v1960_v33 = vcombine.low %v1821_v60, %v1822_v0  ;;  %v1912_v26 = vcombine.low %v1812_v52, %v1813_v27 }
 0x9cd   :  { %v5221_v18 = vadd.f32 %v1990_v43, %v1989_v32  ;;  %v1605_v8 = vcombine.high %v1597_v12, %v1597_v12  ;;  %v1606_v40 = vcombine.high %v1604_v30, %v1604_v30  ;;  %v1816_v45 = vmul.f32 %v1743_v9, %v1597_v12 }
 0x9ce   :  { %v1820_v29 = vmul.f32 %v5162_v37, %v1614_v34  ;;  %v1919_v49 = vrot.slane %v1912_v26, %v5071_v11  ;;  %v1926_v28 = vrot.slane %v1814_v58, %v5071_v11  ;;  %v1818_v48 = vmul.f32 %v5189_v15, %v1604_v30 }
 0x9cf   :  { %v1817_v35 = vmul.f32 %v1742_v57, %v1605_v8  ;;  %v1819_v50 = vmul.f32 %v1759_v22, %v1606_v40  ;;  %v1928_v53 = vcombine.low %v1815_v41, %v1816_v45  ;;  %v1967_v47 = vrot.slane %v1960_v33, %v5071_v11 }
 0x9d0   :  { %v1974_v51 = vrot.slane %v1823_v44, %v5071_v11  ;;  %v1927_v56 = vcombine.low %v1919_v49, %v1926_v28  ;;  %v1958_v37 = vrot.slane %v1820_v29, %v5071_v11  ;;  %v2008_v15 = vrot.slane %v5221_v18, %v5071_v11 }
 0x9d1   :  { %v1935_v19 = vrot.slane %v1928_v53, %v5071_v11  ;;  %v1942_v6 = vrot.slane %v1817_v35, %v5071_v11  ;;  %v1944_v59 = vcombine.low %v1818_v48, %v1819_v50  ;;  %v2001_v23 = vcombine.high %v5221_v18, %v5221_v18 }
 0x9d2   :  { %v1975_v57 = vcombine.low %v1967_v47, %v1974_v51  ;;  %v1992_v2 = vsel %vm1984_vm8, %v1927_v56, 0.0  ;;  %v2016_v20 = vcombine.high %v2008_v15, %v2008_v15 }
 0x9d3   :  { %v1943_v34 = vcombine.low %v1935_v19, %v1942_v6  ;;  %v1951_v63 = vrot.slane %v1944_v59, %v5071_v11  ;;  %v2015_v17 = vrot.slane %v2001_v23, %v5071_v11 }
 0x9d4   :  { %v1997_v60 = vsel %vm1984_vm8, %v1975_v57, 0.0  ;;  %v2034_v22 = vcombine.low %v2008_v15, %v2016_v20  ;;  %v2191_v15 = vpop.permute.xlu0 %2190 }
 0x9d5   :  { %v1959_v3 = vcombine.low %v1951_v63, %v1958_v37  ;;  %v1993_v5 = vsel %vm1984_vm8, %v1943_v34, 0.0 }
 0x9d6   :  { %v1994_v0 = vadd.f32 %v1993_v5, %v1992_v2  ;;  %v2042_v58 = vrot.slane %v2034_v22, %v5071_v11  ;;  %v2430_v2 = vpack.c.bf16 %v5221_v18, %v5221_v18 }
 0x9d7   :  { %v1995_v13 = vsel %vm1984_vm8, %v1959_v3, 0.0  ;;  %v2239_v3 = vpop.permute.xlu1 %2238 }
 0x9d8   :  { %v1996_v14 = vadd.f32 %v1995_v13, %v1994_v0  ;;  %v2438_v5 = vsel %vm2436_vm9, %v2430_v2, 0  ;;  %v339_v2 = vld [vmem:[%s5874_s5 + $0x50] sm:$0xff] }
 0x9da   :  { %v5241_v62 = vadd.f32 %v1997_v60, %v1996_v14 }
 0x9dc   :  { %v2017_v31 = vcombine.high %v5241_v62, %v5241_v62  ;;  %v2024_v9 = vrot.slane %v5241_v62, %v5071_v11 }
 0x9de   :  { %v2031_v21 = vrot.slane %v2017_v31, %v5071_v11  ;;  %v2032_v52 = vcombine.high %v2024_v9, %v2024_v9  ;;  %v2035_v27 = vcombine.low %v2015_v17, %v2024_v9 }
 0x9e0   :  { %v2049_v32 = vrot.slane %v2035_v27, %v5071_v11  ;;  %v2051_v12 = vcombine.low %v2032_v52, %v2031_v21 }
 0x9e2   :  { %v2050_v30 = vcombine.low %v2042_v58, %v2049_v32  ;;  %v2058_v41 = vrot.slane %v2051_v12, %v5071_v11 }
 0x9e4   :  { %v2061_v43 = vpack.c.bf16 %v2058_v41, %v2050_v30 }
 0x9e6   :  { %4365 = vmatmul.mubr.bf16.vlgmr.msra.gmra.mrb[16].mxu0 %v2061_v43 }
 0x9e7   :  { %4408 = vmatprep.mubr.msk.bf16.mxu0 %vm4605_vm0, %v5089_v39 }
 0xab9   :  { %v2120_v44 = vpop.f32.mrb[16].mxu0 }
 0xaba   :  { %v2129_v33 = vcombine.high %v2120_v44, %v2120_v44  ;;  %v2136_v26 = vrot.slane %v2120_v44, %v5071_v11  ;;  %v4366_v8 = vpop.f32.mrb[17].mxu0 }
 0xabb   :  { %v2123_v40 = vpop.f32.mrb[18].mxu0 }
 0xabc   :  { %v2143_v45 = vrot.slane %v2129_v33, %v5071_v11  ;;  %v2144_v29 = vcombine.high %v2136_v26, %v2136_v26  ;;  %v2152_v49 = vrot.slane %v2123_v40, %v5071_v11  ;;  %v4367_v28 = vpop.f32.mrb[19].mxu0  ;;  %v4505_v33 = vld [vmem:[%s5875_s6] sm:$0xff]  }
 0xabd   :  { %4393 = vmatpush3.bf16.msra.mxu0 %v4505_v33 }
 0xabe   :  { %v2154_v35 = vcombine.low %v2136_v26, %v2144_v29  ;;  %v2145_v48 = vcombine.high %v2143_v45, %v2143_v45  ;;  %v2153_v50 = vcombine.high %v2152_v49, %v2152_v49  ;;  %v2168_v47 = vrot.slane %v2143_v45, %v5071_v11  ;;  %4394 = vmatprep.subr.bf16.mxu0 %v5089_v39 }
 0xabf   :  { %v2309_v45 = vstv %s4039_s25 }
 0xac0   :  { %v2161_v53 = vrot.slane %v2154_v35, %v5071_v11  ;;  %v2170_v51 = vcombine.low %v2145_v48, %v2152_v49  ;;  %v2184_v19 = vrot.slane %v2153_v50, %v5071_v11 }
 0xac2   :  { %v2177_v56 = vrot.slane %v2170_v51, %v5071_v11  ;;  %v2169_v6 = vcombine.low %v2161_v53, %v2168_v47 }
 0xac4   :  { %v2188_v59 = vpack.c.bf16 %v2169_v6, %v2169_v6  ;;  %v2185_v37 = vcombine.low %v2177_v56, %v2184_v19  ;;  %v338_v6 = vld [vmem:[%s5874_s5 + $0x48] sm:$0xff] }
 0xac6   :  { %v2196_v34 = vsel %vm413_vm2, %v2188_v59, 0  ;;  %v2189_v63 = vpack.c.bf16 %v2185_v37, %v2185_v37 }
 0xac7   :  { %4369 = vmatpush3.bf16.xpose.msra.mxu1 %v2196_v34  ;;  %v337_v34 = vld [vmem:[%s5874_s5 + $0x40] sm:$0xff] }
 0xac8   :  { %4374 = vmatprep.subr.bf16.mxu1 %v5089_v39  ;;  %v2244_v57 = vsel %vm413_vm2, %v2189_v63, 0 }
 0xace   :  { %4371 = vmatmul.mubr.msk.bf16.vlgmr.msra.gmra.mrb[36].mxu1 %vm413_vm2, %v2191_v15 }
 0xacf   :  { %4375 = vmatpush3.bf16.xpose.msra.mxu1 %v2244_v57  ;;  %4376 = vmatprep.mubr.msk.bf16.mxu1 %vm4605_vm0, %v5089_v39 }
 0xad0   :  { %4380 = vmatprep.subr.bf16.mxu1 %v5089_v39 }
 0xad6   :  { %4377 = vmatmul.mubr.msk.bf16.vlgmr.msra.gmra.mrb[40].mxu1 %vm413_vm2, %v2239_v3  ;;  %v340_v3 = vld [vmem:[%s5874_s5 + $0x58] sm:$0xff] }
 0xad7   :  { %4381 = vmatpush3.bf16.msra.mxu1 %v2438_v5  ;;  %4382 = vmatprep.mubr.msk.bf16.mxu1 %vm4605_vm0, %v5089_v39 }
 0xad8   :  { %4386 = vmatprep.subr.bf16.mxu1 %v5089_v39 }
 0xba1   :  { %v2232_v0 = vpop.f32.mrb[36].mxu1 }
 0xba2   :  { %v4372_v13 = vpop.f32.mrb[37].mxu1  ;;  %v2287_v14 = vsel %vm2286_vm10, %v2232_v0, -inf }
 0xba3   :  { %2288 = vmax.xlane.f32.xlu0 %v2287_v14  ;;  %v2235_v23 = vpop.f32.mrb[38].mxu1 }
 0xba4   :  { %v4373_v20 = vpop.f32.mrb[39].mxu1 }
 0xba9   :  { %v2280_v60 = vpop.f32.mrb[40].mxu1 }
 0xbaa   :  { %v4378_v17 = vpop.f32.mrb[41].mxu1  ;;  %v2290_v31 = vsel %vm2286_vm10, %v2280_v60, -inf }
 0xbab   :  { %2291 = vmax.xlane.f32.xlu1 %v2290_v31  ;;  %v2283_v9 = vpop.f32.mrb[42].mxu1  ;;  %v2431_v31 = vpack.c.bf16 %v5241_v62, %v5241_v62 }
 0xbac   :  { %v4379_v22 = vpop.f32.mrb[43].mxu1 }
 0xc30   :  { %v2289_v21 = vpop.xlane.xlu0 %2288 }
 0xc31   :  { %v2293_v52 = vsub.f32 %v2232_v0, %v2289_v21 }
 0xc33   :  { %v2295_v27 = vmul.f32 1.442695, %v2293_v52 }
 0xc35   :  { %4531 = vpow2.f32 %v2295_v27 }
 0xc38   :  { %v2292_v58 = vpop.xlane.xlu1 %2291 }
 0xc39   :  { %v2294_v32 = vsub.f32 %v2280_v60, %v2292_v58 }
 0xc3b   :  { %v2297_v12 = vmul.f32 1.442695, %v2294_v32 }
 0xc3d   :  { %4533 = vpow2.f32 %v2297_v12 }
 0xc3f   :  { %v4532_v30 = vpop.eup %4531 }
 0xc40   :  { %v2299_v41 = vsel %vm2286_vm10, %v4532_v30, 0.0 }
 0xc41   :  { %2300 = vadd.xlane.f32.xlu0 %v2299_v41  ;;  %v2485_v41 = vsel %vm2436_vm9, %v2431_v31, 0 }
 0xc47   :  { %v4534_v43 = vpop.eup %4533 }
 0xc48   :  { %v2302_v44 = vsel %vm2286_vm10, %v4534_v43, 0.0 }
 0xc49   :  { %2303 = vadd.xlane.f32.xlu0 %v2302_v44 }
 0xcce   :  { %v2301_v26 = vpop.xlane.xlu0 %2300 }
 0xccf   :  { %4535 = vrcp.f32 %v2301_v26 }
 0xcd6   :  { %v2304_v8 = vpop.xlane.xlu0 %2303 }
 0xcd7   :  { %4537 = vrcp.f32 %v2304_v8 }
 0xcd9   :  { %v4536_v40 = vpop.eup %4535 }
 0xcda   :  { %v2306_v29 = vmul.f32 %v4536_v40, %v4532_v30 }
 0xcdc   :  { %v2310_v49 = vmul.f32 %v2309_v45, %v2306_v29  ;;  %3937 = vst.msk [vmem:[%s5878_s9 + $0x8] sm:$0xf] %vm2286_vm10, %v2306_v29  ;;  %v4507_v29 = vld [vmem:[%s5875_s6 + $0x10] sm:$0xff]  }
 0xcde   :  { %v2312_v28 = vadd.f32 1.0, %v2310_v49  ;;  %v4508_v49 = vld [vmem:[%s5875_s6 + $0x18] sm:$0xff]  }
 0xce0   :  { %v2322_v35 = vrot.slane %v2312_v28, %v4913_v54  ;;  %v4509_v28 = vld [vmem:[%s5875_s6 + $0x20] sm:$0xff]  }
 0xce1   :  { %v4538_v48 = vpop.eup %4537 }
 0xce2   :  { %v2323_v50 = vcombine.high %v2322_v35, %v2322_v35  ;;  %v2330_v53 = vrot.slane %v2322_v35, %v4913_v54  ;;  %v2308_v47 = vmul.f32 %v4538_v48, %v4534_v43  ;;  %v4510_v35 = vld [vmem:[%s5875_s6 + $0x28] sm:$0xff]   ;;  %v4511_v48 = vld [vmem:[%s5875_s6 + $0x30] sm:$0xff]  }
 0xce4   :  { %v2311_v51 = vmul.f32 %v2309_v45, %v2308_v47  ;;  %3938 = vst.msk [vmem:[%s5878_s9 + $0x30] sm:$0xf] %vm2286_vm10, %v2308_v47  ;;  %v2337_v56 = vrot.slane %v2323_v50, %v4913_v54  ;;  %v2338_v19 = vcombine.high %v2330_v53, %v2330_v53  ;;  %v2367_v59 = vrot.slane %v2330_v53, %v4918_v61  ;;  %v4512_v50 = vld [vmem:[%s5875_s6 + $0x38] sm:$0xff]  }
 0xce6   :  { %v2313_v37 = vadd.f32 1.0, %v2311_v51  ;;  %v2339_v63 = vcombine.high %v2337_v56, %v2337_v56  ;;  %v2371_v15 = vrot.slane %v2337_v56, %v4918_v61  ;;  %v2375_v57 = vrot.slane %v2338_v19, %v4918_v61 }
 0xce7   :  { %v2404_v14 = vmul.f32 %v2367_v59, %v337_v34 }
 0xce8   :  { %v2346_v5 = vrot.slane %v2313_v37, %v4913_v54  ;;  %v2379_v0 = vrot.slane %v2339_v63, %v4918_v61  ;;  %v2405_v13 = vmul.f32 %v2371_v15, %v338_v6  ;;  %v2406_v60 = vmul.f32 %v2375_v57, %v339_v2 }
 0xce9   :  { %v2582_v63 = vcombine.high %v4988_v24, %v4988_v24 }
 0xcea   :  { %v2347_v23 = vcombine.high %v2346_v5, %v2346_v5  ;;  %v2354_v20 = vrot.slane %v2346_v5, %v4913_v54  ;;  %v2407_v17 = vmul.f32 %v2379_v0, %v340_v3  ;;  %v2420_v9 = vcombine.low %v2404_v14, %v2405_v13 }
 0xceb   :  { %v5364_v5 = vrot.slane %v2582_v63, %v5071_v11 }
 0xcec   :  { %v2421_v22 = vcombine.low %v2406_v60, %v2407_v17  ;;  %v2361_v21 = vrot.slane %v2347_v23, %v4913_v54  ;;  %v2362_v52 = vcombine.high %v2354_v20, %v2354_v20  ;;  %v2383_v27 = vrot.slane %v2354_v20, %v4918_v61 }
 0xcee   :  { %v2428_v58 = vpack.c.bf16 %v2421_v22, %v2420_v9  ;;  %v2363_v32 = vcombine.high %v2361_v21, %v2361_v21  ;;  %v2387_v12 = vrot.slane %v2361_v21, %v4918_v61  ;;  %v2391_v30 = vrot.slane %v2362_v52, %v4918_v61 }
 0xcef   :  { %v2408_v54 = vmul.f32 %v2383_v27, %v337_v34  ;;  %v2568_v52 = vrot.slane %v4861_v55, 6 }
 0xcf0   :  { %4383 = vmatmul.mubr.msk.bf16.vlgmr.msra.gmra.mrb[44].mxu1 %vm2432_vm11, %v2428_v58  ;;  %v2395_v43 = vrot.slane %v2363_v32, %v4918_v61  ;;  %v2409_v44 = vmul.f32 %v2387_v12, %v338_v6  ;;  %v2410_v33 = vmul.f32 %v2391_v30, %v339_v2  ;;  %v4506_v61 = vld [vmem:[%s5875_s6 + $0x8] sm:$0xff]  }
 0xcf1   :  { %4387 = vmatpush3.bf16.msra.mxu1 %v2485_v41  ;;  %4388 = vmatprep.mubr.msk.bf16.mxu1 %vm4605_vm0, %v5089_v39 }
 0xcf2   :  { %v2411_v26 = vmul.f32 %v2395_v43, %v340_v3  ;;  %4420 = vmatprep.subr.bf16.mxu1 %v5089_v39  ;;  %v2422_v8 = vcombine.low %v2408_v54, %v2409_v44  ;;  %4395 = vmatpush3.bf16.msra.mxu0 %v4506_v61 }
 0xcf3   :  { %4396 = vmatprep.subr.bf16.mxu0 %v5089_v39 }
 0xcf4   :  { %v2423_v40 = vcombine.low %v2410_v33, %v2411_v26  ;;  %v5402_v33 = vrot.slane %v5006_v46, %v5071_v11 }
 0xcf6   :  { %v2429_v45 = vpack.c.bf16 %v2423_v40, %v2422_v8  ;;  %4397 = vmatpush3.bf16.msra.mxu0 %v4507_v29 }
 0xcf7   :  { %4398 = vmatprep.subr.bf16.mxu0 %v5089_v39 }
 0xcf8   :  { %4389 = vmatmul.mubr.msk.bf16.vlgmr.msra.gmra.mrb[48].mxu1 %vm2432_vm11, %v2429_v45 }
 0xcf9   :  { %4422 = vmatprep.mubr.msk.bf16.mxu1 %vm4605_vm0, %v5089_v39 }
 0xcfa   :  { %4399 = vmatpush3.bf16.msra.mxu0 %v4508_v49 }
 0xcfb   :  { %4400 = vmatprep.subr.bf16.mxu0 %v5089_v39 }
 0xcfe   :  { %4401 = vmatpush3.bf16.msra.mxu0 %v4509_v28 }
 0xcff   :  { %4402 = vmatprep.subr.bf16.mxu0 %v5089_v39 }
 0xd02   :  { %4403 = vmatpush3.bf16.msra.mxu0 %v4510_v35 }
 0xd03   :  { %4404 = vmatprep.subr.bf16.mxu0 %v5089_v39 }
 0xd06   :  { %4405 = vmatpush3.bf16.msra.mxu0 %v4511_v48 }
 0xd07   :  { %4406 = vmatprep.subr.bf16.mxu0 %v5089_v39 }
 0xd0a   :  { %4407 = vmatpush3.bf16.msra.mxu0 %v4512_v50 }
 0xdc3   :  { %v2474_v53 = vpop.f32.mrb[44].mxu1 }
 0xdc4   :  { %v2532_v47 = vcombine.high %v2474_v53, %v2474_v53  ;;  %v2540_v51 = vmul.f32 %v2474_v53, %v4971_v1  ;;  %v4384_v56 = vpop.f32.mrb[45].mxu1  ;;  %v5431_v53 = vcombine.high %v5402_v33, %v5402_v33 }
 0xdc5   :  { %v2477_v19 = vpop.f32.mrb[46].mxu1 }
 0xdc6   :  { %v2541_v6 = vmul.f32 %v2532_v47, %v4974_v4  ;;  %v2533_v59 = vcombine.high %v2477_v19, %v2477_v19  ;;  %v2542_v37 = vmul.f32 %v2477_v19, %v4977_v10  ;;  %v4385_v34 = vpop.f32.mrb[47].mxu1  ;;  %v2548_v15 = vsel %vm1407_vm5, %v2540_v51, 0.0 }
 0xdc7   :  { %v5368_v10 = vrot.slane %v4988_v24, %v5071_v11  ;;  %v5377_v24 = vcombine.high %v5364_v5, %v5364_v5 }
 0xdc8   :  { %v2549_v57 = vsel %vm1407_vm5, %v2541_v6, 0.0  ;;  %v2543_v2 = vmul.f32 %v2533_v59, %v4984_v16  ;;  %v2551_v1 = vsel %vm1407_vm5, %v2542_v37, 0.0 }
 0xdc9   :  { %v2550_v3 = vadd.f32 %v2549_v57, %v2548_v15  ;;  %v2705_v54 = vcombine.low %v5364_v5, %v5377_v24 }
 0xdca   :  { %v2553_v13 = vsel %vm1407_vm5, %v2543_v2, 0.0 }
 0xdcb   :  { %v2552_v4 = vadd.f32 %v2551_v1, %v2550_v3  ;;  %v2521_v0 = vpop.f32.mrb[48].mxu1  ;;  %v2719_v48 = vrot.slane %v2705_v54, %v5071_v11 }
 0xdcc   :  { %v2534_v14 = vcombine.high %v2521_v0, %v2521_v0  ;;  %v2544_v23 = vmul.f32 %v2521_v0, %v4991_v25  ;;  %v4390_v20 = vpop.f32.mrb[49].mxu1 }
 0xdcd   :  { %v2554_v60 = vadd.f32 %v2553_v13, %v2552_v4  ;;  %v2524_v16 = vpop.f32.mrb[50].mxu1 }
 0xdce   :  { %v2545_v17 = vmul.f32 %v2534_v14, %v4994_v36  ;;  %v2535_v31 = vcombine.high %v2524_v16, %v2524_v16  ;;  %v2546_v9 = vmul.f32 %v2524_v16, %v4997_v38  ;;  %v4391_v22 = vpop.f32.mrb[51].mxu1  ;;  %v2555_v27 = vsel %vm1407_vm5, %v2544_v23, 0.0 }
 0xdcf   :  { %v2564_v21 = vrot.slane %v2554_v60, 2  ;;  %v5384_v36 = vcombine.high %v5368_v10, %v5368_v10  ;;  %v2632_v38 = vcombine.high %v5006_v46, %v5006_v46  ;;  %v2569_v46 = vrot.slane %v4874_v7, 6 }
 0xdd0   :  { %v2556_v25 = vsel %vm1407_vm5, %v2545_v17, 0.0  ;;  %v2547_v58 = vmul.f32 %v2535_v31, %v5003_v42  ;;  %v2558_v43 = vsel %vm1407_vm5, %v2546_v9, 0.0 }
 0xdd1   :  { %v2572_v55 = vsel %vm1984_vm8, %v5221_v18, %v2564_v21  ;;  %v2574_v32 = vsel %vm644_vm1, %v2564_v21, %v2568_v52  ;;  %v2557_v12 = vadd.f32 %v2556_v25, %v2555_v27  ;;  %v2704_v61 = vcombine.low %v5368_v10, %v5384_v36 }
 0xdd2   :  { %v2599_v30 = vcombine.high %v2572_v55, %v2572_v55  ;;  %v5392_v41 = vrot.slane %v2572_v55, %v5071_v11  ;;  %v5396_v42 = vrot.slane %v2574_v32, %v5071_v11  ;;  %v2616_v26 = vcombine.high %v2574_v32, %v2574_v32 }
 0xdd3   :  { %v2559_v44 = vadd.f32 %v2558_v43, %v2557_v12  ;;  %v2560_v8 = vsel %vm1407_vm5, %v2547_v58, 0.0  ;;  %v5415_v29 = vrot.slane %v2632_v38, %v5071_v11  ;;  %v2712_v19 = vrot.slane %v2704_v61, %v5071_v11 }
 0xdd4   :  { %v5405_v18 = vrot.slane %v2599_v30, %v5071_v11  ;;  %v5410_v40 = vcombine.high %v5392_v41, %v5392_v41  ;;  %v5427_v50 = vcombine.high %v5396_v42, %v5396_v42  ;;  %v5436_v47 = vrot.slane %v2616_v26, %v5071_v11 }
 0xdd5   :  { %v2561_v45 = vadd.f32 %v2560_v8, %v2559_v44  ;;  %v5444_v6 = vcombine.high %v5415_v29, %v5415_v29  ;;  %v2720_v15 = vcombine.low %v2712_v19, %v2719_v48  ;;  %v2755_v57 = vcombine.low %v5431_v53, %v5415_v29 }
 0xdd6   :  { %v5420_v49 = vcombine.high %v5405_v18, %v5405_v18  ;;  %v2721_v28 = vcombine.low %v5392_v41, %v5410_v40  ;;  %v2739_v3 = vcombine.low %v5436_v47, %v5402_v33 }
 0xdd7   :  { %v2565_v35 = vrot.slane %v2561_v45, 2  ;;  %v2763_v20 = vrot.slane %v2755_v57, %v5071_v11 }
 0xdd8   :  { %v2722_v7 = vcombine.low %v5405_v18, %v5420_v49  ;;  %v2729_v34 = vrot.slane %v2721_v28, %v5071_v11  ;;  %v2753_v16 = vrot.slane %v2739_v3, %v5071_v11 }
 0xdd9   :  { %v2573_v51 = vsel %vm1984_vm8, %v5241_v62, %v2565_v35  ;;  %v2575_v56 = vsel %vm644_vm1, %v2565_v35, %v2569_v46  ;;  %v2738_v62 = vcombine.low %v5396_v42, %v5427_v50 }
 0xdda   :  { %v2649_v59 = vcombine.high %v2573_v51, %v2573_v51  ;;  %v5447_v37 = vrot.slane %v2573_v51, %v5071_v11  ;;  %v2736_v63 = vrot.slane %v2722_v7, %v5071_v11  ;;  %v5470_v60 = vrot.slane %v2575_v56, %v5071_v11 }
 0xddb   :  { %v2746_v23 = vrot.slane %v2738_v62, %v5071_v11  ;;  %v2666_v31 = vcombine.high %v2575_v56, %v2575_v56 }
 0xddc   :  { %v2737_v2 = vcombine.low %v2729_v34, %v2736_v63  ;;  %v2756_v1 = vcombine.low %v5444_v6, %v5447_v37  ;;  %v5460_v4 = vrot.slane %v2649_v59, %v5071_v11  ;;  %v5475_v17 = vcombine.high %v5447_v37, %v5447_v37 }
 0xddd   :  { %v2754_v21 = vcombine.low %v2746_v23, %v2753_v16  ;;  %v5482_v52 = vrot.slane %v2666_v31, %v5071_v11  ;;  %v5486_v27 = vcombine.high %v5470_v60, %v5470_v60 }
 0xdde   :  { %v2803_v0 = vpack.c.bf16 %v2737_v2, %v2720_v15  ;;  %v2770_v13 = vrot.slane %v2756_v1, %v5071_v11  ;;  %v5465_v14 = vcombine.high %v5460_v4, %v5460_v4  ;;  %v2772_v25 = vcombine.low %v5475_v17, %v5460_v4 }
 0xddf   :  { %5880 = vst [vmem:[#allocation5_spill] sm:$0xff] %v5482_v52  ;;  %v2789_v32 = vcombine.low %v5486_v27, %v5482_v52 }
 0xde0   :  { %4409 = vmatmul.mubr.bf16.vlgmr.msra.gmra.mrb[20].mxu0 %v2803_v0  ;;  %v2771_v9 = vcombine.low %v2763_v20, %v2770_v13  ;;  %v2773_v22 = vcombine.low %v5465_v14, %v5470_v60  ;;  %v2780_v55 = vrot.slane %v2772_v25, %v5071_v11 }
 0xde1   :  { %4412 = vmatprep.mubr.msk.bf16.mxu0 %vm4605_vm0, %v5089_v39  ;;  %v2796_v30 = vrot.slane %v2789_v32, %v5071_v11 }
 0xde2   :  { %v2804_v58 = vpack.c.bf16 %v2771_v9, %v2754_v21  ;;  %v2787_v38 = vrot.slane %v2773_v22, %v5071_v11 }
 0xde4   :  { %v2788_v12 = vcombine.low %v2780_v55, %v2787_v38 }
 0xde6   :  { %v2805_v43 = vpack.c.bf16 %v2796_v30, %v2788_v12 }
 0xde8   :  { %4413 = vmatmul.mubr.bf16.gmra.mrb[24].mxu0 %v2804_v58 }
 0xde9   :  { %4416 = vmatprep.mubr.msk.bf16.mxu0 %vm4605_vm0, %v5089_v39 }
 0xdf0   :  { %4417 = vmatmul.mubr.bf16.gmra.mrb[28].mxu0 %v2805_v43 }
 0xeb3   :  { %v2904_v44 = vpop.f32.mrb[20].mxu0 }
 0xeb4   :  { %v2933_v54 = vcombine.high %v2904_v44, %v2904_v44  ;;  %v5498_v26 = vrot.slane %v2904_v44, %v5071_v11  ;;  %v4410_v8 = vpop.f32.mrb[21].mxu0 }
 0xeb5   :  { %v2907_v45 = vpop.f32.mrb[22].mxu0 }
 0xeb6   :  { %v5501_v61 = vrot.slane %v2933_v54, %v5071_v11  ;;  %v5505_v46 = vcombine.high %v5498_v26, %v5498_v26  ;;  %v2950_v39 = vcombine.high %v2907_v45, %v2907_v45  ;;  %v4411_v28 = vpop.f32.mrb[23].mxu0  ;;  %v5517_v51 = vrot.slane %v2907_v45, %v5071_v11 }
 0xeb8   :  { %v5509_v35 = vcombine.high %v5501_v61, %v5501_v61  ;;  %v5512_v48 = vrot.slane %v2950_v39, %v5071_v11  ;;  %v3048_v7 = vcombine.low %v5498_v26, %v5505_v46  ;;  %v5531_v57 = vcombine.high %v5517_v51, %v5517_v51 }
 0xeba   :  { %v3049_v56 = vcombine.low %v5501_v61, %v5509_v35  ;;  %v5523_v19 = vcombine.high %v5512_v48, %v5512_v48  ;;  %v3056_v3 = vrot.slane %v3048_v7, %v5071_v11  ;;  %v3065_v58 = vcombine.low %v5517_v51, %v5531_v57 }
 0xebb   :  { %v2912_v59 = vpop.f32.mrb[24].mxu0 }
 0xebc   :  { %v2967_v34 = vcombine.high %v2912_v59, %v2912_v59  ;;  %v5526_v63 = vrot.slane %v2912_v59, %v5071_v11  ;;  %v4414_v15 = vpop.f32.mrb[25].mxu0  ;;  %v3063_v62 = vrot.slane %v3049_v56, %v5071_v11  ;;  %v3066_v31 = vcombine.low %v5512_v48, %v5523_v19 }
 0xebd   :  { %v2915_v2 = vpop.f32.mrb[26].mxu0  ;;  %v3073_v7 = vrot.slane %v3065_v58, %v5071_v11 }
 0xebe   :  { %v5535_v1 = vrot.slane %v2967_v34, %v5071_v11  ;;  %v5539_v0 = vcombine.high %v5526_v63, %v5526_v63  ;;  %v2984_v13 = vcombine.high %v2915_v2, %v2915_v2  ;;  %v5542_v23 = vrot.slane %v2915_v2, %v5071_v11  ;;  %v4415_v20 = vpop.f32.mrb[27].mxu0 }
 0xebf   :  { %v3064_v16 = vcombine.low %v3056_v3, %v3063_v62  ;;  %v3080_v43 = vrot.slane %v3066_v31, %v5071_v11 }
 0xec0   :  { %v3082_v9 = vcombine.low %v5526_v63, %v5539_v0  ;;  %v5550_v22 = vcombine.high %v5535_v1, %v5535_v1  ;;  %v5553_v21 = vrot.slane %v2984_v13, %v5071_v11  ;;  %v5557_v25 = vcombine.high %v5542_v23, %v5542_v23 }
 0xec1   :  { %v3154_v38 = vsel %vm637_vm4, %v3064_v16, -inf  ;;  %v3096_v32 = vrot.slane %v5535_v1, %v5071_v11  ;;  %v3081_v2 = vcombine.low %v3073_v7, %v3080_v43 }
 0xec2   :  { %3155 = vmax.xlane.f32.xlu0 %v3154_v38  ;;  %v3089_v55 = vrot.slane %v3082_v9, %v5071_v11  ;;  %v3098_v12 = vcombine.low %v5550_v22, %v5542_v23  ;;  %v3099_v44 = vcombine.low %v5557_v25, %v5553_v21  ;;  %v5589_v20 = vcombine.high %v5553_v21, %v5553_v21 }
 0xec3   :  { %v2920_v30 = vpop.f32.mrb[28].mxu0 }
 0xec4   :  { %v3001_v54 = vcombine.high %v2920_v30, %v2920_v30  ;;  %v5571_v8 = vrot.slane %v2920_v30, %v5071_v11  ;;  %v4418_v45 = vpop.f32.mrb[29].mxu0  ;;  %v3097_v39 = vcombine.low %v3089_v55, %v3096_v32  ;;  %v3106_v3 = vrot.slane %v3098_v12, %v5071_v11 }
 0xec5   :  { %v2923_v28 = vpop.f32.mrb[30].mxu0  ;;  %v3113_v13 = vrot.slane %v3099_v44, %v5071_v11  ;;  %v3157_v55 = vsel %vm637_vm4, %v3081_v2, -inf }
 0xec6   :  { %v5575_v56 = vrot.slane %v3001_v54, %v5071_v11  ;;  %v5579_v59 = vcombine.high %v5571_v8, %v5571_v8  ;;  %v5582_v34 = vrot.slane %v2923_v28, %v5071_v11  ;;  %v4419_v15 = vpop.f32.mrb[31].mxu0  ;;  %v3161_v62 = vsel %vm3160_vm12, %v3097_v39, -inf }
 0xec7   :  { %3162 = vmax.xlane.f32.xlu1 %v3161_v62  ;;  %v3115_v58 = vcombine.low %v5589_v20, %v5571_v8  ;;  %v3114_v32 = vcombine.low %v3106_v3, %v3113_v13 }
 0xec8   :  { %v5593_v16 = vcombine.high %v5575_v56, %v5575_v56  ;;  %v5597_v31 = vcombine.high %v5582_v34, %v5582_v34  ;;  %v3116_v9 = vcombine.low %v5579_v59, %v5575_v56 }
 0xec9   :  { %v3123_v54 = vrot.slane %v3115_v58, %v5071_v11  ;;  %v3164_v45 = vsel %vm637_vm4, %v3114_v32, -inf }
 0xeca   :  { %v3132_v38 = vcombine.low %v5593_v16, %v5582_v34  ;;  %v3146_v30 = vrot.slane %v5597_v31, %v5071_v11  ;;  %v3130_v43 = vrot.slane %v3116_v9, %v5071_v11 }
 0xecb   :  { %3158 = vmax.xlane.f32.xlu1 %v3157_v55 }
 0xecc   :  { %v3139_v12 = vrot.slane %v3132_v38, %v5071_v11  ;;  %v3131_v28 = vcombine.low %v3123_v54, %v3130_v43 }
 0xece   :  { %v3147_v44 = vcombine.low %v3139_v12, %v3146_v30  ;;  %v3167_v7 = vsel %vm637_vm4, %v3131_v28, -inf }
 0xecf   :  { %3165 = vmax.xlane.f32.xlu1 %v3164_v45 }
 0xed0   :  { %v3170_v39 = vsel %vm3160_vm12, %v3147_v44, -inf }
 0xed1   :  { %3171 = vmax.xlane.f32.xlu0 %v3170_v39 }
 0xed5   :  { %3168 = vmax.xlane.f32.xlu0 %v3167_v7 }
 0xf4f   :  { %v3156_v62 = vpop.xlane.xlu0 %3155 }
 0xf54   :  { %v3163_v15 = vpop.xlane.xlu1 %3162 }
 0xf55   :  { %v3173_v2 = vsel %vm1984_vm8, %v3163_v15, -inf }
 0xf56   :  { %v3174_v3 = vmax.f32 %v3156_v62, %v3173_v2 }
 0xf58   :  { %v3159_v13 = vpop.xlane.xlu1 %3158 }
 0xf59   :  { %v3175_v9 = vmax.f32 %v3174_v3, %v3159_v13 }
 0xf5b   :  { %v3176_v38 = vrot.slane %v3175_v9, 4 }
 0xf5c   :  { %v3166_v12 = vpop.xlane.xlu1 %3165 }
 0xf5d   :  { %v3177_v55 = vmax.f32 %v3175_v9, %v3176_v38 }
 0xf5e   :  { %v3172_v58 = vpop.xlane.xlu0 %3171 }
 0xf5f   :  { %v3182_v32 = vsel %vm1984_vm8, %v3172_v58, -inf  ;;  %v3178_v30 = vrot.slane %v3177_v55, 2 }
 0xf60   :  { %v3183_v44 = vmax.f32 %v3166_v12, %v3182_v32 }
 0xf61   :  { %v3179_v43 = vmax.f32 %v3177_v55, %v3178_v30 }
 0xf62   :  { %v3169_v54 = vpop.xlane.xlu0 %3168 }
 0xf63   :  { %v3184_v45 = vmax.f32 %v3183_v44, %v3169_v54  ;;  %v3180_v39 = vrot.slane %v3179_v43, 1 }
 0xf65   :  { %v3185_v28 = vrot.slane %v3184_v45, 4  ;;  %v3181_v7 = vmax.f32 %v3179_v43, %v3180_v39 }
 0xf67   :  { %v3186_v52 = vmax.f32 %v3184_v45, %v3185_v28  ;;  %v3191_v15 = vsub.f32 %v5498_v26, %v3181_v7  ;;  %v3192_v62 = vsub.f32 %v5505_v46, %v3181_v7  ;;  %v3193_v2 = vsub.f32 %v5501_v61, %v3181_v7 }
 0xf68   :  { %v3194_v3 = vsub.f32 %v5509_v35, %v3181_v7  ;;  %v3195_v9 = vsub.f32 %v5517_v51, %v3181_v7  ;;  %v3196_v38 = vsub.f32 %v5531_v57, %v3181_v7  ;;  %v3197_v32 = vsub.f32 %v5512_v48, %v3181_v7 }
 0xf69   :  { %v3187_v13 = vrot.slane %v3186_v52, 2  ;;  %v3213_v55 = vmul.f32 1.442695, %v3191_v15  ;;  %v3215_v58 = vmul.f32 1.442695, %v3192_v62  ;;  %v3198_v26 = vsub.f32 %v5523_v19, %v3181_v7 }
 0xf6a   :  { %v3217_v12 = vmul.f32 1.442695, %v3193_v2  ;;  %v3219_v44 = vmul.f32 1.442695, %v3194_v3  ;;  %v3221_v46 = vmul.f32 1.442695, %v3195_v9  ;;  %v3199_v61 = vsub.f32 %v5526_v63, %v3181_v7 }
 0xf6b   :  { %v3188_v30 = vmax.f32 %v3186_v52, %v3187_v13  ;;  %4539 = vpow2.f32 %v3213_v55  ;;  %v3223_v35 = vmul.f32 1.442695, %v3196_v38  ;;  %v3200_v51 = vsub.f32 %v5539_v0, %v3181_v7 }
 0xf6c   :  { %4541 = vpow2.f32 %v3215_v58  ;;  %v3225_v57 = vmul.f32 1.442695, %v3197_v32  ;;  %v3201_v54 = vsub.f32 %v5535_v1, %v3181_v7  ;;  %v3227_v48 = vmul.f32 1.442695, %v3198_v26 }
 0xf6d   :  { %v3189_v43 = vrot.slane %v3188_v30, 1  ;;  %4543 = vpow2.f32 %v3217_v12  ;;  %v3229_v52 = vmul.f32 1.442695, %v3199_v61  ;;  %v3231_v39 = vmul.f32 1.442695, %v3200_v51 }
 0xf6e   :  { %4545 = vpow2.f32 %v3219_v44  ;;  %v3233_v15 = vmul.f32 1.442695, %v3201_v54 }
 0xf6f   :  { %v3190_v45 = vmax.f32 %v3188_v30, %v3189_v43  ;;  %4547 = vpow2.f32 %v3221_v46 }
 0xf70   :  { %4549 = vpow2.f32 %v3223_v35 }
 0xf71   :  { %v3206_v19 = vsub.f32 %v5589_v20, %v3190_v45  ;;  %v3207_v63 = vsub.f32 %v5571_v8, %v3190_v45  ;;  %v3208_v28 = vsub.f32 %v5579_v59, %v3190_v45  ;;  %4551 = vpow2.f32 %v3225_v57 }
 0xf72   :  { %v3209_v0 = vsub.f32 %v5575_v56, %v3190_v45  ;;  %4553 = vpow2.f32 %v3227_v48  ;;  %v3202_v1 = vsub.f32 %v5550_v22, %v3190_v45  ;;  %v3203_v2 = vsub.f32 %v5542_v23, %v3190_v45 }
 0xf73   :  { %v3243_v62 = vmul.f32 1.442695, %v3206_v19  ;;  %4555 = vpow2.f32 %v3229_v52  ;;  %v3245_v7 = vmul.f32 1.442695, %v3207_v63  ;;  %v3247_v3 = vmul.f32 1.442695, %v3208_v28 }
 0xf74   :  { %4557 = vpow2.f32 %v3231_v39  ;;  %v3204_v20 = vsub.f32 %v5557_v25, %v3190_v45  ;;  %v3249_v8 = vmul.f32 1.442695, %v3209_v0  ;;  %v3205_v59 = vsub.f32 %v5553_v21, %v3190_v45 }
 0xf75   :  { %v5634_v13 = vpop.eup %4539  ;;  %4559 = vpow2.f32 %v3233_v15  ;;  %v3235_v56 = vmul.f32 1.442695, %v3202_v1  ;;  %v3210_v22 = vsub.f32 %v5593_v16, %v3190_v45  ;;  %v3237_v55 = vmul.f32 1.442695, %v3203_v2 }
 0xf76   :  { %v5637_v9 = vpop.eup %4541  ;;  %4561 = vpow2.f32 %v3243_v62  ;;  %v3211_v25 = vsub.f32 %v5582_v34, %v3190_v45  ;;  %v3239_v12 = vmul.f32 1.442695, %v3204_v20  ;;  %v3212_v21 = vsub.f32 %v5597_v31, %v3190_v45 }
 0xf77   :  { %v5640_v38 = vpop.eup %4543  ;;  %v3279_v23 = vcombine.low %v5634_v13, %v5637_v9  ;;  %4563 = vpow2.f32 %v3245_v7  ;;  %v3241_v44 = vmul.f32 1.442695, %v3205_v59  ;;  %v3251_v46 = vmul.f32 1.442695, %v3210_v22 }
 0xf78   :  { %v5645_v58 = vpop.eup %4545  ;;  %4565 = vpow2.f32 %v3247_v3  ;;  %v3253_v43 = vmul.f32 1.442695, %v3211_v25  ;;  %v3255_v51 = vmul.f32 1.442695, %v3212_v21 }
 0xf79   :  { %v5648_v32 = vpop.eup %4547  ;;  %v3280_v16 = vcombine.low %v5640_v38, %v5645_v58  ;;  %v3287_v30 = vrot.slane %v3279_v23, %v5071_v11  ;;  %4567 = vpow2.f32 %v3249_v8 }
 0xf7a   :  { %v5653_v26 = vpop.eup %4549  ;;  %4569 = vpow2.f32 %v3235_v56 }
 0xf7b   :  { %v5655_v34 = vpop.eup %4551  ;;  %v3294_v61 = vrot.slane %v3280_v16, %v5071_v11  ;;  %v3296_v31 = vcombine.low %v5648_v32, %v5653_v26  ;;  %4571 = vpow2.f32 %v3237_v55 }
 0xf7c   :  { %v5660_v35 = vpop.eup %4553  ;;  %4573 = vpow2.f32 %v3239_v12 }
 0xf7d   :  { %v5662_v57 = vpop.eup %4555  ;;  %v3295_v54 = vcombine.low %v3287_v30, %v3294_v61  ;;  %v3297_v45 = vcombine.low %v5655_v34, %v5660_v35  ;;  %v3304_v48 = vrot.slane %v3296_v31, %v5071_v11  ;;  %4575 = vpow2.f32 %v3241_v44 }
 0xf7e   :  { %v5667_v52 = vpop.eup %4557  ;;  %4577 = vpow2.f32 %v3251_v46 }
 0xf7f   :  { %v5669_v39 = vpop.eup %4559  ;;  %v3385_v19 = vsel %vm637_vm4, %v3295_v54, 0.0  ;;  %v3311_v63 = vrot.slane %v3297_v45, %v5071_v11  ;;  %v3313_v28 = vcombine.low %v5662_v57, %v5667_v52  ;;  %4579 = vpow2.f32 %v3253_v43 }
 0xf80   :  { %v5675_v15 = vpop.eup %4561  ;;  %3386 = vadd.xlane.f32.xlu1 %v3385_v19  ;;  %4581 = vpow2.f32 %v3255_v51  ;;  %v3327_v7 = vrot.slane %v5669_v39, %v5071_v11 }
 0xf81   :  { %v5677_v0 = vpop.eup %4563  ;;  %v3312_v62 = vcombine.low %v3304_v48, %v3311_v63  ;;  %v3320_v1 = vrot.slane %v3313_v28, %v5071_v11 }
 0xf82   :  { %v5682_v2 = vpop.eup %4565  ;;  %v3346_v3 = vcombine.low %v5675_v15, %v5677_v0 }
 0xf83   :  { %v5686_v20 = vpop.eup %4567  ;;  %v3388_v8 = vsel %vm637_vm4, %v3312_v62, 0.0  ;;  %v3328_v59 = vcombine.low %v3320_v1, %v3327_v7 }
 0xf84   :  { %v5689_v56 = vpop.eup %4569  ;;  %3389 = vadd.xlane.f32.xlu0 %v3388_v8  ;;  %v3347_v22 = vcombine.low %v5682_v2, %v5686_v20  ;;  %v3354_v23 = vrot.slane %v3346_v3, %v5071_v11  ;;  %v3570_v3 = vld [vmem:[%s5876_s7] sm:$0x3] }
 0xf85   :  { %v5694_v55 = vpop.eup %4571  ;;  %v3391_v25 = vsel %vm3160_vm12, %v3328_v59, 0.0  ;;  %v3581_v8 = vsel %vm644_vm1, %v3570_v3, 0 }
 0xf86   :  { %v5697_v12 = vpop.eup %4573  ;;  %3392 = vadd.xlane.f32.xlu1 %v3391_v25  ;;  %v3361_v21 = vrot.slane %v3347_v22, %v5071_v11  ;;  %v3329_v16 = vcombine.low %v5689_v56, %v5694_v55  ;;  %4421 = vmatpush3.bf16.msra.mxu1 %v3581_v8 }
 0xf87   :  { %v5702_v30 = vpop.eup %4575 }
 0xf88   :  { %v5704_v44 = vpop.eup %4577  ;;  %v3362_v46 = vcombine.low %v3354_v23, %v3361_v21  ;;  %v3330_v61 = vcombine.low %v5697_v12, %v5702_v30  ;;  %v3337_v31 = vrot.slane %v3329_v16, %v5071_v11 }
 0xf89   :  { %v5709_v43 = vpop.eup %4579 }
 0xf8a   :  { %v5711_v51 = vpop.eup %4581  ;;  %v3397_v54 = vsel %vm637_vm4, %v3362_v46, 0.0  ;;  %v3344_v45 = vrot.slane %v3330_v61, %v5071_v11  ;;  %v3363_v48 = vcombine.low %v5704_v44, %v5709_v43 }
 0xf8b   :  { %3398 = vadd.xlane.f32.xlu1 %v3397_v54  ;;  %v3377_v28 = vrot.slane %v5711_v51, %v5071_v11 }
 0xf8c   :  { %v3345_v19 = vcombine.low %v3337_v31, %v3344_v45  ;;  %v3370_v63 = vrot.slane %v3363_v48, %v5071_v11 }
 0xf8e   :  { %v3394_v62 = vsel %vm637_vm4, %v3345_v19, 0.0  ;;  %v3378_v1 = vcombine.low %v3370_v63, %v3377_v28 }
 0xf8f   :  { %3395 = vadd.xlane.f32.xlu0 %v3394_v62 }
 0xf90   :  { %v3400_v7 = vsel %vm3160_vm12, %v3378_v1, 0.0 }
 0xf93   :  { %3401 = vadd.xlane.f32.xlu0 %v3400_v7 }
0x100d   :  { %v3387_v59 = vpop.xlane.xlu1 %3386 }
0x1011   :  { %v3390_v22 = vpop.xlane.xlu0 %3389 }
0x1012   :  { %v3403_v23 = vadd.f32 %v3390_v22, %v3387_v59 }
0x1013   :  { %v3393_v25 = vpop.xlane.xlu1 %3392 }
0x1014   :  { %v3404_v21 = vsel %vm1984_vm8, %v3393_v25, 0.0 }
0x1015   :  { %v3405_v16 = vadd.f32 %v3404_v21, %v3403_v23 }
0x1017   :  { %v3406_v46 = vrot.slane %v3405_v16, 4 }
0x1018   :  { %v3399_v48 = vpop.xlane.xlu1 %3398 }
0x1019   :  { %v3407_v61 = vadd.f32 %v3406_v46, %v3405_v16 }
0x101b   :  { %v3408_v31 = vrot.slane %v3407_v61, 2 }
0x101c   :  { %v3396_v54 = vpop.xlane.xlu0 %3395 }
0x101d   :  { %v3409_v45 = vadd.f32 %v3408_v31, %v3407_v61  ;;  %v3412_v63 = vadd.f32 %v3399_v48, %v3396_v54 }
0x101f   :  { %v3410_v19 = vrot.slane %v3409_v45, 1 }
0x1020   :  { %v3402_v28 = vpop.xlane.xlu0 %3401 }
0x1021   :  { %v3411_v62 = vadd.f32 %v3410_v19, %v3409_v45  ;;  %v3413_v1 = vsel %vm1984_vm8, %v3402_v28, 0.0 }
0x1022   :  { %v3414_v7 = vadd.f32 %v3413_v1, %v3412_v63 }
0x1023   :  { %4583 = vrcp.f32 %v3411_v62 }
0x1024   :  { %v3415_v3 = vrot.slane %v3414_v7, 4 }
0x1026   :  { %v3416_v8 = vadd.f32 %v3415_v3, %v3414_v7 }
0x1028   :  { %v3417_v59 = vrot.slane %v3416_v8, 2 }
0x102a   :  { %v3418_v22 = vadd.f32 %v3417_v59, %v3416_v8 }
0x102c   :  { %v3419_v25 = vrot.slane %v3418_v22, 1 }
0x102d   :  { %v4584_v23 = vpop.eup %4583 }
0x102e   :  { %v3420_v21 = vadd.f32 %v3419_v25, %v3418_v22  ;;  %v3422_v16 = vmul.f32 %v4584_v23, %v5634_v13  ;;  %v3423_v46 = vmul.f32 %v4584_v23, %v5637_v9  ;;  %v3424_v61 = vmul.f32 %v4584_v23, %v5640_v38  ;;  %v4588_v22 = vld [vmem:[%s5878_s9 + $0x38] sm:$0xff] }
0x102f   :  { %v3425_v31 = vmul.f32 %v4584_v23, %v5645_v58  ;;  %v3426_v54 = vmul.f32 %v4584_v23, %v5648_v32  ;;  %v3427_v45 = vmul.f32 %v4584_v23, %v5653_v26  ;;  %v3428_v48 = vmul.f32 %v4584_v23, %v5655_v34 }
0x1030   :  { %4585 = vrcp.f32 %v3420_v21  ;;  %v3429_v19 = vmul.f32 %v4584_v23, %v5660_v35  ;;  %v3468_v63 = vcombine.low %v3422_v16, %v3423_v46  ;;  %v3430_v28 = vmul.f32 %v4584_v23, %v5662_v57 }
0x1031   :  { %v3469_v62 = vcombine.low %v3424_v61, %v3425_v31  ;;  %v3485_v13 = vcombine.low %v3426_v54, %v3427_v45  ;;  %v3431_v9 = vmul.f32 %v4584_v23, %v5667_v52  ;;  %v3432_v38 = vmul.f32 %v4584_v23, %v5669_v39 }
0x1032   :  { %v3476_v58 = vrot.slane %v3468_v63, %v5071_v11  ;;  %v3486_v1 = vcombine.low %v3428_v48, %v3429_v19 }
0x1033   :  { %v3483_v32 = vrot.slane %v3469_v62, %v5071_v11  ;;  %v3493_v26 = vrot.slane %v3485_v13, %v5071_v11  ;;  %v3502_v34 = vcombine.low %v3430_v28, %v3431_v9  ;;  %v3945_v57 = vrot.slane %v3432_v38, %v5071_v11 }
0x1034   :  { %v3500_v7 = vrot.slane %v3486_v1, %v5071_v11 }
0x1035   :  { %v3484_v35 = vcombine.low %v3476_v58, %v3483_v32  ;;  %v3510_v3 = vrot.slane %v3502_v34, %v5071_v11 }
0x1036   :  { %v3501_v8 = vcombine.low %v3493_v26, %v3500_v7 }
0x1037   :  { %4001 = vst.msk [vmem:[%s5878_s9 + $0xc] sm:$0xff] %vm637_vm4, %v3484_v35  ;;  %v3946_v52 = vcombine.low %v3510_v3, %v3945_v57 }
0x1038   :  { %v3567_v39 = vpack.c.bf16 %v3501_v8, %v3484_v35  ;;  %4002 = vst.msk [vmem:[%s5878_s9 + $0x14] sm:$0xff] %vm637_vm4, %v3501_v8 }
0x1039   :  { %4003 = vst.msk [vmem:[%s5878_s9 + $0x1c] sm:$0x3f] %vm3160_vm12, %v3946_v52 }
0x103a   :  { %v4586_v59 = vpop.eup %4585  ;;  %4423 = vmatmul.mubr.msk.bf16.vlgmr.msra.gmra.mrb[52].mxu1 %vm637_vm4, %v3567_v39 }
0x103b   :  { %4426 = vmatprep.mubr.msk.bf16.mxu1 %vm4605_vm0, %v4588_v22  ;;  %v3434_v25 = vmul.f32 %v4586_v59, %v5689_v56  ;;  %v3435_v23 = vmul.f32 %v4586_v59, %v5694_v55  ;;  %v3436_v21 = vmul.f32 %v4586_v59, %v5697_v12  ;;  %v3437_v16 = vmul.f32 %v4586_v59, %v5702_v30 }
0x103c   :  { %v3438_v46 = vmul.f32 %v4586_v59, %v5675_v15  ;;  %v3439_v61 = vmul.f32 %v4586_v59, %v5677_v0  ;;  %v3440_v31 = vmul.f32 %v4586_v59, %v5682_v2  ;;  %v3441_v54 = vmul.f32 %v4586_v59, %v5686_v20 }
0x103d   :  { %v3503_v45 = vcombine.low %v3432_v38, %v3434_v25  ;;  %v3519_v48 = vcombine.low %v3435_v23, %v3436_v21  ;;  %v3947_v19 = vcombine.low %v3434_v25, %v3435_v23  ;;  %v3948_v63 = vcombine.low %v3436_v21, %v3437_v16 }
0x103e   :  { %v3520_v28 = vcombine.low %v3437_v16, %v3438_v46  ;;  %v3442_v56 = vmul.f32 %v4586_v59, %v5704_v44  ;;  %v3443_v55 = vmul.f32 %v4586_v59, %v5709_v43  ;;  %v3444_v20 = vmul.f32 %v4586_v59, %v5711_v51 }
0x103f   :  { %v3517_v12 = vrot.slane %v3503_v45, %v5071_v11  ;;  %v3527_v30 = vrot.slane %v3519_v48, %v5071_v11  ;;  %v3955_v15 = vrot.slane %v3947_v19, %v5071_v11  ;;  %v3962_v0 = vrot.slane %v3948_v63, %v5071_v11 }
0x1040   :  { %v3534_v2 = vrot.slane %v3520_v28, %v5071_v11  ;;  %v3536_v62 = vcombine.low %v3439_v61, %v3440_v31  ;;  %v3537_v13 = vcombine.low %v3441_v54, %v3442_v56  ;;  %v3964_v58 = vcombine.low %v3438_v46, %v3439_v61 }
0x1041   :  { %v3518_v9 = vcombine.low %v3510_v3, %v3517_v12  ;;  %v3963_v38 = vcombine.low %v3955_v15, %v3962_v0  ;;  %v3965_v44 = vcombine.low %v3440_v31, %v3441_v54  ;;  %v3981_v26 = vcombine.low %v3442_v56, %v3443_v55 }
0x1042   :  { %v3535_v1 = vcombine.low %v3527_v30, %v3534_v2  ;;  %v3972_v43 = vrot.slane %v3964_v58, %v5071_v11  ;;  %v3544_v51 = vrot.slane %v3536_v62, %v5071_v11  ;;  %v3551_v7 = vrot.slane %v3537_v13, %v5071_v11 }
0x1043   :  { %4004 = vst.msk [vmem:[%s5878_s9 + $0x34] sm:$0xff] %vm637_vm4, %v3963_v38  ;;  %v3979_v32 = vrot.slane %v3965_v44, %v5071_v11  ;;  %v3988_v3 = vrot.slane %v3981_v26, %v5071_v11  ;;  %v3995_v57 = vrot.slane %v3444_v20, %v5071_v11  ;;  %v3553_v8 = vcombine.low %v3443_v55, %v3444_v20 }
0x1044   :  { %v3568_v34 = vpack.c.bf16 %v3535_v1, %v3518_v9  ;;  %v3552_v39 = vcombine.low %v3544_v51, %v3551_v7  ;;  %v5800_v23 = vstv %s4052_s16 }
0x1045   :  { %v3980_v35 = vcombine.low %v3972_v43, %v3979_v32  ;;  %v3996_v52 = vcombine.low %v3988_v3, %v3995_v57  ;;  %v3560_v59 = vrot.slane %v3553_v8, %v5071_v11 }
0x1046   :  { %4427 = vmatmul.mubr.msk.bf16.gmra.mrb[56].mxu1 %vm637_vm4, %v3568_v34 }
0x1047   :  { %4430 = vmatprep.mubr.msk.bf16.mxu1 %vm4605_vm0, %v4588_v22  ;;  %4005 = vst.msk [vmem:[%s5878_s9 + $0x3c] sm:$0xff] %vm637_vm4, %v3980_v35  ;;  %v3569_v25 = vpack.c.bf16 %v3560_v59, %v3552_v39 }
0x1048   :  { %4006 = vst.msk [vmem:[%s5878_s9 + $0x44] sm:$0x3f] %vm3160_vm12, %v3996_v52 }
0x104e   :  { %4431 = vmatmul.mubr.msk.bf16.gmra.mrb[60].mxu1 %vm637_vm4, %v3569_v25 }
0x110d   :  { %v3617_v22 = vpop.f32.mrb[52].mxu1 }
0x110e   :  { %v3641_v21 = vmul.f32 %v5800_v23, %v3617_v22  ;;  %v4424_v16 = vpop.f32.mrb[53].mxu1 }
0x110f   :  { %v3620_v46 = vpop.f32.mrb[54].mxu1 }
0x1110   :  { %v3647_v61 = vadd.f32 1.0, %v3641_v21  ;;  %v3642_v31 = vmul.f32 %v5800_v23, %v3620_v46  ;;  %v4425_v54 = vpop.f32.mrb[55].mxu1 }
0x1112   :  { %v3659_v45 = vcombine.high %v3647_v61, %v3647_v61  ;;  %v3666_v48 = vrot.slane %v3647_v61, %v5071_v11  ;;  %v3648_v19 = vadd.f32 1.0, %v3642_v31 }
0x1114   :  { %v3673_v63 = vrot.slane %v3659_v45, %v5071_v11  ;;  %v3674_v28 = vcombine.high %v3666_v48, %v3666_v48  ;;  %v3676_v56 = vcombine.high %v3648_v19, %v3648_v19  ;;  %v3683_v55 = vrot.slane %v3648_v19, %v5071_v11 }
0x1115   :  { %v3774_v30 = vmul.f32 %v3666_v48, %v5368_v10 }
0x1116   :  { %v3675_v12 = vcombine.high %v3673_v63, %v3673_v63  ;;  %v3775_v15 = vmul.f32 %v3674_v28, %v5384_v36  ;;  %v3690_v0 = vrot.slane %v3676_v56, %v5071_v11  ;;  %v3691_v2 = vcombine.high %v3683_v55, %v3683_v55 }
0x1117   :  { %v3776_v20 = vmul.f32 %v3673_v63, %v5364_v5  ;;  %v3778_v38 = vmul.f32 %v3683_v55, %v5392_v41 }
0x1118   :  { %v3777_v62 = vmul.f32 %v3675_v12, %v5377_v24  ;;  %v3818_v13 = vcombine.low %v3774_v30, %v3775_v15  ;;  %v3692_v9 = vcombine.high %v3690_v0, %v3690_v0  ;;  %v3779_v58 = vmul.f32 %v3691_v2, %v5410_v40 }
0x1119   :  { %v3625_v44 = vpop.f32.mrb[56].mxu1  ;;  %v3780_v43 = vmul.f32 %v3690_v0, %v5405_v18 }
0x111a   :  { %v3819_v1 = vcombine.low %v3776_v20, %v3777_v62  ;;  %v3781_v10 = vmul.f32 %v3692_v9, %v5420_v49  ;;  %v3643_v36 = vmul.f32 %v5800_v23, %v3625_v44  ;;  %v4428_v32 = vpop.f32.mrb[57].mxu1  ;;  %v3826_v26 = vrot.slane %v3818_v13, %v5071_v11 }
0x111b   :  { %v3835_v5 = vcombine.low %v3778_v38, %v3779_v58  ;;  %v3628_v34 = vpop.f32.mrb[58].mxu1 }
0x111c   :  { %v3833_v24 = vrot.slane %v3819_v1, %v5071_v11  ;;  %v3836_v51 = vcombine.low %v3780_v43, %v3781_v10  ;;  %v3649_v7 = vadd.f32 1.0, %v3643_v36  ;;  %v3644_v41 = vmul.f32 %v5800_v23, %v3628_v34  ;;  %v4429_v40 = vpop.f32.mrb[59].mxu1 }
0x111d   :  { %v3843_v35 = vrot.slane %v3835_v5, %v5071_v11 }
0x111e   :  { %v3834_v3 = vcombine.low %v3826_v26, %v3833_v24  ;;  %v3850_v18 = vrot.slane %v3836_v51, %v5071_v11  ;;  %v3693_v49 = vcombine.high %v3649_v7, %v3649_v7  ;;  %v3700_v57 = vrot.slane %v3649_v7, %v5071_v11 }
0x111f   :  { %v3650_v8 = vadd.f32 1.0, %v3644_v41 }
0x1120   :  { %3917 = vst [vmem:[%s5877_s8] sm:$0xff] %v3834_v3  ;;  %v3851_v52 = vcombine.low %v3843_v35, %v3850_v18  ;;  %v3707_v39 = vrot.slane %v3693_v49, %v5071_v11  ;;  %v3708_v59 = vcombine.high %v3700_v57, %v3700_v57  ;;  %v3782_v46 = vmul.f32 %v3700_v57, %v5396_v42 }
0x1121   :  { %v3710_v25 = vcombine.high %v3650_v8, %v3650_v8  ;;  %v3717_v22 = vrot.slane %v3650_v8, %v5071_v11  ;;  %v3633_v21 = vpop.f32.mrb[60].mxu1 }
0x1122   :  { %3918 = vst [vmem:[%s5877_s8 + $0x8] sm:$0xff] %v3851_v52  ;;  %v3709_v16 = vcombine.high %v3707_v39, %v3707_v39  ;;  %v3783_v61 = vmul.f32 %v3708_v59, %v5427_v50  ;;  %v3645_v31 = vmul.f32 %v5800_v23, %v3633_v21  ;;  %v4432_v54 = vpop.f32.mrb[61].mxu1  ;;  %v3784_v45 = vmul.f32 %v3707_v39, %v5436_v47 }
0x1123   :  { %v3724_v48 = vrot.slane %v3710_v25, %v5071_v11  ;;  %v3725_v19 = vcombine.high %v3717_v22, %v3717_v22  ;;  %v3636_v63 = vpop.f32.mrb[62].mxu1  ;;  %v3786_v42 = vmul.f32 %v3717_v22, %v5431_v53 }
0x1124   :  { %v3785_v28 = vmul.f32 %v3709_v16, %v5402_v33  ;;  %v3852_v56 = vcombine.low %v3782_v46, %v3783_v61  ;;  %v3651_v55 = vadd.f32 1.0, %v3645_v31  ;;  %v3646_v12 = vmul.f32 %v5800_v23, %v3636_v63  ;;  %v4433_v30 = vpop.f32.mrb[63].mxu1 }
0x1125   :  { %v3726_v15 = vcombine.high %v3724_v48, %v3724_v48  ;;  %v3787_v50 = vmul.f32 %v3725_v19, %v5415_v29  ;;  %v3788_v20 = vmul.f32 %v3724_v48, %v5444_v6 }
0x1126   :  { %v3853_v0 = vcombine.low %v3784_v45, %v3785_v28  ;;  %v3727_v2 = vcombine.high %v3651_v55, %v3651_v55  ;;  %v3734_v47 = vrot.slane %v3651_v55, %v5071_v11  ;;  %v3652_v33 = vadd.f32 1.0, %v3646_v12 }
0x1127   :  { %v3789_v62 = vmul.f32 %v3726_v15, %v5447_v37  ;;  %v3869_v13 = vcombine.low %v3786_v42, %v3787_v50  ;;  %v3860_v9 = vrot.slane %v3852_v56, %v5071_v11 }
0x1128   :  { %v3867_v23 = vrot.slane %v3853_v0, %v5071_v11  ;;  %v3741_v38 = vrot.slane %v3727_v2, %v5071_v11  ;;  %v3742_v58 = vcombine.high %v3734_v47, %v3734_v47  ;;  %v3750_v29 = vrot.slane %v3652_v33, %v5071_v11 }
0x1129   :  { %v3870_v53 = vcombine.low %v3788_v20, %v3789_v62  ;;  %v3790_v43 = vmul.f32 %v3734_v47, %v5475_v17  ;;  %v3877_v37 = vrot.slane %v3869_v13, %v5071_v11  ;;  %v5881_v17 = vld [vmem:[#allocation5_spill] sm:$0xff] }
0x112a   :  { %v3868_v44 = vcombine.low %v3860_v9, %v3867_v23  ;;  %v3743_v1 = vcombine.high %v3741_v38, %v3741_v38  ;;  %v3791_v6 = vmul.f32 %v3742_v58, %v5460_v4  ;;  %v3751_v36 = vcombine.high %v3750_v29, %v3750_v29 }
0x112b   :  { %v3884_v10 = vrot.slane %v3870_v53, %v5071_v11  ;;  %v3792_v32 = vmul.f32 %v3741_v38, %v5465_v14  ;;  %v3794_v24 = vmul.f32 %v3750_v29, %v5486_v27 }
0x112c   :  { %3919 = vst [vmem:[%s5877_s8 + $0x10] sm:$0xff] %v3868_v44  ;;  %v3793_v26 = vmul.f32 %v3743_v1, %v5470_v60  ;;  %v3886_v5 = vcombine.low %v3790_v43, %v3791_v6  ;;  %v3795_v51 = vmul.f32 %v3751_v36, %v5881_v17 }
0x112d   :  { %v3885_v34 = vcombine.low %v3877_v37, %v3884_v10 }
0x112e   :  { %v3887_v4 = vcombine.low %v3792_v32, %v3793_v26  ;;  %v3903_v7 = vcombine.low %v3794_v24, %v3795_v51  ;;  %v3894_v41 = vrot.slane %v3886_v5, %v5071_v11 }
0x112f   :  { %3920 = vst [vmem:[%s5877_s8 + $0x18] sm:$0xff] %v3885_v34 }
0x1130   :  { %v3901_v40 = vrot.slane %v3887_v4, %v5071_v11  ;;  %4056 = vst.sshfl [vmem:[%s5877_s8 + $0x28] sm:$0x33 pattern:$0x76325410] %v3903_v7 }
0x1132   :  { %v3902_v14 = vcombine.low %v3894_v41, %v3901_v40 }
0x1134   :  { %3921 = vst [vmem:[%s5877_s8 + $0x20] sm:$0xff] %v3902_v14 }
0x1135   :  { %4015 = vsyncpa [#allocation3], 1 }

</bundles_post_ra>
